<compile_context>
chip_gen: v5e
topology: v5e:2x2
jax: 0.10.0
libtpu: 0.0.40
codegen_flags: <defaults>
</compile_context>

<pallas_src>
import jax
import jax.numpy as jnp
from jax.experimental import pallas as pl
from jax.experimental.pallas import tpu as pltpu

NUM_FEATURES = 100
NUM_OUT = 28 * 28          # 784
HIDDEN = (256, 512, 1024)

OUT_PAD = 896              # 784 -> 896 = 7 * 128 lanes (unmasked stores)
MAX_TILE_B = 512           # max batch rows per grid step


def _round_up(x, m):
    return (x + m - 1) // m * m


def _leaky_relu(x, slope=0.2):
    return jnp.where(x > 0, x, slope * x)


def generator_kernel(x_ref,
                     w0_ref, b0_ref,
                     w1_ref, b1_ref,
                     w2_ref, b2_ref,
                     w3_ref, b3_ref,
                     out_ref):
    # layer0: Linear(100 -> 256) + LeakyReLU(0.2)   (bf16 inputs, f32 accum)
    h = jnp.dot(x_ref[...], w0_ref[...], preferred_element_type=jnp.float32)
    h = _leaky_relu(h + b0_ref[...])
    # layer1: Linear(256 -> 512) + LeakyReLU(0.2)
    h = jnp.dot(h.astype(jnp.bfloat16), w1_ref[...],
                preferred_element_type=jnp.float32)
    h = _leaky_relu(h + b1_ref[...])
    # layer2: Linear(512 -> 1024) + LeakyReLU(0.2)
    h = jnp.dot(h.astype(jnp.bfloat16), w2_ref[...],
                preferred_element_type=jnp.float32)
    h = _leaky_relu(h + b2_ref[...])
    # out: Linear(1024 -> 896pad) + Tanh, stored as bf16
    h = jnp.dot(h.astype(jnp.bfloat16), w3_ref[...],
                preferred_element_type=jnp.float32)
    out_ref[...] = jnp.tanh(h + b3_ref[...]).astype(out_ref.dtype)


def _pad_params(params):
    """Zero-pad the last layer to 896 output lanes (mathematically exact)."""
    (w0, b0), (w1, b1), (w2, b2), (w3, b3) = params
    w3p = jnp.pad(w3, ((0, 0), (0, OUT_PAD - NUM_OUT)))
    b3p = jnp.pad(b3, ((0, 0), (0, OUT_PAD - NUM_OUT)))
    return [(w0, b0), (w1, b1), (w2, b2), (w3p, b3p)]


@jax.jit
def generator_forward(x, params):
    """x: (B, 100) float32 (or bf16).

    params: list of 4 tuples (W, b); W has shape (in, out) in bfloat16
    (kernel computes y = x @ W + b, identical math to nn.Linear), b is (1, out)
    float32.  Returns (B, 784) bfloat16.
    """
    B = x.shape[0]
    # ~ceil(B/2) rows per step => >= 2 grid steps whenever B > 8 so the
    # "parallel" batch axis can shard across both v7x TensorCores.
    half = (B + 1) // 2
    tile_b = min(MAX_TILE_B, max(8, _round_up(half, 8)))
    b_pad = _round_up(B, tile_b)
    grid = (b_pad // tile_b,)

    x_bf16 = x.astype(jnp.bfloat16)
    if b_pad != B:
        x_bf16 = jnp.pad(x_bf16, ((0, b_pad - B), (0, 0)))

    padded = _pad_params(params)
    const_map = lambda i: (0, 0)          # weights/biases: resident, DMA'd once
    flat = []
    in_specs = [pl.BlockSpec((tile_b, NUM_FEATURES), lambda i: (i, 0))]
    for w, b in padded:
        flat.append(w)
        flat.append(b)
        in_specs.append(pl.BlockSpec(w.shape, const_map))
        in_specs.append(pl.BlockSpec(b.shape, const_map))
    out_spec = pl.BlockSpec((tile_b, OUT_PAD), lambda i: (i, 0))

    weight_bytes = sum(int(a.size) * a.dtype.itemsize for a in flat)
    flops = 2 * b_pad * (NUM_FEATURES * 256 + 256 * 512
                         + 512 * 1024 + 1024 * OUT_PAD)
    bytes_accessed = (weight_bytes
                      + int(x_bf16.size) * 2       # bf16 x
                      + b_pad * OUT_PAD * 2)       # bf16 out
    cost = pl.CostEstimate(flops=flops,
                           transcendentals=b_pad * OUT_PAD,
                           bytes_accessed=bytes_accessed)

    out = pl.pallas_call(
        generator_kernel,
        out_shape=jax.ShapeDtypeStruct((b_pad, OUT_PAD), jnp.bfloat16),
        grid=grid,
        in_specs=in_specs,
        out_specs=out_spec,
        compiler_params=pltpu.CompilerParams(
            dimension_semantics=("parallel",),
            vmem_limit_bytes=48 << 20,
        ),
        cost_estimate=cost,
    )(x_bf16, *flat)

    return out[:B, :NUM_OUT]


def init_params(key):
    """Deterministic init mimicking nn.Linear's U(-1/sqrt(in), 1/sqrt(in)).

    Weights are stored transposed vs. PyTorch, i.e. shape (in, out), and cast
    to bfloat16 (perf: halves weight DMA); biases stay float32.
    """
    dims = (NUM_FEATURES,) + HIDDEN + (NUM_OUT,)
    params = []
    for i in range(len(dims) - 1):
        fan_in, fan_out = dims[i], dims[i + 1]
        key, kw, kb = jax.random.split(key, 3)
        bound = 1.0 / float(fan_in) ** 0.5
        w = jax.random.uniform(kw, (fan_in, fan_out), jnp.float32, -bound, bound)
        b = jax.random.uniform(kb, (1, fan_out), jnp.float32, -bound, bound)
        params.append((w.astype(jnp.bfloat16), b))
    return params


def reference_forward(x, params):
    """Pure-JAX reference mirroring the kernel's bf16-input / f32-accum math."""
    h = x
    for i, (w, b) in enumerate(params):
        h = jnp.dot(h.astype(jnp.bfloat16), w,
                    preferred_element_type=jnp.float32) + b
        if i < len(params) - 1:
            h = jnp.where(h > 0, h, 0.2 * h)
        else:
            h = jnp.tanh(h)
    return h  # float32 (kernel additionally rounds the output to bf16)


if __name__ == "__main__":
    key = jax.random.PRNGKey(0)
    key, kx = jax.random.split(key)

    batch = 8
    x = jax.random.normal(kx, (batch, NUM_FEATURES), jnp.float32)
    params = init_params(key)

    out = generator_forward(x, params)
    out = jax.block_until_ready(out)

    ref = reference_forward(x, params)
    assert out.shape == (batch, NUM_OUT), out.shape
    assert out.dtype == jnp.bfloat16, out.dtype
    max_err = float(jnp.max(jnp.abs(out.astype(jnp.float32) - ref)))
    # bf16 output rounding of tanh values in [-1, 1] is <= ~8e-3.
    assert max_err < 2e-2, max_err

    print("KERNEL_OK")
</pallas_src>

<mosaic_0001>
module attributes {stable_mosaic.version = 11 : i64} {
  func.func @generator_kernel(%arg0: i32, %arg1: memref<8x100xbf16, #tpu.memory_space<vmem>>, %arg2: memref<100x256xbf16, #tpu.memory_space<vmem>>, %arg3: memref<1x256xf32, #tpu.memory_space<vmem>>, %arg4: memref<256x512xbf16, #tpu.memory_space<vmem>>, %arg5: memref<1x512xf32, #tpu.memory_space<vmem>>, %arg6: memref<512x1024xbf16, #tpu.memory_space<vmem>>, %arg7: memref<1x1024xf32, #tpu.memory_space<vmem>>, %arg8: memref<1024x896xbf16, #tpu.memory_space<vmem>>, %arg9: memref<1x896xf32, #tpu.memory_space<vmem>>, %arg10: memref<8x896xbf16, #tpu.memory_space<vmem>>) attributes {dimension_semantics = [#tpu.dimension_semantics<parallel>], iteration_bounds = array<i64: 1>, scalar_prefetch = 0 : i64, scratch_operands = 0 : i64, tpu.core_type = #tpu.core_type<tc>, window_params = [{transform_indices = @transform_0, window_bounds = array<i64: 8, 100>}, {pipeline_mode = #tpu.pipeline_mode<synchronous>, transform_indices = @transform_1, window_bounds = array<i64: 100, 256>}, {pipeline_mode = #tpu.pipeline_mode<synchronous>, transform_indices = @transform_2, window_bounds = array<i64: 1, 256>}, {pipeline_mode = #tpu.pipeline_mode<synchronous>, transform_indices = @transform_3, window_bounds = array<i64: 256, 512>}, {pipeline_mode = #tpu.pipeline_mode<synchronous>, transform_indices = @transform_4, window_bounds = array<i64: 1, 512>}, {pipeline_mode = #tpu.pipeline_mode<synchronous>, transform_indices = @transform_5, window_bounds = array<i64: 512, 1024>}, {pipeline_mode = #tpu.pipeline_mode<synchronous>, transform_indices = @transform_6, window_bounds = array<i64: 1, 1024>}, {pipeline_mode = #tpu.pipeline_mode<synchronous>, transform_indices = @transform_7, window_bounds = array<i64: 1024, 896>}, {pipeline_mode = #tpu.pipeline_mode<synchronous>, transform_indices = @transform_8, window_bounds = array<i64: 1, 896>}, {transform_indices = @transform_9, window_bounds = array<i64: 8, 896>}]} {
    %c0 = arith.constant 0 : index
    %c0_0 = arith.constant 0 : index
    %0 = vector.load %arg1[%c0, %c0_0] : memref<8x100xbf16, #tpu.memory_space<vmem>>, vector<8x100xbf16>
    %c0_1 = arith.constant 0 : index
    %c0_2 = arith.constant 0 : index
    %1 = vector.load %arg2[%c0_1, %c0_2] : memref<100x256xbf16, #tpu.memory_space<vmem>>, vector<100x256xbf16>
    %cst = arith.constant dense<0.000000e+00> : vector<8x256xf32>
    %2 = tpu.matmul %0, %1, %cst {dimension_numbers = #tpu.dot_dimension_numbers<[1], [0], [0], [1], [0, 0, 1, 1], [], []>} : vector<8x100xbf16>, vector<100x256xbf16>, vector<8x256xf32> -> vector<8x256xf32>
    %c0_3 = arith.constant 0 : index
    %c0_4 = arith.constant 0 : index
    %3 = vector.load %arg3[%c0_3, %c0_4] : memref<1x256xf32, #tpu.memory_space<vmem>>, vector<1x256xf32>
    %4 = vector.broadcast %3 : vector<1x256xf32> to vector<8x256xf32>
    %5 = arith.addf %2, %4 : vector<8x256xf32>
    %cst_5 = arith.constant 0.000000e+00 : f32
    %6 = vector.broadcast %cst_5 : f32 to vector<8x256xf32>
    %7 = arith.cmpf ogt, %5, %6 : vector<8x256xf32>
    %cst_6 = arith.constant 2.000000e-01 : f32
    %8 = vector.broadcast %cst_6 : f32 to vector<8x256xf32>
    %9 = arith.mulf %8, %5 : vector<8x256xf32>
    %10 = arith.select %7, %5, %9 : vector<8x256xi1>, vector<8x256xf32>
    %11 = arith.truncf %10 : vector<8x256xf32> to vector<8x256xbf16>
    %c0_7 = arith.constant 0 : index
    %c0_8 = arith.constant 0 : index
    %12 = vector.load %arg4[%c0_7, %c0_8] : memref<256x512xbf16, #tpu.memory_space<vmem>>, vector<256x512xbf16>
    %cst_9 = arith.constant dense<0.000000e+00> : vector<8x512xf32>
    %13 = tpu.matmul %11, %12, %cst_9 {dimension_numbers = #tpu.dot_dimension_numbers<[1], [0], [0], [1], [0, 0, 1, 1], [], []>} : vector<8x256xbf16>, vector<256x512xbf16>, vector<8x512xf32> -> vector<8x512xf32>
    %c0_10 = arith.constant 0 : index
    %c0_11 = arith.constant 0 : index
    %14 = vector.load %arg5[%c0_10, %c0_11] : memref<1x512xf32, #tpu.memory_space<vmem>>, vector<1x512xf32>
    %15 = vector.broadcast %14 : vector<1x512xf32> to vector<8x512xf32>
    %16 = arith.addf %13, %15 : vector<8x512xf32>
    %cst_12 = arith.constant 0.000000e+00 : f32
    %17 = vector.broadcast %cst_12 : f32 to vector<8x512xf32>
    %18 = arith.cmpf ogt, %16, %17 : vector<8x512xf32>
    %cst_13 = arith.constant 2.000000e-01 : f32
    %19 = vector.broadcast %cst_13 : f32 to vector<8x512xf32>
    %20 = arith.mulf %19, %16 : vector<8x512xf32>
    %21 = arith.select %18, %16, %20 : vector<8x512xi1>, vector<8x512xf32>
    %22 = arith.truncf %21 : vector<8x512xf32> to vector<8x512xbf16>
    %c0_14 = arith.constant 0 : index
    %c0_15 = arith.constant 0 : index
    %23 = vector.load %arg6[%c0_14, %c0_15] : memref<512x1024xbf16, #tpu.memory_space<vmem>>, vector<512x1024xbf16>
    %cst_16 = arith.constant dense<0.000000e+00> : vector<8x1024xf32>
    %24 = tpu.matmul %22, %23, %cst_16 {dimension_numbers = #tpu.dot_dimension_numbers<[1], [0], [0], [1], [0, 0, 1, 1], [], []>} : vector<8x512xbf16>, vector<512x1024xbf16>, vector<8x1024xf32> -> vector<8x1024xf32>
    %c0_17 = arith.constant 0 : index
    %c0_18 = arith.constant 0 : index
    %25 = vector.load %arg7[%c0_17, %c0_18] : memref<1x1024xf32, #tpu.memory_space<vmem>>, vector<1x1024xf32>
    %26 = vector.broadcast %25 : vector<1x1024xf32> to vector<8x1024xf32>
    %27 = arith.addf %24, %26 : vector<8x1024xf32>
    %cst_19 = arith.constant 0.000000e+00 : f32
    %28 = vector.broadcast %cst_19 : f32 to vector<8x1024xf32>
    %29 = arith.cmpf ogt, %27, %28 : vector<8x1024xf32>
    %cst_20 = arith.constant 2.000000e-01 : f32
    %30 = vector.broadcast %cst_20 : f32 to vector<8x1024xf32>
    %31 = arith.mulf %30, %27 : vector<8x1024xf32>
    %32 = arith.select %29, %27, %31 : vector<8x1024xi1>, vector<8x1024xf32>
    %33 = arith.truncf %32 : vector<8x1024xf32> to vector<8x1024xbf16>
    %c0_21 = arith.constant 0 : index
    %c0_22 = arith.constant 0 : index
    %34 = vector.load %arg8[%c0_21, %c0_22] : memref<1024x896xbf16, #tpu.memory_space<vmem>>, vector<1024x896xbf16>
    %cst_23 = arith.constant dense<0.000000e+00> : vector<8x896xf32>
    %35 = tpu.matmul %33, %34, %cst_23 {dimension_numbers = #tpu.dot_dimension_numbers<[1], [0], [0], [1], [0, 0, 1, 1], [], []>} : vector<8x1024xbf16>, vector<1024x896xbf16>, vector<8x896xf32> -> vector<8x896xf32>
    %c0_24 = arith.constant 0 : index
    %c0_25 = arith.constant 0 : index
    %36 = vector.load %arg9[%c0_24, %c0_25] : memref<1x896xf32, #tpu.memory_space<vmem>>, vector<1x896xf32>
    %37 = vector.broadcast %36 : vector<1x896xf32> to vector<8x896xf32>
    %38 = arith.addf %35, %37 : vector<8x896xf32>
    %39 = math.tanh %38 : vector<8x896xf32>
    %40 = arith.truncf %39 : vector<8x896xf32> to vector<8x896xbf16>
    %c0_26 = arith.constant 0 : index
    %c0_27 = arith.constant 0 : index
    %41 = vector.load %arg10[%c0_26, %c0_27] : memref<8x896xbf16, #tpu.memory_space<vmem>>, vector<8x896xbf16>
    tpu.vector_store %arg10[%c0_26, %c0_27], %40 {strides = array<i32>} : memref<8x896xbf16, #tpu.memory_space<vmem>>, vector<8x896xbf16>,
    return
  }
  func.func @transform_0(%arg0: i32) -> (i32, i32) {
    %c0_i32 = arith.constant 0 : i32
    %c0_i32_0 = arith.constant 0 : i32
    return %arg0, %c0_i32 : i32, i32
  }
  func.func @transform_1(%arg0: i32) -> (i32, i32) {
    %c0_i32 = arith.constant 0 : i32
    %c0_i32_0 = arith.constant 0 : i32
    %c0_i32_1 = arith.constant 0 : i32
    return %c0_i32, %c0_i32_0 : i32, i32
  }
  func.func @transform_2(%arg0: i32) -> (i32, i32) {
    %c0_i32 = arith.constant 0 : i32
    %c0_i32_0 = arith.constant 0 : i32
    %c0_i32_1 = arith.constant 0 : i32
    return %c0_i32, %c0_i32_0 : i32, i32
  }
  func.func @transform_3(%arg0: i32) -> (i32, i32) {
    %c0_i32 = arith.constant 0 : i32
    %c0_i32_0 = arith.constant 0 : i32
    %c0_i32_1 = arith.constant 0 : i32
    return %c0_i32, %c0_i32_0 : i32, i32
  }
  func.func @transform_4(%arg0: i32) -> (i32, i32) {
    %c0_i32 = arith.constant 0 : i32
    %c0_i32_0 = arith.constant 0 : i32
    %c0_i32_1 = arith.constant 0 : i32
    return %c0_i32, %c0_i32_0 : i32, i32
  }
  func.func @transform_5(%arg0: i32) -> (i32, i32) {
    %c0_i32 = arith.constant 0 : i32
    %c0_i32_0 = arith.constant 0 : i32
    %c0_i32_1 = arith.constant 0 : i32
    return %c0_i32, %c0_i32_0 : i32, i32
  }
  func.func @transform_6(%arg0: i32) -> (i32, i32) {
    %c0_i32 = arith.constant 0 : i32
    %c0_i32_0 = arith.constant 0 : i32
    %c0_i32_1 = arith.constant 0 : i32
    return %c0_i32, %c0_i32_0 : i32, i32
  }
  func.func @transform_7(%arg0: i32) -> (i32, i32) {
    %c0_i32 = arith.constant 0 : i32
    %c0_i32_0 = arith.constant 0 : i32
    %c0_i32_1 = arith.constant 0 : i32
    return %c0_i32, %c0_i32_0 : i32, i32
  }
  func.func @transform_8(%arg0: i32) -> (i32, i32) {
    %c0_i32 = arith.constant 0 : i32
    %c0_i32_0 = arith.constant 0 : i32
    %c0_i32_1 = arith.constant 0 : i32
    return %c0_i32, %c0_i32_0 : i32, i32
  }
  func.func @transform_9(%arg0: i32) -> (i32, i32) {
    %c0_i32 = arith.constant 0 : i32
    %c0_i32_0 = arith.constant 0 : i32
    return %arg0, %c0_i32 : i32, i32
  }
}

</mosaic_0001>

<bundles_post_ra>
// kernel: generator_forward.1
= control target key start
LH: loop header
LB: loop body
LE: loop exit
PB: predicated region body
PF: predicated region fallthrough
CT: control target
= control target key end

     0   :  { %vm123_vm0 = vcmask 1041408   ;;  %vm119_vm1 = vcmask 818176   ;;  %s15249_s0 = inlined_call_operand.vmem [shape: bf16[8,100], index: 0, kind: input, shape index: {}]   ;;  %s15250_s1 = inlined_call_operand.vmem [shape: bf16[100,256], index: 1, kind: input, shape index: {}]   ;;  %s15251_s2 = inlined_call_operand.vmem [shape: f32[1,256], index: 2, kind: input, shape index: {}]   ;;  %s15252_s3 = inlined_call_operand.vmem [shape: bf16[256,512], index: 3, kind: input, shape index: {}]   ;;  %s15253_s4 = inlined_call_operand.vmem [shape: f32[1,512], index: 4, kind: input, shape index: {}]   ;;  %s15254_s5 = inlined_call_operand.vmem [shape: bf16[512,1024], index: 5, kind: input, shape index: {}]   ;;  %s15255_s6 = inlined_call_operand.vmem [shape: f32[1,1024], index: 6, kind: input, shape index: {}]   ;;  %s15256_s7 = inlined_call_operand.vmem [shape: bf16[1024,896], index: 7, kind: input, shape index: {}]   ;;  %s15257_s8 = inlined_call_operand.vmem [shape: f32[1,896], index: 8, kind: input, shape index: {}]   ;;  %s15258_s9 = inlined_call_operand.hbm [shape: bf16[8,896], index: 9, kind: output, shape index: {}]  }
   0x1   :  { %v47_v0 = vld [vmem:[%s15250_s1 + $0x60] sm:$0x33]  ;;  %v6313_v3 = vld [vmem:[%s15250_s1 + $0x50] sm:$0xf]  ;;  %v9404_v6 = vld [vmem:[%s15250_s1 + $0x54] sm:$0xf0] }
   0x2   :  { %v91_v1 = vunpack.c.l.b16 %v47_v0  ;;  %v92_v2 = vunpack.c.h.b16 %v47_v0  ;;  %v9403_v7 = vld [vmem:[%s15250_s1 + $0x54] sm:$0xf]  ;;  %v6315_v8 = vld [vmem:[%s15250_s1 + $0x58] sm:$0xf0]  ;;  %v6314_v11 = vor.u32 %v9404_v6, %v6313_v3  ;;  %v6305_v13 = vld [vmem:[%s15250_s1 + $0x40] sm:$0xf] }
   0x3   :  { %v6318_v12 = vor.u32 %v9403_v7, %v6315_v8  ;;  %v9402_v14 = vld [vmem:[%s15250_s1 + $0x44] sm:$0xf0]  ;;  %v9401_v15 = vld [vmem:[%s15250_s1 + $0x44] sm:$0xf]  ;;  %v6307_v16 = vld [vmem:[%s15250_s1 + $0x48] sm:$0xf0] }
   0x4   :  { %v105_v4 = vpack.c.b16 %v91_v1, %v91_v1  ;;  %v106_v5 = vpack.c.b16 %v92_v2, %v92_v2  ;;  %v6435_v17 = vld [vmem:[%s15252_s3 + $0xe0] sm:$0xf]  ;;  %v9435_v18 = vld [vmem:[%s15252_s3 + $0xec] sm:$0xf0]  ;;  %v6306_v19 = vor.u32 %v9402_v14, %v6305_v13  ;;  %v6310_v20 = vor.u32 %v9401_v15, %v6307_v16  ;;  %v9400_v25 = vld [vmem:[%s15250_s1 + $0x34] sm:$0xf0] }
   0x5   :  { %v6297_v21 = vld [vmem:[%s15250_s1 + $0x30] sm:$0xf]  ;;  %v6436_v22 = vor.u32 %v9435_v18, %v6435_v17  ;;  %v6563_v23 = vld [vmem:[%s15252_s3 + $0x1e0] sm:$0xf]  ;;  %v9399_v26 = vld [vmem:[%s15250_s1 + $0x34] sm:$0xf] }
   0x6   :  { %v125_v9 = vsel %vm123_vm0, %v105_v4, 0  ;;  %v128_v10 = vsel %vm123_vm0, %v106_v5, 0  ;;  %v9467_v24 = vld [vmem:[%s15252_s3 + $0x1ec] sm:$0xf0]  ;;  %v6299_v27 = vld [vmem:[%s15250_s1 + $0x38] sm:$0xf0]  ;;  %v6298_v36 = vor.u32 %v9400_v25, %v6297_v21 }
   0x7   :  { %131 = vmatpush.bf16.msra.mxu0 %v125_v9  ;;  %144 = vmatpush.bf16.msra.mxu1 %v128_v10  ;;  %v6564_v28 = vor.u32 %v9467_v24, %v6563_v23  ;;  %v6419_v29 = vld [vmem:[%s15252_s3 + $0xc0] sm:$0xf]  ;;  %v9431_v30 = vld [vmem:[%s15252_s3 + $0xcc] sm:$0xf0]  ;;  %v9398_v33 = vld [vmem:[%s15250_s1 + $0x24] sm:$0xf0]  ;;  %v6302_v37 = vor.u32 %v9399_v26, %v6299_v27 }
   0x8   :  { %558 = vmatpush.bf16.msra.mxu2 %v6436_v22  ;;  %v6547_v31 = vld [vmem:[%s15252_s3 + $0x1c0] sm:$0xf]  ;;  %v6420_v34 = vor.u32 %v9431_v30, %v6419_v29  ;;  %v9463_v35 = vld [vmem:[%s15252_s3 + $0x1cc] sm:$0xf0]  ;;  %v9397_v38 = vld [vmem:[%s15250_s1 + $0x24] sm:$0xf] }
   0x9   :  { %v6289_v32 = vld [vmem:[%s15250_s1 + $0x20] sm:$0xf]  ;;  %571 = vmatpush.bf16.msra.mxu3 %v6564_v28  ;;  %v6291_v39 = vld [vmem:[%s15250_s1 + $0x28] sm:$0xf0]  ;;  %v6548_v40 = vor.u32 %v9463_v35, %v6547_v31  ;;  %v9427_v42 = vld [vmem:[%s15252_s3 + $0xac] sm:$0xf0] }
   0xa   :  { %v6403_v41 = vld [vmem:[%s15252_s3 + $0xa0] sm:$0xf]  ;;  %v9459_v44 = vld [vmem:[%s15252_s3 + $0x1ac] sm:$0xf0]  ;;  %v6290_v49 = vor.u32 %v9398_v33, %v6289_v32  ;;  %v6294_v50 = vor.u32 %v9397_v38, %v6291_v39  ;;  %v9396_v54 = vld [vmem:[%s15250_s1 + $0x14] sm:$0xf0] }
   0xb   :  { %132 = vmatpush.bf16.msra.mxu0 %v6314_v11  ;;  %145 = vmatpush.bf16.msra.mxu1 %v6318_v12  ;;  %v6531_v43 = vld [vmem:[%s15252_s3 + $0x1a0] sm:$0xf]  ;;  %v6404_v45 = vor.u32 %v9427_v42, %v6403_v41  ;;  %v9423_v48 = vld [vmem:[%s15252_s3 + $0x8c] sm:$0xf0]  ;;  %v9395_v55 = vld [vmem:[%s15250_s1 + $0x14] sm:$0xf] }
   0xc   :  { %559 = vmatpush.bf16.msra.mxu2 %v6420_v34  ;;  %v6532_v46 = vor.u32 %v9459_v44, %v6531_v43  ;;  %v6387_v47 = vld [vmem:[%s15252_s3 + $0x80] sm:$0xf]  ;;  %v6281_v51 = vld [vmem:[%s15250_s1 + $0x10] sm:$0xf]  ;;  %v6283_v56 = vld [vmem:[%s15250_s1 + $0x18] sm:$0xf0] }
   0xd   :  { %572 = vmatpush.bf16.msra.mxu3 %v6548_v40  ;;  %v6515_v52 = vld [vmem:[%s15252_s3 + $0x180] sm:$0xf]  ;;  %v9455_v53 = vld [vmem:[%s15252_s3 + $0x18c] sm:$0xf0]  ;;  %v6388_v57 = vor.u32 %v9423_v48, %v6387_v47  ;;  %v6282_v62 = vor.u32 %v9396_v54, %v6281_v51  ;;  %v6286_v63 = vor.u32 %v9395_v55, %v6283_v56  ;;  %v9394_v0 = vld [vmem:[%s15250_s1 + $0x4] sm:$0xf0] }
   0xe   :  { %v6273_v58 = vld [vmem:[%s15250_s1] sm:$0xf]  ;;  %v6516_v59 = vor.u32 %v9455_v53, %v6515_v52  ;;  %v9419_v61 = vld [vmem:[%s15252_s3 + $0x6c] sm:$0xf0]  ;;  %v9393_v3 = vld [vmem:[%s15250_s1 + $0x4] sm:$0xf] }
   0xf   :  { %133 = vmatpush.bf16.msra.mxu0 %v6306_v19  ;;  %146 = vmatpush.bf16.msra.mxu1 %v6310_v20  ;;  %v6371_v60 = vld [vmem:[%s15252_s3 + $0x60] sm:$0xf]  ;;  %v9451_v2 = vld [vmem:[%s15252_s3 + $0x16c] sm:$0xf0]  ;;  %v6275_v4 = vld [vmem:[%s15250_s1 + $0x8] sm:$0xf0]  ;;  %v6274_v13 = vor.u32 %v9394_v0, %v6273_v58 }
  0x10   :  { %560 = vmatpush.bf16.msra.mxu2 %v6404_v45  ;;  %v6499_v1 = vld [vmem:[%s15252_s3 + $0x160] sm:$0xf]  ;;  %v9433_v5 = vld [vmem:[%s15252_s3 + $0xe4] sm:$0xf]  ;;  %v6437_v6 = vld [vmem:[%s15252_s3 + $0xf0] sm:$0xf0]  ;;  %v6372_v9 = vor.u32 %v9419_v61, %v6371_v60  ;;  %v6278_v14 = vor.u32 %v9393_v3, %v6275_v4 }
  0x11   :  { %573 = vmatpush.bf16.msra.mxu3 %v6532_v46  ;;  %v9465_v7 = vld [vmem:[%s15252_s3 + $0x1e4] sm:$0xf]  ;;  %v6565_v8 = vld [vmem:[%s15252_s3 + $0x1f0] sm:$0xf0]  ;;  %v6500_v10 = vor.u32 %v9451_v2, %v6499_v1  ;;  %v6355_v11 = vld [vmem:[%s15252_s3 + $0x40] sm:$0xf]  ;;  %v6440_v15 = vor.u32 %v9433_v5, %v6437_v6 }
  0x12   :  { %v9415_v12 = vld [vmem:[%s15252_s3 + $0x4c] sm:$0xf0]  ;;  %v6568_v16 = vor.u32 %v9465_v7, %v6565_v8  ;;  %v9429_v17 = vld [vmem:[%s15252_s3 + $0xc4] sm:$0xf]  ;;  %v6483_v18 = vld [vmem:[%s15252_s3 + $0x140] sm:$0xf] }
  0x13   :  { %134 = vmatpush.bf16.msra.mxu0 %v6298_v36  ;;  %147 = vmatpush.bf16.msra.mxu1 %v6302_v37  ;;  %v9447_v19 = vld [vmem:[%s15252_s3 + $0x14c] sm:$0xf0]  ;;  %v6421_v20 = vld [vmem:[%s15252_s3 + $0xd0] sm:$0xf0]  ;;  %v9461_v21 = vld [vmem:[%s15252_s3 + $0x1c4] sm:$0xf]  ;;  %v6356_v23 = vor.u32 %v9415_v12, %v6355_v11 }
  0x14   :  { %561 = vmatpush.bf16.msra.mxu2 %v6388_v57  ;;  %v6549_v22 = vld [vmem:[%s15252_s3 + $0x1d0] sm:$0xf0]  ;;  %v6339_v24 = vld [vmem:[%s15252_s3 + $0x20] sm:$0xf]  ;;  %v9411_v25 = vld [vmem:[%s15252_s3 + $0x2c] sm:$0xf0]  ;;  %v6484_v27 = vor.u32 %v9447_v19, %v6483_v18  ;;  %v6424_v28 = vor.u32 %v9429_v17, %v6421_v20 }
  0x15   :  { %574 = vmatpush.bf16.msra.mxu3 %v6516_v59  ;;  %v34_v26 = vld [vmem:[%s15249_s0] sm:$0xf]  ;;  %v6552_v29 = vor.u32 %v9461_v21, %v6549_v22  ;;  %v9425_v30 = vld [vmem:[%s15252_s3 + $0xa4] sm:$0xf]  ;;  %v9443_v32 = vld [vmem:[%s15252_s3 + $0x12c] sm:$0xf0]  ;;  %v6340_v36 = vor.u32 %v9411_v25, %v6339_v24 }
  0x16   :  { %v6467_v31 = vld [vmem:[%s15252_s3 + $0x120] sm:$0xf]  ;;  %v6405_v33 = vld [vmem:[%s15252_s3 + $0xb0] sm:$0xf0]  ;;  %v9457_v34 = vld [vmem:[%s15252_s3 + $0x1a4] sm:$0xf] }
  0x17   :  { %135 = vmatpush.bf16.msra.mxu0 %v6290_v49  ;;  %148 = vmatpush.bf16.msra.mxu1 %v6294_v50  ;;  %v6533_v35 = vld [vmem:[%s15252_s3 + $0x1b0] sm:$0xf0]  ;;  %v6323_v37 = vld [vmem:[%s15252_s3] sm:$0xf]  ;;  %v9407_v38 = vld [vmem:[%s15252_s3 + $0xc] sm:$0xf0]  ;;  %v6468_v40 = vor.u32 %v9443_v32, %v6467_v31  ;;  %v6408_v43 = vor.u32 %v9425_v30, %v6405_v33 }
  0x18   :  { %562 = vmatpush.bf16.msra.mxu2 %v6372_v9  ;;  %v9421_v39 = vld [vmem:[%s15252_s3 + $0x84] sm:$0xf]  ;;  %v6443_v41 = vld [vmem:[%s15252_s3 + $0xe8] sm:$0xf]  ;;  %v9436_v42 = vld [vmem:[%s15252_s3 + $0xf4] sm:$0xf0]  ;;  %v6536_v44 = vor.u32 %v9457_v34, %v6533_v35  ;;  %v6324_v50 = vor.u32 %v9407_v38, %v6323_v37 }
  0x19   :  { %575 = vmatpush.bf16.msra.mxu3 %v6500_v10  ;;  %v6389_v45 = vld [vmem:[%s15252_s3 + $0x90] sm:$0xf0]  ;;  %v6451_v46 = vld [vmem:[%s15252_s3 + $0x100] sm:$0xf]  ;;  %v9439_v47 = vld [vmem:[%s15252_s3 + $0x10c] sm:$0xf0] }
  0x1a   :  { %v9453_v48 = vld [vmem:[%s15252_s3 + $0x184] sm:$0xf]  ;;  %v6517_v49 = vld [vmem:[%s15252_s3 + $0x190] sm:$0xf0] }
  0x1b   :  { %136 = vmatpush.bf16.msra.mxu0 %v6282_v62  ;;  %149 = vmatpush.bf16.msra.mxu1 %v6286_v63 }
  0x1c   :  { %563 = vmatpush.bf16.msra.mxu2 %v6356_v23 }
  0x1d   :  { %576 = vmatpush.bf16.msra.mxu3 %v6484_v27 }
  0x1f   :  { %137 = vmatpush.bf16.msra.mxu0 %v6274_v13  ;;  %150 = vmatpush.bf16.msra.mxu1 %v6278_v14 }
  0x20   :  { %564 = vmatpush.bf16.msra.mxu2 %v6340_v36 }
  0x22   :  { %6319 = vmatmul.msk.bf16.vlgmr.msra.gmra.mxu0 %vm119_vm1, %v34_v26  ;;  %6320 = vmatmul.msk.bf16.vlgmr.msra.gmra.mxu1 %vm119_vm1, %v34_v26 }
  0x23   :  { %584 = vmatpush.bf16.msrb.mxu0 %v6440_v15  ;;  %597 = vmatpush.bf16.msrb.mxu1 %v6568_v16 }
  0x27   :  { %585 = vmatpush.bf16.msrb.mxu0 %v6424_v28  ;;  %598 = vmatpush.bf16.msrb.mxu1 %v6552_v29 }
  0x28   :  { %14 = vsyncpa [#allocation3], 0  ;;  %v6444_v51 = vor.u32 %v9436_v42, %v6443_v41  ;;  %v6571_v52 = vld [vmem:[%s15252_s3 + $0x1e8] sm:$0xf]  ;;  %v9468_v53 = vld [vmem:[%s15252_s3 + $0x1f4] sm:$0xf0]  ;;  %577 = vmatpush.bf16.msra.mxu3 %v6468_v40  ;;  %v6452_v54 = vor.u32 %v9439_v47, %v6451_v46  ;;  %v6392_v57 = vor.u32 %v9421_v39, %v6389_v45  ;;  %v6520_v58 = vor.u32 %v9453_v48, %v6517_v49 }
  0x29   :  { %v6427_v55 = vld [vmem:[%s15252_s3 + $0xc8] sm:$0xf]  ;;  %v9432_v56 = vld [vmem:[%s15252_s3 + $0xd4] sm:$0xf0]  ;;  %v9417_v59 = vld [vmem:[%s15252_s3 + $0x64] sm:$0xf]  ;;  %565 = vmatpush.bf16.msra.mxu2 %v6324_v50  ;;  %v6572_v63 = vor.u32 %v9468_v53, %v6571_v52 }
  0x2a   :  { %v6373_v60 = vld [vmem:[%s15252_s3 + $0x70] sm:$0xf0]  ;;  %v9449_v61 = vld [vmem:[%s15252_s3 + $0x164] sm:$0xf]  ;;  %v6428_v0 = vor.u32 %v9432_v56, %v6427_v55  ;;  %v6555_v1 = vld [vmem:[%s15252_s3 + $0x1c8] sm:$0xf] }
  0x2b   :  { %586 = vmatpush.bf16.msrb.mxu0 %v6408_v43  ;;  %599 = vmatpush.bf16.msrb.mxu1 %v6536_v44  ;;  %v6501_v62 = vld [vmem:[%s15252_s3 + $0x170] sm:$0xf0]  ;;  %v9464_v2 = vld [vmem:[%s15252_s3 + $0x1d4] sm:$0xf0]  ;;  %v6376_v3 = vor.u32 %v9417_v59, %v6373_v60  ;;  %v9413_v5 = vld [vmem:[%s15252_s3 + $0x44] sm:$0xf] }
  0x2c   :  { %578 = vmatpush.bf16.msra.mxu3 %v6452_v54  ;;  %v6504_v4 = vor.u32 %v9449_v61, %v6501_v62  ;;  %v6357_v6 = vld [vmem:[%s15252_s3 + $0x50] sm:$0xf0]  ;;  %v9445_v7 = vld [vmem:[%s15252_s3 + $0x144] sm:$0xf]  ;;  %v6556_v9 = vor.u32 %v9464_v2, %v6555_v1  ;;  %v9434_v22 = vld [vmem:[%s15252_s3 + $0xec] sm:$0xf] }
  0x2d   :  { %610 = vmatpush.bf16.msrb.mxu2 %v6444_v51  ;;  %v6485_v8 = vld [vmem:[%s15252_s3 + $0x150] sm:$0xf0]  ;;  %v6360_v10 = vor.u32 %v9413_v5, %v6357_v6  ;;  %v9409_v12 = vld [vmem:[%s15252_s3 + $0x24] sm:$0xf]  ;;  %v6445_v23 = vld [vmem:[%s15252_s3 + $0xf8] sm:$0xf0] }
  0x2e   :  { %v6488_v11 = vor.u32 %v9445_v7, %v6485_v8  ;;  %v6341_v13 = vld [vmem:[%s15252_s3 + $0x30] sm:$0xf0]  ;;  %v9441_v14 = vld [vmem:[%s15252_s3 + $0x124] sm:$0xf]  ;;  %v9466_v24 = vld [vmem:[%s15252_s3 + $0x1ec] sm:$0xf]  ;;  %v6448_v28 = vor.u32 %v9434_v22, %v6445_v23 }
  0x2f   :  { %587 = vmatpush.bf16.msrb.mxu0 %v6392_v57  ;;  %600 = vmatpush.bf16.msrb.mxu1 %v6520_v58  ;;  %v6469_v15 = vld [vmem:[%s15252_s3 + $0x130] sm:$0xf0]  ;;  %v6344_v16 = vor.u32 %v9409_v12, %v6341_v13  ;;  %v9405_v18 = vld [vmem:[%s15252_s3 + $0x4] sm:$0xf]  ;;  %v6573_v25 = vld [vmem:[%s15252_s3 + $0x1f8] sm:$0xf0] }
  0x30   :  { %623 = vmatpush.bf16.msrb.mxu3 %v6572_v63  ;;  %v6472_v17 = vor.u32 %v9441_v14, %v6469_v15  ;;  %v6325_v19 = vld [vmem:[%s15252_s3 + $0x10] sm:$0xf0]  ;;  %v9437_v20 = vld [vmem:[%s15252_s3 + $0x104] sm:$0xf]  ;;  %v6576_v29 = vor.u32 %v9466_v24, %v6573_v25  ;;  %v9430_v30 = vld [vmem:[%s15252_s3 + $0xcc] sm:$0xf] }
  0x31   :  { %611 = vmatpush.bf16.msrb.mxu2 %v6428_v0  ;;  %v6453_v21 = vld [vmem:[%s15252_s3 + $0x110] sm:$0xf0]  ;;  %v6328_v26 = vor.u32 %v9405_v18, %v6325_v19  ;;  %v6429_v31 = vld [vmem:[%s15252_s3 + $0xd8] sm:$0xf0]  ;;  %v9462_v32 = vld [vmem:[%s15252_s3 + $0x1cc] sm:$0xf] }
  0x32   :  { %v6456_v27 = vor.u32 %v9437_v20, %v6453_v21  ;;  %v6557_v33 = vld [vmem:[%s15252_s3 + $0x1d8] sm:$0xf0]  ;;  %v6432_v34 = vor.u32 %v9430_v30, %v6429_v31  ;;  %v6411_v36 = vld [vmem:[%s15252_s3 + $0xa8] sm:$0xf]  ;;  %v9428_v37 = vld [vmem:[%s15252_s3 + $0xb4] sm:$0xf0] }
  0x33   :  { %588 = vmatpush.bf16.msrb.mxu0 %v6376_v3  ;;  %601 = vmatpush.bf16.msrb.mxu1 %v6504_v4  ;;  %v6560_v35 = vor.u32 %v9462_v32, %v6557_v33  ;;  %v6539_v38 = vld [vmem:[%s15252_s3 + $0x1a8] sm:$0xf]  ;;  %v6412_v39 = vor.u32 %v9428_v37, %v6411_v36  ;;  %v9460_v40 = vld [vmem:[%s15252_s3 + $0x1b4] sm:$0xf0]  ;;  %v9426_v41 = vld [vmem:[%s15252_s3 + $0xac] sm:$0xf] }
  0x34   :  { %624 = vmatpush.bf16.msrb.mxu3 %v6556_v9  ;;  %v6540_v42 = vor.u32 %v9460_v40, %v6539_v38  ;;  %v6413_v43 = vld [vmem:[%s15252_s3 + $0xb8] sm:$0xf0]  ;;  %v9458_v44 = vld [vmem:[%s15252_s3 + $0x1ac] sm:$0xf]  ;;  %v6395_v48 = vld [vmem:[%s15252_s3 + $0x88] sm:$0xf] }
  0x35   :  { %v6541_v45 = vld [vmem:[%s15252_s3 + $0x1b8] sm:$0xf0]  ;;  %612 = vmatpush.bf16.msrb.mxu2 %v6412_v39  ;;  %v6416_v46 = vor.u32 %v9426_v41, %v6413_v43  ;;  %v9424_v49 = vld [vmem:[%s15252_s3 + $0x94] sm:$0xf0]  ;;  %v6523_v50 = vld [vmem:[%s15252_s3 + $0x188] sm:$0xf] }
  0x36   :  { %v6544_v47 = vor.u32 %v9458_v44, %v6541_v45  ;;  %v6396_v51 = vor.u32 %v9424_v49, %v6395_v48  ;;  %v9456_v52 = vld [vmem:[%s15252_s3 + $0x194] sm:$0xf0]  ;;  %v9422_v53 = vld [vmem:[%s15252_s3 + $0x8c] sm:$0xf]  ;;  %v6397_v54 = vld [vmem:[%s15252_s3 + $0x98] sm:$0xf0] }
  0x37   :  { %589 = vmatpush.bf16.msrb.mxu0 %v6360_v10  ;;  %602 = vmatpush.bf16.msrb.mxu1 %v6488_v11  ;;  %v6524_v55 = vor.u32 %v9456_v52, %v6523_v50  ;;  %v6400_v56 = vor.u32 %v9422_v53, %v6397_v54  ;;  %v9454_v57 = vld [vmem:[%s15252_s3 + $0x18c] sm:$0xf]  ;;  %v6525_v58 = vld [vmem:[%s15252_s3 + $0x198] sm:$0xf0]  ;;  %v6379_v60 = vld [vmem:[%s15252_s3 + $0x68] sm:$0xf] }
  0x38   :  { %625 = vmatpush.bf16.msrb.mxu3 %v6540_v42  ;;  %v6528_v59 = vor.u32 %v9454_v57, %v6525_v58  ;;  %v9420_v61 = vld [vmem:[%s15252_s3 + $0x74] sm:$0xf0]  ;;  %v6507_v62 = vld [vmem:[%s15252_s3 + $0x168] sm:$0xf]  ;;  %v9418_v1 = vld [vmem:[%s15252_s3 + $0x6c] sm:$0xf] }
  0x39   :  { %613 = vmatpush.bf16.msrb.mxu2 %v6396_v51  ;;  %v6380_v63 = vor.u32 %v9420_v61, %v6379_v60  ;;  %v9452_v0 = vld [vmem:[%s15252_s3 + $0x174] sm:$0xf0]  ;;  %v6381_v2 = vld [vmem:[%s15252_s3 + $0x78] sm:$0xf0]  ;;  %v9450_v5 = vld [vmem:[%s15252_s3 + $0x16c] sm:$0xf] }
  0x3a   :  { %v6508_v3 = vor.u32 %v9452_v0, %v6507_v62  ;;  %v6384_v4 = vor.u32 %v9418_v1, %v6381_v2  ;;  %v6509_v6 = vld [vmem:[%s15252_s3 + $0x178] sm:$0xf0]  ;;  %v6363_v7 = vld [vmem:[%s15252_s3 + $0x48] sm:$0xf]  ;;  %v9416_v9 = vld [vmem:[%s15252_s3 + $0x54] sm:$0xf0] }
  0x3b   :  { %590 = vmatpush.bf16.msrb.mxu0 %v6344_v16  ;;  %603 = vmatpush.bf16.msrb.mxu1 %v6472_v17  ;;  %v6512_v8 = vor.u32 %v9450_v5, %v6509_v6  ;;  %v6491_v10 = vld [vmem:[%s15252_s3 + $0x148] sm:$0xf]  ;;  %v9448_v11 = vld [vmem:[%s15252_s3 + $0x154] sm:$0xf0]  ;;  %v6364_v12 = vor.u32 %v9416_v9, %v6363_v7  ;;  %v9414_v14 = vld [vmem:[%s15252_s3 + $0x4c] sm:$0xf] }
  0x3c   :  { %626 = vmatpush.bf16.msrb.mxu3 %v6524_v55  ;;  %v6492_v13 = vor.u32 %v9448_v11, %v6491_v10  ;;  %v6365_v15 = vld [vmem:[%s15252_s3 + $0x58] sm:$0xf0]  ;;  %v9446_v16 = vld [vmem:[%s15252_s3 + $0x14c] sm:$0xf]  ;;  %v6347_v19 = vld [vmem:[%s15252_s3 + $0x28] sm:$0xf] }
  0x3d   :  { %614 = vmatpush.bf16.msrb.mxu2 %v6380_v63  ;;  %v6368_v17 = vor.u32 %v9414_v14, %v6365_v15  ;;  %v6493_v18 = vld [vmem:[%s15252_s3 + $0x158] sm:$0xf0]  ;;  %v9412_v20 = vld [vmem:[%s15252_s3 + $0x34] sm:$0xf0]  ;;  %v6475_v22 = vld [vmem:[%s15252_s3 + $0x128] sm:$0xf] }
  0x3e   :  { %v6496_v21 = vor.u32 %v9446_v16, %v6493_v18  ;;  %v9444_v23 = vld [vmem:[%s15252_s3 + $0x134] sm:$0xf0]  ;;  %v9410_v24 = vld [vmem:[%s15252_s3 + $0x2c] sm:$0xf]  ;;  %v6348_v25 = vor.u32 %v9412_v20, %v6347_v19  ;;  %v6331_v31 = vld [vmem:[%s15252_s3 + $0x8] sm:$0xf] }
  0x3f   :  { %591 = vmatpush.bf16.msrb.mxu0 %v6328_v26  ;;  %604 = vmatpush.bf16.msrb.mxu1 %v6456_v27  ;;  %v6349_v26 = vld [vmem:[%s15252_s3 + $0x38] sm:$0xf0]  ;;  %v9442_v27 = vld [vmem:[%s15252_s3 + $0x12c] sm:$0xf]  ;;  %v9408_v32 = vld [vmem:[%s15252_s3 + $0x14] sm:$0xf0] }
  0x40   :  { %627 = vmatpush.bf16.msrb.mxu3 %v6508_v3  ;;  %v6352_v30 = vor.u32 %v9410_v24, %v6349_v26  ;;  %v6459_v33 = vld [vmem:[%s15252_s3 + $0x108] sm:$0xf]  ;;  %v9406_v36 = vld [vmem:[%s15252_s3 + $0xc] sm:$0xf]  ;;  %v6333_v37 = vld [vmem:[%s15252_s3 + $0x18] sm:$0xf0]  ;;  %v6332_v40 = vor.u32 %v9408_v32, %v6331_v31 }
  0x41   :  { %615 = vmatpush.bf16.msrb.mxu2 %v6364_v12  ;;  %v9438_v38 = vld [vmem:[%s15252_s3 + $0x10c] sm:$0xf]  ;;  %v6461_v39 = vld [vmem:[%s15252_s3 + $0x118] sm:$0xf0]  ;;  %v6336_v42 = vor.u32 %v9406_v36, %v6333_v37  ;;  %v48_v44 = vld [vmem:[%s15251_s2] sm:$0x3] }
  0x42   :  { %v6464_v43 = vor.u32 %v9438_v38, %v6461_v39  ;;  %v50_v45 = vperm.slane %v48_v44, 0  ;;  %v7059_v51 = vld [vmem:[%s15254_s5 + $0x3c0] sm:$0xf]  ;;  %s6262_s18 = sshll.u32 %s15258_s9, 4  ;;  %s6263_s18 = int_to_ptr.hbm [resolvable:$true] %s6262_s18 }
  0x43   :  { %636 = vmatpush.bf16.msra.mxu0 %v6448_v28  ;;  %649 = vmatpush.bf16.msra.mxu1 %v6576_v29  ;;  %v6477_v28 = vld [vmem:[%s15252_s3 + $0x138] sm:$0xf0]  ;;  %v6476_v29 = vor.u32 %v9444_v23, %v6475_v22  ;;  %v9593_v52 = vld [vmem:[%s15254_s5 + $0x3dc] sm:$0xf0] }
  0x44   :  { %628 = vmatpush.bf16.msrb.mxu3 %v6492_v13  ;;  %v6803_v53 = vld [vmem:[%s15254_s5 + $0x1c0] sm:$0xf]  ;;  %v7060_v1 = vor.u32 %v9593_v52, %v7059_v51 }
  0x45   :  { %616 = vmatpush.bf16.msrb.mxu2 %v6348_v25  ;;  %v9529_v54 = vld [vmem:[%s15254_s5 + $0x1dc] sm:$0xf0] }
  0x46   :  { %v7571_v55 = vld [vmem:[%s15254_s5 + $0x7c0] sm:$0xf] }
  0x47   :  { %637 = vmatpush.bf16.msra.mxu0 %v6432_v34  ;;  %650 = vmatpush.bf16.msra.mxu1 %v6560_v35  ;;  %v6480_v34 = vor.u32 %v9442_v27, %v6477_v28  ;;  %v9440_v35 = vld [vmem:[%s15252_s3 + $0x114] sm:$0xf0]  ;;  %v9721_v58 = vld [vmem:[%s15254_s5 + $0x7dc] sm:$0xf0] }
  0x48   :  { %629 = vmatpush.bf16.msrb.mxu3 %v6476_v29  ;;  %v6460_v41 = vor.u32 %v9440_v35, %v6459_v33  ;;  %v9657_v60 = vld [vmem:[%s15254_s5 + $0x5dc] sm:$0xf0]  ;;  %v7572_v7 = vor.u32 %v9721_v58, %v7571_v55 }
  0x49   :  { %617 = vmatpush.bf16.msrb.mxu2 %v6332_v40  ;;  %v7027_v2 = vld [vmem:[%s15254_s5 + $0x380] sm:$0xf] }
  0x4a   :  { %v9585_v3 = vld [vmem:[%s15254_s5 + $0x39c] sm:$0xf0] }
  0x4b   :  { %638 = vmatpush.bf16.msra.mxu0 %v6416_v46  ;;  %651 = vmatpush.bf16.msra.mxu1 %v6544_v47  ;;  %v51_v46 = vperm.slane %v48_v44, 1  ;;  %v6771_v5 = vld [vmem:[%s15254_s5 + $0x180] sm:$0xf]  ;;  %v7028_v15 = vor.u32 %v9585_v3, %v7027_v2 }
  0x4c   :  { %630 = vmatpush.bf16.msrb.mxu3 %v6460_v41  ;;  %v9521_v6 = vld [vmem:[%s15254_s5 + $0x19c] sm:$0xf0] }
  0x4d   :  { %v9713_v12 = vld [vmem:[%s15254_s5 + $0x79c] sm:$0xf0]  ;;  %v6772_v18 = vor.u32 %v9521_v6, %v6771_v5 }
  0x4e   :  { %v7283_v13 = vld [vmem:[%s15254_s5 + $0x580] sm:$0xf] }
  0x4f   :  { %639 = vmatpush.bf16.msra.mxu0 %v6400_v56  ;;  %652 = vmatpush.bf16.msra.mxu1 %v6528_v59  ;;  %v7315_v59 = vld [vmem:[%s15254_s5 + $0x5c0] sm:$0xf] }
  0x50   :  { %v7316_v9 = vor.u32 %v9657_v60, %v7315_v59  ;;  %v9649_v14 = vld [vmem:[%s15254_s5 + $0x59c] sm:$0xf0] }
  0x51   :  { %v6995_v16 = vld [vmem:[%s15254_s5 + $0x340] sm:$0xf]  ;;  %v7284_v23 = vor.u32 %v9649_v14, %v7283_v13 }
  0x52   :  { %v6739_v19 = vld [vmem:[%s15254_s5 + $0x140] sm:$0xf] }
  0x53   :  { %640 = vmatpush.bf16.msra.mxu0 %v6384_v4  ;;  %653 = vmatpush.bf16.msra.mxu1 %v6512_v8  ;;  %v6804_v4 = vor.u32 %v9529_v54, %v6803_v53  ;;  %v7539_v8 = vld [vmem:[%s15254_s5 + $0x780] sm:$0xf] }
  0x54   :  { %v9513_v20 = vld [vmem:[%s15254_s5 + $0x15c] sm:$0xf0] }
  0x55   :  { %v7507_v22 = vld [vmem:[%s15254_s5 + $0x740] sm:$0xf] }
  0x56   :  { %v9705_v24 = vld [vmem:[%s15254_s5 + $0x75c] sm:$0xf0] }
  0x57   :  { %641 = vmatpush.bf16.msra.mxu0 %v6368_v17  ;;  %654 = vmatpush.bf16.msra.mxu1 %v6496_v21  ;;  %v9577_v17 = vld [vmem:[%s15254_s5 + $0x35c] sm:$0xf0]  ;;  %v7540_v21 = vor.u32 %v9713_v12, %v7539_v8  ;;  %v7508_v33 = vor.u32 %v9705_v24, %v7507_v22  ;;  %v6805_v22 = vld [vmem:[%s15254_s5 + $0x1e0] sm:$0xf0] }
  0x58   :  { %v7251_v25 = vld [vmem:[%s15254_s5 + $0x540] sm:$0xf]  ;;  %v6996_v27 = vor.u32 %v9577_v17, %v6995_v16 }
  0x59   :  { %v9641_v26 = vld [vmem:[%s15254_s5 + $0x55c] sm:$0xf0] }
  0x5a   :  { %v6963_v28 = vld [vmem:[%s15254_s5 + $0x300] sm:$0xf]  ;;  %v7252_v35 = vor.u32 %v9641_v26, %v7251_v25 }
  0x5b   :  { %642 = vmatpush.bf16.msra.mxu0 %v6352_v30  ;;  %655 = vmatpush.bf16.msra.mxu1 %v6480_v34  ;;  %v9569_v29 = vld [vmem:[%s15254_s5 + $0x31c] sm:$0xf0]  ;;  %v6740_v30 = vor.u32 %v9513_v20, %v6739_v19  ;;  %v7061_v20 = vld [vmem:[%s15254_s5 + $0x3e0] sm:$0xf0] }
  0x5c   :  { %v6707_v31 = vld [vmem:[%s15254_s5 + $0x100] sm:$0xf]  ;;  %v6964_v39 = vor.u32 %v9569_v29, %v6963_v28  ;;  %v7573_v28 = vld [vmem:[%s15254_s5 + $0x7e0] sm:$0xf0] }
  0x5d   :  { %v9505_v32 = vld [vmem:[%s15254_s5 + $0x11c] sm:$0xf0] }
  0x5e   :  { %v7475_v34 = vld [vmem:[%s15254_s5 + $0x700] sm:$0xf] }
  0x5f   :  { %643 = vmatpush.bf16.msra.mxu0 %v6336_v42  ;;  %656 = vmatpush.bf16.msra.mxu1 %v6464_v43  ;;  %v9697_v36 = vld [vmem:[%s15254_s5 + $0x71c] sm:$0xf0]  ;;  %v6708_v42 = vor.u32 %v9505_v32, %v6707_v31  ;;  %v7029_v32 = vld [vmem:[%s15254_s5 + $0x3a0] sm:$0xf0] }
  0x60   :  { %v7219_v37 = vld [vmem:[%s15254_s5 + $0x500] sm:$0xf] }
  0x61   :  { %v9633_v38 = vld [vmem:[%s15254_s5 + $0x51c] sm:$0xf0] }
  0x62   :  { %v6931_v40 = vld [vmem:[%s15254_s5 + $0x2c0] sm:$0xf] }
  0x63   :  { %v9561_v41 = vld [vmem:[%s15254_s5 + $0x2dc] sm:$0xf0] }
  0x64   :  { %v6675_v43 = vld [vmem:[%s15254_s5 + $0xc0] sm:$0xf]  ;;  %v6932_v51 = vor.u32 %v9561_v41, %v6931_v40  ;;  %v6997_v40 = vld [vmem:[%s15254_s5 + $0x360] sm:$0xf0] }
  0x65   :  { %v9497_v44 = vld [vmem:[%s15254_s5 + $0xdc] sm:$0xf0]  ;;  %v9509_v41 = vld [vmem:[%s15254_s5 + $0x144] sm:$0xf] }
  0x66   :  { %v6899_v52 = vld [vmem:[%s15254_s5 + $0x280] sm:$0xf]  ;;  %v6676_v54 = vor.u32 %v9497_v44, %v6675_v43  ;;  %v9565_v44 = vld [vmem:[%s15254_s5 + $0x304] sm:$0xf] }
  0x67   :  { %v9553_v53 = vld [vmem:[%s15254_s5 + $0x29c] sm:$0xf0] }
  0x68   :  { %v6643_v55 = vld [vmem:[%s15254_s5 + $0x80] sm:$0xf] }
  0x69   :  { %v7411_v58 = vld [vmem:[%s15254_s5 + $0x680] sm:$0xf] }
  0x6a   :  { %v9681_v60 = vld [vmem:[%s15254_s5 + $0x69c] sm:$0xf0] }
  0x6b   :  { %v6867_v2 = vld [vmem:[%s15254_s5 + $0x240] sm:$0xf] }
  0x6c   :  { %v9545_v3 = vld [vmem:[%s15254_s5 + $0x25c] sm:$0xf0] }
  0x6d   :  { %v6611_v5 = vld [vmem:[%s15254_s5 + $0x40] sm:$0xf] }
  0x6e   :  { %v7379_v6 = vld [vmem:[%s15254_s5 + $0x640] sm:$0xf] }
  0x6f   :  { %v9673_v8 = vld [vmem:[%s15254_s5 + $0x65c] sm:$0xf0] }
  0x70   :  { %v6835_v12 = vld [vmem:[%s15254_s5 + $0x200] sm:$0xf] }
  0x71   :  { %v9537_v13 = vld [vmem:[%s15254_s5 + $0x21c] sm:$0xf0] }
  0x72   :  { %v6579_v16 = vld [vmem:[%s15254_s5] sm:$0xf]  ;;  %v6836_v25 = vor.u32 %v9537_v13, %v6835_v12  ;;  %v6645_v12 = vld [vmem:[%s15254_s5 + $0xa0] sm:$0xf0] }
  0x73   :  { %v9473_v17 = vld [vmem:[%s15254_s5 + $0x1c] sm:$0xf0]  ;;  %v9645_v13 = vld [vmem:[%s15254_s5 + $0x584] sm:$0xf] }
  0x74   :  { %v9665_v24 = vld [vmem:[%s15254_s5 + $0x61c] sm:$0xf0]  ;;  %v6580_v26 = vor.u32 %v9473_v17, %v6579_v16  ;;  %v9533_v17 = vld [vmem:[%s15254_s5 + $0x204] sm:$0xf] }
  0x9f   :  { %v139_v47 = vpop.f32.mrf.mxu0  ;;  %v152_v48 = vpop.f32.mrf.mxu1 }
  0xa0   :  { %v140_v49 = vadd.f32 %v139_v47, %v50_v45  ;;  %v153_v50 = vadd.f32 %v152_v48, %v51_v46  ;;  %v7476_v45 = vor.u32 %v9697_v36, %v7475_v34  ;;  %v7443_v46 = vld [vmem:[%s15254_s5 + $0x6c0] sm:$0xf]  ;;  %v7220_v47 = vor.u32 %v9633_v38, %v7219_v37  ;;  %v6773_v34 = vld [vmem:[%s15254_s5 + $0x1a0] sm:$0xf0] }
  0xa1   :  { %v9689_v48 = vld [vmem:[%s15254_s5 + $0x6dc] sm:$0xf0]  ;;  %v9573_v38 = vld [vmem:[%s15254_s5 + $0x344] sm:$0xf] }
  0xa2   :  { %vm156_vm2 = vcmp.gt.f32.partialorder %v140_v49, 0.0  ;;  %v158_v56 = vmul.f32 0.2, %v140_v49  ;;  %vm157_vm3 = vcmp.gt.f32.partialorder %v153_v50, 0.0  ;;  %v159_v57 = vmul.f32 0.2, %v153_v50 }
  0xa3   :  { %v7000_v43 = vor.u32 %v9573_v38, %v6997_v40  ;;  %v9677_v38 = vld [vmem:[%s15254_s5 + $0x684] sm:$0xf] }
  0xa4   :  { %v160_v61 = vsel %vm156_vm2, %v140_v49, %v158_v56  ;;  %v161_v62 = vsel %vm157_vm3, %v153_v50, %v159_v57  ;;  %v7187_v49 = vld [vmem:[%s15254_s5 + $0x4c0] sm:$0xf]  ;;  %v7444_v57 = vor.u32 %v9689_v48, %v7443_v46  ;;  %v6965_v46 = vld [vmem:[%s15254_s5 + $0x320] sm:$0xf0] }
  0xa5   :  { %v10757_v63 = vpack.c.bf16 %v160_v61, %v160_v61  ;;  %v10759_v0 = vpack.c.bf16 %v161_v62, %v161_v62  ;;  %v9625_v50 = vld [vmem:[%s15254_s5 + $0x4dc] sm:$0xf0]  ;;  %v6709_v48 = vld [vmem:[%s15254_s5 + $0x120] sm:$0xf0] }
  0xa6   :  { %v9489_v56 = vld [vmem:[%s15254_s5 + $0x9c] sm:$0xf0]  ;;  %v7188_v59 = vor.u32 %v9625_v50, %v7187_v49  ;;  %v6968_v49 = vor.u32 %v9565_v44, %v6965_v46  ;;  %v9669_v44 = vld [vmem:[%s15254_s5 + $0x644] sm:$0xf] }
  0xa7   :  { %v141_v10 = vpop.f32.mrf.mxu0  ;;  %v154_v11 = vpop.f32.mrf.mxu1  ;;  %566 = vmatmul.bf16.vlgmr.msra.gmra.mxu2 %v10757_v63  ;;  %579 = vmatmul.bf16.vlgmr.msra.gmra.mxu3 %v10759_v0  ;;  %v7155_v61 = vld [vmem:[%s15254_s5 + $0x480] sm:$0xf] }
  0xa8   :  { %592 = vmatmul.bf16.vlgmr.msrb.gmra.mxu0 %v10757_v63  ;;  %605 = vmatmul.bf16.vlgmr.msrb.gmra.mxu1 %v10759_v0  ;;  %v9617_v62 = vld [vmem:[%s15254_s5 + $0x49c] sm:$0xf0]  ;;  %v6868_v11 = vor.u32 %v9545_v3, %v6867_v2  ;;  %v6677_v2 = vld [vmem:[%s15254_s5 + $0xe0] sm:$0xf0] }
  0xa9   :  { %2245 = vmatpush.bf16.msra.mxu3 %v7060_v1  ;;  %2232 = vmatpush.bf16.msra.mxu2 %v6804_v4  ;;  %v6900_v1 = vor.u32 %v9553_v53, %v6899_v52  ;;  %v6644_v4 = vor.u32 %v9489_v56, %v6643_v55  ;;  %v9609_v10 = vld [vmem:[%s15254_s5 + $0x45c] sm:$0xf0]  ;;  %v6933_v52 = vld [vmem:[%s15254_s5 + $0x2e0] sm:$0xf0] }
  0xaa   :  { %2271 = vmatpush.bf16.msrb.mxu1 %v7572_v7  ;;  %2258 = vmatpush.bf16.msrb.mxu0 %v7316_v9  ;;  %v7156_v7 = vor.u32 %v9617_v62, %v7155_v61  ;;  %v7123_v9 = vld [vmem:[%s15254_s5 + $0x440] sm:$0xf]  ;;  %v6901_v55 = vld [vmem:[%s15254_s5 + $0x2a0] sm:$0xf0] }
  0xab   :  { %v7124_v19 = vor.u32 %v9609_v10, %v7123_v9  ;;  %v9709_v56 = vld [vmem:[%s15254_s5 + $0x784] sm:$0xf] }
  0xac   :  { %v9653_v3 = vld [vmem:[%s15254_s5 + $0x5c4] sm:$0xf] }
  0xad   :  { %2246 = vmatpush.bf16.msra.mxu3 %v7028_v15  ;;  %2233 = vmatpush.bf16.msra.mxu2 %v6772_v18  ;;  %v9589_v15 = vld [vmem:[%s15254_s5 + $0x3c4] sm:$0xf]  ;;  %v7380_v18 = vor.u32 %v9673_v8, %v7379_v6 }
  0xae   :  { %2272 = vmatpush.bf16.msrb.mxu1 %v7540_v21  ;;  %2259 = vmatpush.bf16.msrb.mxu0 %v7284_v23  ;;  %v9525_v21 = vld [vmem:[%s15254_s5 + $0x1c4] sm:$0xf]  ;;  %v7347_v23 = vld [vmem:[%s15254_s5 + $0x600] sm:$0xf]  ;;  %v7064_v29 = vor.u32 %v9589_v15, %v7061_v20 }
  0xaf   :  { %v6808_v31 = vor.u32 %v9525_v21, %v6805_v22  ;;  %v6869_v6 = vld [vmem:[%s15254_s5 + $0x260] sm:$0xf0] }
  0xb0   :  { %v7509_v9 = vld [vmem:[%s15254_s5 + $0x760] sm:$0xf0] }
  0xb1   :  { %2247 = vmatpush.bf16.msra.mxu3 %v6996_v27  ;;  %2234 = vmatpush.bf16.msra.mxu2 %v6740_v30  ;;  %v9717_v27 = vld [vmem:[%s15254_s5 + $0x7c4] sm:$0xf] }
  0xb2   :  { %2273 = vmatpush.bf16.msrb.mxu1 %v7508_v33  ;;  %2260 = vmatpush.bf16.msrb.mxu0 %v7252_v35  ;;  %v9581_v30 = vld [vmem:[%s15254_s5 + $0x384] sm:$0xf]  ;;  %v7348_v35 = vor.u32 %v9665_v24, %v7347_v23  ;;  %v7576_v36 = vor.u32 %v9717_v27, %v7573_v28 }
  0xb3   :  { %v9517_v33 = vld [vmem:[%s15254_s5 + $0x184] sm:$0xf]  ;;  %v7032_v37 = vor.u32 %v9581_v30, %v7029_v32 }
  0xb4   :  { %v7285_v15 = vld [vmem:[%s15254_s5 + $0x5a0] sm:$0xf0] }
  0xb5   :  { %2248 = vmatpush.bf16.msra.mxu3 %v6964_v39  ;;  %2235 = vmatpush.bf16.msra.mxu2 %v6708_v42  ;;  %v6776_v39 = vor.u32 %v9517_v33, %v6773_v34  ;;  %v6741_v42 = vld [vmem:[%s15254_s5 + $0x160] sm:$0xf0]  ;;  %v7288_v16 = vor.u32 %v9645_v13, %v7285_v15  ;;  %v9586_v15 = vld [vmem:[%s15254_s5 + $0x3a4] sm:$0xf0] }
  0xb6   :  { %2274 = vmatpush.bf16.msrb.mxu1 %v7476_v45  ;;  %2261 = vmatpush.bf16.msrb.mxu0 %v7220_v47  ;;  %v6744_v45 = vor.u32 %v9509_v41, %v6741_v42  ;;  %v9501_v47 = vld [vmem:[%s15254_s5 + $0x104] sm:$0xf] }
  0xb7   :  { %618 = vmatmul.bf16.vlgmr.msrb.gmra.mxu2 %v10757_v63  ;;  %631 = vmatmul.bf16.vlgmr.msrb.gmra.mxu3 %v10759_v0  ;;  %v6712_v50 = vor.u32 %v9501_v47, %v6709_v48  ;;  %v7477_v21 = vld [vmem:[%s15254_s5 + $0x720] sm:$0xf0] }
  0xb8   :  { %644 = vmatmul.bf16.vlgmr.msra.gmra.mxu0 %v10757_v63  ;;  %657 = vmatmul.bf16.vlgmr.msra.gmra.mxu1 %v10759_v0  ;;  %v9481_v63 = vld [vmem:[%s15254_s5 + $0x5c] sm:$0xf0]  ;;  %v7412_v0 = vor.u32 %v9681_v60, %v7411_v58  ;;  %v7541_v58 = vld [vmem:[%s15254_s5 + $0x7a0] sm:$0xf0] }
  0xb9   :  { %2249 = vmatpush.bf16.msra.mxu3 %v6932_v51  ;;  %2236 = vmatpush.bf16.msra.mxu2 %v6676_v54  ;;  %v6612_v14 = vor.u32 %v9481_v63, %v6611_v5  ;;  %v9557_v51 = vld [vmem:[%s15254_s5 + $0x2c4] sm:$0xf]  ;;  %v9601_v60 = vld [vmem:[%s15254_s5 + $0x41c] sm:$0xf0]  ;;  %v7544_v61 = vor.u32 %v9709_v56, %v7541_v58 }
  0xba   :  { %2275 = vmatpush.bf16.msrb.mxu1 %v7444_v57  ;;  %2262 = vmatpush.bf16.msrb.mxu0 %v7188_v59  ;;  %v6936_v53 = vor.u32 %v9557_v51, %v6933_v52  ;;  %v9549_v54 = vld [vmem:[%s15254_s5 + $0x284] sm:$0xf]  ;;  %v7091_v59 = vld [vmem:[%s15254_s5 + $0x400] sm:$0xf] }
  0xbb   :  { %v6904_v57 = vor.u32 %v9549_v54, %v6901_v55  ;;  %v7092_v62 = vor.u32 %v9601_v60, %v7091_v59  ;;  %v7317_v5 = vld [vmem:[%s15254_s5 + $0x5e0] sm:$0xf0]  ;;  %v11126_v55 = vld [vmem:[%s15253_s4] sm:$0xf] }
  0xbc   :  { %v7320_v63 = vor.u32 %v9653_v3, %v7317_v5  ;;  %v9477_v23 = vld [vmem:[%s15254_s5 + $0x44] sm:$0xf]  ;;  %v9594_v5 = vld [vmem:[%s15254_s5 + $0x3e4] sm:$0xf0] }
  0xbd   :  { %2250 = vmatpush.bf16.msra.mxu3 %v6900_v1  ;;  %2237 = vmatpush.bf16.msra.mxu2 %v6644_v4  ;;  %v9493_v1 = vld [vmem:[%s15254_s5 + $0xc4] sm:$0xf] }
  0xbe   :  { %2276 = vmatpush.bf16.msrb.mxu1 %v7412_v0  ;;  %2263 = vmatpush.bf16.msrb.mxu0 %v7156_v7  ;;  %v6680_v4 = vor.u32 %v9493_v1, %v6677_v2  ;;  %v9541_v0 = vld [vmem:[%s15254_s5 + $0x244] sm:$0xf]  ;;  %v230_v2 = vperm.slane %v11126_v55, 0 }
  0xbf   :  { %v9701_v7 = vld [vmem:[%s15254_s5 + $0x744] sm:$0xf]  ;;  %v6872_v8 = vor.u32 %v9541_v0, %v6869_v6 }
  0xc0   :  { %v7512_v10 = vor.u32 %v9701_v7, %v7509_v9  ;;  %v6613_v24 = vld [vmem:[%s15254_s5 + $0x60] sm:$0xf0] }
  0xc1   :  { %2251 = vmatpush.bf16.msra.mxu3 %v6868_v11  ;;  %2238 = vmatpush.bf16.msra.mxu2 %v6612_v14  ;;  %v9485_v11 = vld [vmem:[%s15254_s5 + $0x84] sm:$0xf] }
  0xc2   :  { %2277 = vmatpush.bf16.msrb.mxu1 %v7380_v18  ;;  %2264 = vmatpush.bf16.msrb.mxu0 %v7124_v19  ;;  %v6648_v14 = vor.u32 %v9485_v11, %v6645_v12  ;;  %v6837_v18 = vld [vmem:[%s15254_s5 + $0x220] sm:$0xf0] }
  0xc3   :  { %v9693_v19 = vld [vmem:[%s15254_s5 + $0x704] sm:$0xf]  ;;  %v6840_v20 = vor.u32 %v9533_v17, %v6837_v18  ;;  %v9530_v17 = vld [vmem:[%s15254_s5 + $0x1e4] sm:$0xf0] }
  0xc4   :  { %v7480_v22 = vor.u32 %v9693_v19, %v7477_v21  ;;  %v7253_v27 = vld [vmem:[%s15254_s5 + $0x560] sm:$0xf0] }
  0xc5   :  { %2252 = vmatpush.bf16.msra.mxu3 %v6836_v25  ;;  %2239 = vmatpush.bf16.msra.mxu2 %v6580_v26  ;;  %v9637_v25 = vld [vmem:[%s15254_s5 + $0x544] sm:$0xf]  ;;  %v6616_v26 = vor.u32 %v9477_v23, %v6613_v24  ;;  %v9578_v23 = vld [vmem:[%s15254_s5 + $0x364] sm:$0xf0] }
  0xc6   :  { %2278 = vmatpush.bf16.msrb.mxu1 %v7348_v35  ;;  %2265 = vmatpush.bf16.msrb.mxu0 %v7092_v62  ;;  %v7256_v28 = vor.u32 %v9637_v25, %v7253_v27  ;;  %v7445_v30 = vld [vmem:[%s15254_s5 + $0x6e0] sm:$0xf0]  ;;  %v233_v27 = vperm.slane %v11126_v55, 3 }
  0xc7   :  { %v9469_v32 = vld [vmem:[%s15254_s5 + $0x4] sm:$0xf] }
  0xc8   :  { %v6581_v33 = vld [vmem:[%s15254_s5 + $0x20] sm:$0xf0] }
  0xc9   :  { %2297 = vmatpush.bf16.msrb.mxu3 %v7064_v29  ;;  %2284 = vmatpush.bf16.msrb.mxu2 %v6808_v31  ;;  %v9685_v29 = vld [vmem:[%s15254_s5 + $0x6c4] sm:$0xf]  ;;  %v6584_v35 = vor.u32 %v9469_v32, %v6581_v33 }
  0xca   :  { %2323 = vmatpush.bf16.msra.mxu1 %v7576_v36  ;;  %2310 = vmatpush.bf16.msra.mxu0 %v7320_v63  ;;  %v7448_v31 = vor.u32 %v9685_v29, %v7445_v30  ;;  %v9629_v34 = vld [vmem:[%s15254_s5 + $0x504] sm:$0xf]  ;;  %v9522_v29 = vld [vmem:[%s15254_s5 + $0x1a4] sm:$0xf0] }
  0xcb   :  { %v7221_v36 = vld [vmem:[%s15254_s5 + $0x520] sm:$0xf0] }
  0xcc   :  { %v9621_v41 = vld [vmem:[%s15254_s5 + $0x4c4] sm:$0xf] }
  0xcd   :  { %2298 = vmatpush.bf16.msrb.mxu3 %v7032_v37  ;;  %2285 = vmatpush.bf16.msrb.mxu2 %v6776_v39  ;;  %v7224_v37 = vor.u32 %v9629_v34, %v7221_v36  ;;  %v7413_v39 = vld [vmem:[%s15254_s5 + $0x6a0] sm:$0xf0]  ;;  %v6971_v34 = vld [vmem:[%s15254_s5 + $0x308] sm:$0xf] }
  0xce   :  { %2324 = vmatpush.bf16.msra.mxu1 %v7544_v61  ;;  %2311 = vmatpush.bf16.msra.mxu0 %v7288_v16  ;;  %v7416_v40 = vor.u32 %v9677_v38, %v7413_v39  ;;  %v7189_v42 = vld [vmem:[%s15254_s5 + $0x4e0] sm:$0xf0]  ;;  %v6811_v16 = vld [vmem:[%s15254_s5 + $0x1c8] sm:$0xf]  ;;  %v232_v39 = vperm.slane %v11126_v55, 2 }
  0xcf   :  { %v9613_v47 = vld [vmem:[%s15254_s5 + $0x484] sm:$0xf]  ;;  %v6812_v21 = vor.u32 %v9530_v17, %v6811_v16  ;;  %v9514_v38 = vld [vmem:[%s15254_s5 + $0x164] sm:$0xf0] }
  0xd0   :  { %v7157_v48 = vld [vmem:[%s15254_s5 + $0x4a0] sm:$0xf0] }
  0xd1   :  { %2299 = vmatpush.bf16.msrb.mxu3 %v7000_v43  ;;  %2286 = vmatpush.bf16.msrb.mxu2 %v6744_v45  ;;  %v7192_v43 = vor.u32 %v9621_v41, %v7189_v42  ;;  %v7381_v45 = vld [vmem:[%s15254_s5 + $0x660] sm:$0xf0]  ;;  %v6939_v42 = vld [vmem:[%s15254_s5 + $0x2c8] sm:$0xf] }
  0xd2   :  { %2325 = vmatpush.bf16.msra.mxu1 %v7512_v10  ;;  %2312 = vmatpush.bf16.msra.mxu0 %v7256_v28  ;;  %v7384_v46 = vor.u32 %v9669_v44, %v7381_v45  ;;  %v7349_v51 = vld [vmem:[%s15254_s5 + $0x620] sm:$0xf0]  ;;  %v6779_v28 = vld [vmem:[%s15254_s5 + $0x188] sm:$0xf] }
  0xd3   :  { %v7125_v54 = vld [vmem:[%s15254_s5 + $0x460] sm:$0xf0]  ;;  %v6780_v33 = vor.u32 %v9522_v29, %v6779_v28  ;;  %v7579_v45 = vld [vmem:[%s15254_s5 + $0x7c8] sm:$0xf] }
  0xd4   :  { %v9597_v58 = vld [vmem:[%s15254_s5 + $0x404] sm:$0xf]  ;;  %v7483_v28 = vld [vmem:[%s15254_s5 + $0x708] sm:$0xf] }
  0xd5   :  { %2300 = vmatpush.bf16.msrb.mxu3 %v6968_v49  ;;  %2287 = vmatpush.bf16.msrb.mxu2 %v6712_v50  ;;  %v7160_v49 = vor.u32 %v9613_v47, %v7157_v48  ;;  %v9661_v50 = vld [vmem:[%s15254_s5 + $0x604] sm:$0xf]  ;;  %v6715_v47 = vld [vmem:[%s15254_s5 + $0x108] sm:$0xf] }
  0xd6   :  { %2326 = vmatpush.bf16.msra.mxu1 %v7480_v22  ;;  %2313 = vmatpush.bf16.msra.mxu0 %v7224_v37  ;;  %v7352_v52 = vor.u32 %v9661_v50, %v7349_v51  ;;  %v7093_v59 = vld [vmem:[%s15254_s5 + $0x420] sm:$0xf0]  ;;  %v7003_v22 = vld [vmem:[%s15254_s5 + $0x348] sm:$0xf] }
  0xd7   :  { %v7096_v60 = vor.u32 %v9597_v58, %v7093_v59  ;;  %v7004_v30 = vor.u32 %v9578_v23, %v7003_v22  ;;  %v6747_v37 = vld [vmem:[%s15254_s5 + $0x148] sm:$0xf] }
  0xd8   :  { %v6748_v44 = vor.u32 %v9514_v38, %v6747_v37  ;;  %v9506_v51 = vld [vmem:[%s15254_s5 + $0x124] sm:$0xf0] }
  0xd9   :  { %2301 = vmatpush.bf16.msrb.mxu3 %v6936_v53  ;;  %2288 = vmatpush.bf16.msrb.mxu2 %v6680_v4  ;;  %v9605_v53 = vld [vmem:[%s15254_s5 + $0x444] sm:$0xf]  ;;  %v7067_v4 = vld [vmem:[%s15254_s5 + $0x3c8] sm:$0xf] }
  0xda   :  { %2327 = vmatpush.bf16.msra.mxu1 %v7448_v31  ;;  %2314 = vmatpush.bf16.msra.mxu0 %v7192_v43  ;;  %v7128_v56 = vor.u32 %v9605_v53, %v7125_v54  ;;  %v7068_v9 = vor.u32 %v9594_v5, %v7067_v4  ;;  %v9562_v43 = vld [vmem:[%s15254_s5 + $0x2e4] sm:$0xf0] }
  0xdb   :  { %v6940_v54 = vor.u32 %v9562_v43, %v6939_v42  ;;  %v9498_v4 = vld [vmem:[%s15254_s5 + $0xe4] sm:$0xf0] }
  0xdc   :  { %v7323_v5 = vld [vmem:[%s15254_s5 + $0x5c8] sm:$0xf] }
  0xdd   :  { %2302 = vmatpush.bf16.msrb.mxu3 %v6904_v57  ;;  %2289 = vmatpush.bf16.msrb.mxu2 %v6648_v14  ;;  %v231_v57 = vperm.slane %v11126_v55, 1  ;;  %v7035_v14 = vld [vmem:[%s15254_s5 + $0x388] sm:$0xf] }
  0xde   :  { %2328 = vmatpush.bf16.msra.mxu1 %v7416_v40  ;;  %2315 = vmatpush.bf16.msra.mxu0 %v7160_v49  ;;  %v7036_v19 = vor.u32 %v9586_v15, %v7035_v14  ;;  %v9650_v22 = vld [vmem:[%s15254_s5 + $0x5a4] sm:$0xf0] }
  0xdf   :  { %v9698_v29 = vld [vmem:[%s15254_s5 + $0x724] sm:$0xf0] }
  0xe0   :  { %v9642_v37 = vld [vmem:[%s15254_s5 + $0x564] sm:$0xf0] }
  0xe1   :  { %2303 = vmatpush.bf16.msrb.mxu3 %v6872_v8  ;;  %2290 = vmatpush.bf16.msrb.mxu2 %v6616_v26  ;;  %v9690_v42 = vld [vmem:[%s15254_s5 + $0x6e4] sm:$0xf0] }
  0xe2   :  { %2329 = vmatpush.bf16.msra.mxu1 %v7384_v46  ;;  %2316 = vmatpush.bf16.msra.mxu0 %v7128_v56  ;;  %v9722_v46 = vld [vmem:[%s15254_s5 + $0x7e4] sm:$0xf0] }
  0xe3   :  { %v7580_v55 = vor.u32 %v9722_v46, %v7579_v45  ;;  %v6907_v56 = vld [vmem:[%s15254_s5 + $0x288] sm:$0xf]  ;;  %v9582_v45 = vld [vmem:[%s15254_s5 + $0x38c] sm:$0xf] }
  0xe4   :  { %v7037_v46 = vld [vmem:[%s15254_s5 + $0x3a8] sm:$0xf0] }
  0xe5   :  { %2304 = vmatpush.bf16.msrb.mxu3 %v6840_v20  ;;  %2291 = vmatpush.bf16.msrb.mxu2 %v6584_v35  ;;  %v9570_v35 = vld [vmem:[%s15254_s5 + $0x324] sm:$0xf0] }
  0xe6   :  { %2330 = vmatpush.bf16.msra.mxu1 %v7352_v52  ;;  %2317 = vmatpush.bf16.msra.mxu0 %v7096_v60  ;;  %v6972_v41 = vor.u32 %v9570_v35, %v6971_v34  ;;  %v6619_v34 = vld [vmem:[%s15254_s5 + $0x48] sm:$0xf] }
  0xe7   :  { %v9482_v35 = vld [vmem:[%s15254_s5 + $0x64] sm:$0xf0] }
  0xe8   :  { %v6620_v43 = vor.u32 %v9482_v35, %v6619_v34  ;;  %v9550_v35 = vld [vmem:[%s15254_s5 + $0x28c] sm:$0xf] }
 0x125   :  { %v593_v61 = vpop.f32.mrf.mxu0  ;;  %v606_v62 = vpop.f32.mrf.mxu1 }
 0x126   :  { %v594_v1 = vadd.f32 %v593_v61, %v231_v57  ;;  %v6716_v61 = vor.u32 %v9506_v51, %v6715_v47  ;;  %v6587_v47 = vld [vmem:[%s15254_s5 + $0x8] sm:$0xf] }
 0x128   :  { %v607_v3 = vadd.f32 %v606_v62, %v594_v1  ;;  %v9554_v62 = vld [vmem:[%s15254_s5 + $0x2a4] sm:$0xf0] }
 0x129   :  { %v7547_v1 = vld [vmem:[%s15254_s5 + $0x788] sm:$0xf] }
 0x12a   :  { %vm663_vm4 = vcmp.gt.f32.partialorder %v607_v3, 0.0  ;;  %v667_v63 = vmul.f32 0.2, %v607_v3  ;;  %v567_v0 = vpop.f32.mrf.mxu2  ;;  %v580_v6 = vpop.f32.mrf.mxu3 }
 0x12b   :  { %v568_v7 = vadd.f32 %v567_v0, %v230_v2  ;;  %v9714_v2 = vld [vmem:[%s15254_s5 + $0x7a4] sm:$0xf0] }
 0x12c   :  { %v671_v8 = vsel %vm663_vm4, %v607_v3, %v667_v63  ;;  %v6683_v3 = vld [vmem:[%s15254_s5 + $0xc8] sm:$0xf] }
 0x12d   :  { %v11142_v10 = vpack.c.bf16 %v671_v8, %v671_v8  ;;  %v581_v11 = vadd.f32 %v580_v6, %v568_v7  ;;  %v595_v12 = vpop.f32.mrf.mxu0  ;;  %v608_v13 = vpop.f32.mrf.mxu1  ;;  %v9658_v0 = vld [vmem:[%s15254_s5 + $0x5e4] sm:$0xf0]  ;;  %v6908_v6 = vor.u32 %v9554_v62, %v6907_v56  ;;  %v7548_v7 = vor.u32 %v9714_v2, %v7547_v1 }
 0x12e   :  { %v6875_v8 = vld [vmem:[%s15254_s5 + $0x248] sm:$0xf]  ;;  %v6684_v17 = vor.u32 %v9498_v4, %v6683_v3  ;;  %v9518_v4 = vld [vmem:[%s15254_s5 + $0x18c] sm:$0xf] }
 0x12f   :  { %vm662_vm5 = vcmp.gt.f32.partialorder %v581_v11, 0.0  ;;  %v666_v18 = vmul.f32 0.2, %v581_v11  ;;  %2253 = vmatmul.bf16.vlgmr.msra.gmra.mxu3 %v11142_v10  ;;  %v7515_v12 = vld [vmem:[%s15254_s5 + $0x748] sm:$0xf] }
 0x130   :  { %2349 = vmatpush.bf16.msra.mxu3 %v7068_v9  ;;  %v9706_v13 = vld [vmem:[%s15254_s5 + $0x764] sm:$0xf0] }
 0x131   :  { %v670_v20 = vsel %vm662_vm5, %v581_v11, %v666_v18  ;;  %v9546_v11 = vld [vmem:[%s15254_s5 + $0x264] sm:$0xf0]  ;;  %v7324_v18 = vor.u32 %v9658_v0, %v7323_v5  ;;  %v6781_v5 = vld [vmem:[%s15254_s5 + $0x1a8] sm:$0xf0] }
 0x132   :  { %v11163_v24 = vpack.c.bf16 %v670_v20, %v670_v20  ;;  %v569_v25 = vpop.f32.mrf.mxu2  ;;  %v582_v26 = vpop.f32.mrf.mxu3  ;;  %v9490_v20 = vld [vmem:[%s15254_s5 + $0xa4] sm:$0xf0]  ;;  %v6876_v23 = vor.u32 %v9546_v11, %v6875_v8  ;;  %v9566_v8 = vld [vmem:[%s15254_s5 + $0x30c] sm:$0xf]  ;;  %v6784_v11 = vor.u32 %v9518_v4, %v6781_v5 }
 0x133   :  { %v7516_v25 = vor.u32 %v9706_v13, %v7515_v12  ;;  %v6843_v26 = vld [vmem:[%s15254_s5 + $0x208] sm:$0xf]  ;;  %v7485_v4 = vld [vmem:[%s15254_s5 + $0x728] sm:$0xf0] }
 0x134   :  { %2350 = vmatpush.bf16.msra.mxu3 %v7036_v19  ;;  %2240 = vmatmul.bf16.vlgmr.msra.gmra.mxu2 %v11163_v24  ;;  %v6651_v19 = vld [vmem:[%s15254_s5 + $0x88] sm:$0xf] }
 0x135   :  { %v645_v31 = vpop.f32.mrf.mxu0  ;;  %v658_v32 = vpop.f32.mrf.mxu1  ;;  %2336 = vmatpush.bf16.msra.mxu2 %v6812_v21  ;;  %v7291_v21 = vld [vmem:[%s15254_s5 + $0x588] sm:$0xf] }
 0x136   :  { %v646_v36 = vadd.f32 %v645_v31, %v233_v27  ;;  %v9538_v27 = vld [vmem:[%s15254_s5 + $0x224] sm:$0xf0]  ;;  %v7292_v31 = vor.u32 %v9650_v22, %v7291_v21  ;;  %v9558_v21 = vld [vmem:[%s15254_s5 + $0x2cc] sm:$0xf] }
 0x137   :  { %v6844_v38 = vor.u32 %v9538_v27, %v6843_v26  ;;  %v9682_v56 = vld [vmem:[%s15254_s5 + $0x6a4] sm:$0xf0]  ;;  %v7581_v26 = vld [vmem:[%s15254_s5 + $0x7e8] sm:$0xf0] }
 0x138   :  { %v659_v40 = vadd.f32 %v658_v32, %v646_v36  ;;  %2351 = vmatpush.bf16.msra.mxu3 %v7004_v30  ;;  %v6652_v30 = vor.u32 %v9490_v20, %v6651_v19  ;;  %v9590_v32 = vld [vmem:[%s15254_s5 + $0x3cc] sm:$0xf]  ;;  %v7259_v36 = vld [vmem:[%s15254_s5 + $0x548] sm:$0xf] }
 0x139   :  { %2337 = vmatpush.bf16.msra.mxu2 %v6780_v33  ;;  %v7069_v33 = vld [vmem:[%s15254_s5 + $0x3e8] sm:$0xf0]  ;;  %v7195_v1 = vld [vmem:[%s15254_s5 + $0x4c8] sm:$0xf] }
 0x13a   :  { %vm665_vm6 = vcmp.gt.f32.partialorder %v659_v40, 0.0  ;;  %v669_v48 = vmul.f32 0.2, %v659_v40  ;;  %v619_v49 = vpop.f32.mrf.mxu2  ;;  %v632_v50 = vpop.f32.mrf.mxu3  ;;  %v9626_v2 = vld [vmem:[%s15254_s5 + $0x4e4] sm:$0xf0] }
 0x13b   :  { %v620_v52 = vadd.f32 %v619_v49, %v232_v39  ;;  %v7484_v39 = vor.u32 %v9698_v29, %v7483_v28  ;;  %v7227_v49 = vld [vmem:[%s15254_s5 + $0x508] sm:$0xf] }
 0x13c   :  { %v673_v53 = vsel %vm665_vm6, %v659_v40, %v669_v48  ;;  %2352 = vmatpush.bf16.msra.mxu3 %v6972_v41  ;;  %v7072_v40 = vor.u32 %v9590_v32, %v7069_v33  ;;  %v7451_v41 = vld [vmem:[%s15254_s5 + $0x6c8] sm:$0xf]  ;;  %v6717_v32 = vld [vmem:[%s15254_s5 + $0x128] sm:$0xf0] }
 0x13d   :  { %v11207_v57 = vpack.c.bf16 %v673_v53, %v673_v53  ;;  %v633_v58 = vadd.f32 %v632_v50, %v620_v52  ;;  %v647_v59 = vpop.f32.mrf.mxu0  ;;  %v660_v60 = vpop.f32.mrf.mxu1  ;;  %2338 = vmatpush.bf16.msra.mxu2 %v6748_v44  ;;  %v7260_v44 = vor.u32 %v9642_v37, %v7259_v36  ;;  %v9474_v48 = vld [vmem:[%s15254_s5 + $0x24] sm:$0xf0]  ;;  %v7452_v51 = vor.u32 %v9690_v42, %v7451_v41  ;;  %v9526_v52 = vld [vmem:[%s15254_s5 + $0x1cc] sm:$0xf] }
 0x13e   :  { %v9634_v50 = vld [vmem:[%s15254_s5 + $0x524] sm:$0xf0]  ;;  %v6813_v53 = vld [vmem:[%s15254_s5 + $0x1e8] sm:$0xf0] }
 0x13f   :  { %vm664_vm7 = vcmp.gt.f32.partialorder %v633_v58, 0.0  ;;  %v668_v63 = vmul.f32 0.2, %v633_v58  ;;  %2279 = vmatmul.bf16.vlgmr.msrb.gmra.mxu1 %v11207_v57  ;;  %2305 = vmatmul.bf16.vlgmr.msrb.gmra.mxu3 %v11142_v10  ;;  %v7228_v59 = vor.u32 %v9634_v50, %v7227_v49  ;;  %v9574_v60 = vld [vmem:[%s15254_s5 + $0x34c] sm:$0xf]  ;;  %v6816_v62 = vor.u32 %v9526_v52, %v6813_v53 }
 0x140   :  { %2353 = vmatpush.bf16.msra.mxu3 %v6940_v54  ;;  %2375 = vmatpush.bf16.msrb.mxu1 %v7580_v55  ;;  %v7040_v54 = vor.u32 %v9582_v45, %v7037_v46  ;;  %v7419_v55 = vld [vmem:[%s15254_s5 + $0x688] sm:$0xf]  ;;  %v6909_v37 = vld [vmem:[%s15254_s5 + $0x2a8] sm:$0xf0] }
 0x141   :  { %v672_v9 = vsel %vm664_vm7, %v633_v58, %v668_v63  ;;  %2339 = vmatpush.bf16.msra.mxu2 %v6716_v61  ;;  %v6588_v58 = vor.u32 %v9474_v48, %v6587_v47  ;;  %v7005_v61 = vld [vmem:[%s15254_s5 + $0x368] sm:$0xf0]  ;;  %v7420_v3 = vor.u32 %v9682_v56, %v7419_v55  ;;  %v7387_v0 = vld [vmem:[%s15254_s5 + $0x648] sm:$0xf]  ;;  %v6912_v47 = vor.u32 %v9550_v35, %v6909_v37  ;;  %v7011_v35 = vld [vmem:[%s15254_s5 + $0x350] sm:$0xf] }
 0x142   :  { %v11244_v14 = vpack.c.bf16 %v672_v9, %v672_v9  ;;  %v621_v15 = vpop.f32.mrf.mxu2  ;;  %v634_v16 = vpop.f32.mrf.mxu3  ;;  %v7008_v63 = vor.u32 %v9574_v60, %v7005_v61  ;;  %v6973_v9 = vld [vmem:[%s15254_s5 + $0x328] sm:$0xf0]  ;;  %v7163_v12 = vld [vmem:[%s15254_s5 + $0x488] sm:$0xf] }
 0x143   :  { %v9618_v13 = vld [vmem:[%s15254_s5 + $0x4a4] sm:$0xf0]  ;;  %v9510_v16 = vld [vmem:[%s15254_s5 + $0x14c] sm:$0xf] }
 0x144   :  { %2354 = vmatpush.bf16.msra.mxu3 %v6908_v6  ;;  %2376 = vmatpush.bf16.msrb.mxu1 %v7548_v7  ;;  %v9674_v6 = vld [vmem:[%s15254_s5 + $0x664] sm:$0xf0]  ;;  %v7196_v7 = vor.u32 %v9626_v2, %v7195_v1  ;;  %v7164_v22 = vor.u32 %v9618_v13, %v7163_v12  ;;  %v9654_v45 = vld [vmem:[%s15254_s5 + $0x5cc] sm:$0xf] }
 0x145   :  { %2266 = vmatmul.bf16.vlgmr.msrb.gmra.mxu0 %v11244_v14  ;;  %2292 = vmatmul.bf16.vlgmr.msrb.gmra.mxu2 %v11163_v24  ;;  %v7388_v15 = vor.u32 %v9674_v6, %v7387_v0  ;;  %v7355_v19 = vld [vmem:[%s15254_s5 + $0x608] sm:$0xf]  ;;  %v7325_v46 = vld [vmem:[%s15254_s5 + $0x5e8] sm:$0xf0]  ;;  %v7075_v0 = vld [vmem:[%s15254_s5 + $0x3d0] sm:$0xf] }
 0x146   :  { %2340 = vmatpush.bf16.msra.mxu2 %v6684_v17  ;;  %2362 = vmatpush.bf16.msrb.mxu0 %v7324_v18  ;;  %v6749_v17 = vld [vmem:[%s15254_s5 + $0x168] sm:$0xf0]  ;;  %v6976_v18 = vor.u32 %v9566_v8, %v6973_v9  ;;  %v9666_v20 = vld [vmem:[%s15254_s5 + $0x624] sm:$0xf0]  ;;  %v7328_v55 = vor.u32 %v9654_v45, %v7325_v46  ;;  %v9595_v6 = vld [vmem:[%s15254_s5 + $0x3ec] sm:$0xf0] }
 0x147   :  { %v6752_v27 = vor.u32 %v9510_v16, %v6749_v17  ;;  %v7131_v28 = vld [vmem:[%s15254_s5 + $0x448] sm:$0xf]  ;;  %v9542_v49 = vld [vmem:[%s15254_s5 + $0x24c] sm:$0xf] }
 0x148   :  { %2355 = vmatpush.bf16.msra.mxu3 %v6876_v23  ;;  %2377 = vmatpush.bf16.msrb.mxu1 %v7516_v25  ;;  %v6941_v23 = vld [vmem:[%s15254_s5 + $0x2e8] sm:$0xf0]  ;;  %v9610_v29 = vld [vmem:[%s15254_s5 + $0x464] sm:$0xf0] }
 0x149   :  { %v9718_v25 = vld [vmem:[%s15254_s5 + $0x7cc] sm:$0xf]  ;;  %v6944_v33 = vor.u32 %v9558_v21, %v6941_v23  ;;  %v7132_v36 = vor.u32 %v9610_v29, %v7131_v28  ;;  %v7099_v41 = vld [vmem:[%s15254_s5 + $0x408] sm:$0xf]  ;;  %v9587_v21 = vld [vmem:[%s15254_s5 + $0x3ac] sm:$0xf0] }
 0x14a   :  { %2341 = vmatpush.bf16.msra.mxu2 %v6652_v30  ;;  %2363 = vmatpush.bf16.msrb.mxu0 %v7292_v31  ;;  %v7356_v30 = vor.u32 %v9666_v20, %v7355_v19  ;;  %v9502_v31 = vld [vmem:[%s15254_s5 + $0x10c] sm:$0xf]  ;;  %v7584_v34 = vor.u32 %v9718_v25, %v7581_v26  ;;  %v9602_v42 = vld [vmem:[%s15254_s5 + $0x424] sm:$0xf0]  ;;  %v7043_v20 = vld [vmem:[%s15254_s5 + $0x390] sm:$0xf] }
 0x14b   :  { %v7100_v50 = vor.u32 %v9602_v42, %v7099_v41  ;;  %v9702_v52 = vld [vmem:[%s15254_s5 + $0x74c] sm:$0xf]  ;;  %v6819_v28 = vld [vmem:[%s15254_s5 + $0x1d0] sm:$0xf] }
 0x14c   :  { %2356 = vmatpush.bf16.msra.mxu3 %v6844_v38  ;;  %2378 = vmatpush.bf16.msrb.mxu1 %v7484_v39  ;;  %v9710_v38 = vld [vmem:[%s15254_s5 + $0x78c] sm:$0xf]  ;;  %v9531_v29 = vld [vmem:[%s15254_s5 + $0x1ec] sm:$0xf0] }
 0x14d   :  { %v7549_v39 = vld [vmem:[%s15254_s5 + $0x7a8] sm:$0xf0]  ;;  %v6820_v37 = vor.u32 %v9531_v29, %v6819_v28  ;;  %v6787_v41 = vld [vmem:[%s15254_s5 + $0x190] sm:$0xf] }
 0x14e   :  { %2342 = vmatpush.bf16.msra.mxu2 %v6620_v43  ;;  %2364 = vmatpush.bf16.msrb.mxu0 %v7260_v44  ;;  %v9494_v43 = vld [vmem:[%s15254_s5 + $0xcc] sm:$0xf]  ;;  %v7552_v48 = vor.u32 %v9710_v38, %v7549_v39  ;;  %v9523_v42 = vld [vmem:[%s15254_s5 + $0x1ac] sm:$0xf0] }
 0x14f   :  { %2331 = vmatmul.bf16.vlgmr.msra.gmra.mxu1 %v11207_v57  ;;  %2357 = vmatmul.bf16.vlgmr.msra.gmra.mxu3 %v11142_v10  ;;  %v6685_v44 = vld [vmem:[%s15254_s5 + $0xe8] sm:$0xf0] }
 0x150   :  { %2401 = vmatpush.bf16.msrb.mxu3 %v7072_v40  ;;  %2379 = vmatpush.bf16.msrb.mxu1 %v7452_v51  ;;  %v6720_v40 = vor.u32 %v9502_v31, %v6717_v32  ;;  %v6877_v51 = vld [vmem:[%s15254_s5 + $0x268] sm:$0xf0] }
 0x151   :  { %v7517_v53 = vld [vmem:[%s15254_s5 + $0x768] sm:$0xf0]  ;;  %v6880_v61 = vor.u32 %v9542_v49, %v6877_v51  ;;  %v6788_v49 = vor.u32 %v9523_v42, %v6787_v41  ;;  %v9699_v41 = vld [vmem:[%s15254_s5 + $0x72c] sm:$0xf0] }
 0x152   :  { %2343 = vmatpush.bf16.msra.mxu2 %v6588_v58  ;;  %2365 = vmatpush.bf16.msrb.mxu0 %v7228_v59  ;;  %v9486_v56 = vld [vmem:[%s15254_s5 + $0x8c] sm:$0xf] }
 0x153   :  { %v6653_v58 = vld [vmem:[%s15254_s5 + $0xa8] sm:$0xf0] }
 0x154   :  { %2402 = vmatpush.bf16.msrb.mxu3 %v7040_v54  ;;  %2380 = vmatpush.bf16.msrb.mxu1 %v7420_v3  ;;  %v6688_v54 = vor.u32 %v9494_v43, %v6685_v44  ;;  %v9646_v59 = vld [vmem:[%s15254_s5 + $0x58c] sm:$0xf]  ;;  %v6656_v5 = vor.u32 %v9486_v56, %v6653_v58 }
 0x155   :  { %2318 = vmatmul.bf16.vlgmr.msra.gmra.mxu0 %v11244_v14  ;;  %2344 = vmatmul.bf16.vlgmr.msra.gmra.mxu2 %v11163_v24  ;;  %v7293_v60 = vld [vmem:[%s15254_s5 + $0x5a8] sm:$0xf0] }
 0x156   :  { %2388 = vmatpush.bf16.msrb.mxu2 %v6816_v62  ;;  %2366 = vmatpush.bf16.msrb.mxu0 %v7196_v7  ;;  %v7520_v62 = vor.u32 %v9702_v52, %v7517_v53  ;;  %v9534_v1 = vld [vmem:[%s15254_s5 + $0x20c] sm:$0xf]  ;;  %v6755_v53 = vld [vmem:[%s15254_s5 + $0x150] sm:$0xf] }
 0x157   :  { %v6845_v2 = vld [vmem:[%s15254_s5 + $0x228] sm:$0xf0] }
 0x158   :  { %2403 = vmatpush.bf16.msrb.mxu3 %v7008_v63  ;;  %2381 = vmatpush.bf16.msrb.mxu1 %v7388_v15  ;;  %v9694_v3 = vld [vmem:[%s15254_s5 + $0x70c] sm:$0xf]  ;;  %v7296_v63 = vor.u32 %v9646_v59, %v7293_v60  ;;  %v6848_v12 = vor.u32 %v9534_v1, %v6845_v2  ;;  %v7076_v15 = vor.u32 %v9595_v6, %v7075_v0  ;;  %v6947_v59 = vld [vmem:[%s15254_s5 + $0x2d0] sm:$0xf] }
 0x159   :  { %v9478_v7 = vld [vmem:[%s15254_s5 + $0x4c] sm:$0xf]  ;;  %v7488_v13 = vor.u32 %v9694_v3, %v7485_v4  ;;  %v9723_v1 = vld [vmem:[%s15254_s5 + $0x7ec] sm:$0xf0] }
 0x15a   :  { %2389 = vmatpush.bf16.msrb.mxu2 %v6784_v11  ;;  %2367 = vmatpush.bf16.msrb.mxu0 %v7164_v22  ;;  %v6621_v8 = vld [vmem:[%s15254_s5 + $0x68] sm:$0xf0]  ;;  %v9507_v0 = vld [vmem:[%s15254_s5 + $0x12c] sm:$0xf0] }
 0x15b   :  { %v9638_v9 = vld [vmem:[%s15254_s5 + $0x54c] sm:$0xf] }
 0x15c   :  { %2404 = vmatpush.bf16.msrb.mxu3 %v6976_v18  ;;  %2382 = vmatpush.bf16.msrb.mxu1 %v7356_v30  ;;  %v7261_v11 = vld [vmem:[%s15254_s5 + $0x568] sm:$0xf0]  ;;  %v6624_v18 = vor.u32 %v9478_v7, %v6621_v8  ;;  %v7044_v30 = vor.u32 %v9587_v21, %v7043_v20  ;;  %v6915_v8 = vld [vmem:[%s15254_s5 + $0x290] sm:$0xf] }
 0x15d   :  { %v9686_v16 = vld [vmem:[%s15254_s5 + $0x6cc] sm:$0xf]  ;;  %v7264_v19 = vor.u32 %v9638_v9, %v7261_v11  ;;  %v9555_v11 = vld [vmem:[%s15254_s5 + $0x2ac] sm:$0xf0] }
 0x15e   :  { %2390 = vmatpush.bf16.msrb.mxu2 %v6752_v27  ;;  %2368 = vmatpush.bf16.msrb.mxu0 %v7132_v36  ;;  %v7453_v17 = vld [vmem:[%s15254_s5 + $0x6e8] sm:$0xf0]  ;;  %v9579_v36 = vld [vmem:[%s15254_s5 + $0x36c] sm:$0xf0] }
 0x15f   :  { %2383 = vmatmul.bf16.vlgmr.msrb.gmra.mxu1 %v11207_v57  ;;  %v9470_v22 = vld [vmem:[%s15254_s5 + $0xc] sm:$0xf]  ;;  %v7456_v27 = vor.u32 %v9686_v16, %v7453_v17  ;;  %v7012_v43 = vor.u32 %v9579_v36, %v7011_v35  ;;  %v7331_v20 = vld [vmem:[%s15254_s5 + $0x5d0] sm:$0xf] }
 0x160   :  { %2405 = vmatpush.bf16.msrb.mxu3 %v6944_v33  ;;  %2427 = vmatpush.bf16.msra.mxu1 %v7584_v34  ;;  %v6589_v23 = vld [vmem:[%s15254_s5 + $0x28] sm:$0xf0]  ;;  %v9659_v21 = vld [vmem:[%s15254_s5 + $0x5ec] sm:$0xf0] }
 0x161   :  { %v9630_v25 = vld [vmem:[%s15254_s5 + $0x50c] sm:$0xf]  ;;  %v6592_v33 = vor.u32 %v9470_v22, %v6589_v23  ;;  %v6916_v22 = vor.u32 %v9555_v11, %v6915_v8  ;;  %v7332_v29 = vor.u32 %v9659_v21, %v7331_v20  ;;  %v9651_v35 = vld [vmem:[%s15254_s5 + $0x5ac] sm:$0xf0]  ;;  %v9575_v8 = vld [vmem:[%s15254_s5 + $0x354] sm:$0xf] }
 0x162   :  { %2391 = vmatpush.bf16.msrb.mxu2 %v6720_v40  ;;  %2369 = vmatpush.bf16.msrb.mxu0 %v7100_v50  ;;  %v7229_v26 = vld [vmem:[%s15254_s5 + $0x528] sm:$0xf0]  ;;  %v7013_v11 = vld [vmem:[%s15254_s5 + $0x370] sm:$0xf0]  ;;  %v7395_v20 = vld [vmem:[%s15254_s5 + $0x650] sm:$0xf] }
 0x163   :  { %v9678_v31 = vld [vmem:[%s15254_s5 + $0x68c] sm:$0xf]  ;;  %v7232_v34 = vor.u32 %v9630_v25, %v7229_v26  ;;  %v6883_v26 = vld [vmem:[%s15254_s5 + $0x250] sm:$0xf] }
 0x164   :  { %2406 = vmatpush.bf16.msrb.mxu3 %v6912_v47  ;;  %2428 = vmatpush.bf16.msra.mxu1 %v7552_v48  ;;  %v7421_v32 = vld [vmem:[%s15254_s5 + $0x6a8] sm:$0xf0]  ;;  %v6979_v47 = vld [vmem:[%s15254_s5 + $0x310] sm:$0xf] }
 0x165   :  { %2370 = vmatmul.bf16.vlgmr.msrb.gmra.mxu0 %v11244_v14  ;;  %v9622_v38 = vld [vmem:[%s15254_s5 + $0x4cc] sm:$0xf]  ;;  %v7424_v40 = vor.u32 %v9678_v31, %v7421_v32  ;;  %v9571_v48 = vld [vmem:[%s15254_s5 + $0x32c] sm:$0xf0] }
 0x166   :  { %2392 = vmatpush.bf16.msrb.mxu2 %v6688_v54  ;;  %2414 = vmatpush.bf16.msra.mxu0 %v7328_v55  ;;  %v7197_v39 = vld [vmem:[%s15254_s5 + $0x4e8] sm:$0xf0]  ;;  %v9515_v54 = vld [vmem:[%s15254_s5 + $0x16c] sm:$0xf0]  ;;  %v6980_v55 = vor.u32 %v9571_v48, %v6979_v47 }
 0x167   :  { %v9670_v44 = vld [vmem:[%s15254_s5 + $0x64c] sm:$0xf]  ;;  %v7200_v46 = vor.u32 %v9622_v38, %v7197_v39  ;;  %v6756_v2 = vor.u32 %v9515_v54, %v6755_v53  ;;  %v9707_v31 = vld [vmem:[%s15254_s5 + $0x76c] sm:$0xf0] }
 0x168   :  { %2407 = vmatpush.bf16.msrb.mxu3 %v6880_v61  ;;  %2429 = vmatpush.bf16.msra.mxu1 %v7520_v62  ;;  %v7389_v45 = vld [vmem:[%s15254_s5 + $0x668] sm:$0xf0]  ;;  %v9563_v61 = vld [vmem:[%s15254_s5 + $0x2ec] sm:$0xf0] }
 0x169   :  { %v9614_v50 = vld [vmem:[%s15254_s5 + $0x48c] sm:$0xf]  ;;  %v7392_v52 = vor.u32 %v9670_v44, %v7389_v45  ;;  %v7587_v62 = vld [vmem:[%s15254_s5 + $0x7d0] sm:$0xf]  ;;  %v6948_v6 = vor.u32 %v9563_v61, %v6947_v59  ;;  %v9591_v44 = vld [vmem:[%s15254_s5 + $0x3d4] sm:$0xf] }
 0x16a   :  { %2393 = vmatpush.bf16.msrb.mxu2 %v6656_v5  ;;  %2415 = vmatpush.bf16.msra.mxu0 %v7296_v63  ;;  %v7165_v51 = vld [vmem:[%s15254_s5 + $0x4a8] sm:$0xf0]  ;;  %v6723_v63 = vld [vmem:[%s15254_s5 + $0x110] sm:$0xf]  ;;  %v7588_v7 = vor.u32 %v9723_v1, %v7587_v62  ;;  %v7077_v45 = vld [vmem:[%s15254_s5 + $0x3f0] sm:$0xf0] }
 0x16b   :  { %v9662_v56 = vld [vmem:[%s15254_s5 + $0x60c] sm:$0xf]  ;;  %v7168_v60 = vor.u32 %v9614_v50, %v7165_v51  ;;  %v6659_v32 = vld [vmem:[%s15254_s5 + $0x90] sm:$0xf]  ;;  %v7045_v59 = vld [vmem:[%s15254_s5 + $0x3b0] sm:$0xf0] }
 0x16c   :  { %2408 = vmatpush.bf16.msrb.mxu3 %v6848_v12  ;;  %2430 = vmatpush.bf16.msra.mxu1 %v7488_v13  ;;  %v7357_v58 = vld [vmem:[%s15254_s5 + $0x628] sm:$0xf0]  ;;  %v7555_v12 = vld [vmem:[%s15254_s5 + $0x790] sm:$0xf] }
 0x16d   :  { %v9606_v3 = vld [vmem:[%s15254_s5 + $0x44c] sm:$0xf]  ;;  %v7360_v5 = vor.u32 %v9662_v56, %v7357_v58  ;;  %v9715_v13 = vld [vmem:[%s15254_s5 + $0x7ac] sm:$0xf0]  ;;  %v9583_v58 = vld [vmem:[%s15254_s5 + $0x394] sm:$0xf] }
 0x16e   :  { %2394 = vmatpush.bf16.msrb.mxu2 %v6624_v18  ;;  %2416 = vmatpush.bf16.msra.mxu0 %v7264_v19  ;;  %v7133_v4 = vld [vmem:[%s15254_s5 + $0x468] sm:$0xf0]  ;;  %v6691_v18 = vld [vmem:[%s15254_s5 + $0xd0] sm:$0xf]  ;;  %v7556_v23 = vor.u32 %v9715_v13, %v7555_v12 }
 0x16f   :  { %2409 = vmatmul.bf16.vlgmr.msrb.gmra.mxu3 %v11142_v10  ;;  %v7136_v9 = vor.u32 %v9606_v3, %v7133_v4  ;;  %v9598_v16 = vld [vmem:[%s15254_s5 + $0x40c] sm:$0xf]  ;;  %v9499_v19 = vld [vmem:[%s15254_s5 + $0xec] sm:$0xf0]  ;;  %v6821_v3 = vld [vmem:[%s15254_s5 + $0x1f0] sm:$0xf0] }
 0x170   :  { %2453 = vmatpush.bf16.msra.mxu3 %v7076_v15  ;;  %2431 = vmatpush.bf16.msra.mxu1 %v7456_v27  ;;  %v6724_v15 = vor.u32 %v9507_v0, %v6723_v63  ;;  %v7101_v17 = vld [vmem:[%s15254_s5 + $0x428] sm:$0xf0]  ;;  %v9547_v27 = vld [vmem:[%s15254_s5 + $0x26c] sm:$0xf0]  ;;  %v6692_v28 = vor.u32 %v9499_v19, %v6691_v18  ;;  %v7016_v18 = vor.u32 %v9575_v8, %v7013_v11  ;;  %v7301_v8 = vld [vmem:[%s15254_s5 + $0x5b0] sm:$0xf0] }
 0x171   :  { %v7104_v25 = vor.u32 %v9598_v16, %v7101_v17  ;;  %v6884_v36 = vor.u32 %v9547_v27, %v6883_v26  ;;  %v9539_v39 = vld [vmem:[%s15254_s5 + $0x22c] sm:$0xf0]  ;;  %v6789_v16 = vld [vmem:[%s15254_s5 + $0x1b0] sm:$0xf0] }
 0x172   :  { %2395 = vmatpush.bf16.msrb.mxu2 %v6592_v33  ;;  %2417 = vmatpush.bf16.msra.mxu0 %v7232_v34  ;;  %v9491_v33 = vld [vmem:[%s15254_s5 + $0xac] sm:$0xf0]  ;;  %v9535_v11 = vld [vmem:[%s15254_s5 + $0x214] sm:$0xf] }
 0x173   :  { %v7299_v34 = vld [vmem:[%s15254_s5 + $0x590] sm:$0xf]  ;;  %v6660_v42 = vor.u32 %v9491_v33, %v6659_v32 }
 0x174   :  { %2454 = vmatpush.bf16.msra.mxu3 %v7044_v30  ;;  %2432 = vmatpush.bf16.msra.mxu1 %v7424_v40  ;;  %v7523_v30 = vld [vmem:[%s15254_s5 + $0x750] sm:$0xf] }
 0x175   :  { %2396 = vmatmul.bf16.vlgmr.msrb.gmra.mxu2 %v11163_v24  ;;  %v7524_v38 = vor.u32 %v9707_v31, %v7523_v30  ;;  %v7491_v40 = vld [vmem:[%s15254_s5 + $0x710] sm:$0xf] }
 0x176   :  { %2440 = vmatpush.bf16.msra.mxu2 %v6820_v37  ;;  %2418 = vmatpush.bf16.msra.mxu0 %v7200_v46  ;;  %v6851_v37 = vld [vmem:[%s15254_s5 + $0x210] sm:$0xf]  ;;  %v7492_v51 = vor.u32 %v9699_v41, %v7491_v40 }
 0x177   :  { %v6627_v46 = vld [vmem:[%s15254_s5 + $0x50] sm:$0xf]  ;;  %v6852_v50 = vor.u32 %v9539_v39, %v6851_v37  ;;  %v7589_v39 = vld [vmem:[%s15254_s5 + $0x7f0] sm:$0xf0] }
 0x178   :  { %2455 = vmatpush.bf16.msra.mxu3 %v7012_v43  ;;  %2433 = vmatpush.bf16.msra.mxu1 %v7392_v52  ;;  %v7300_v43 = vor.u32 %v9651_v35, %v7299_v34  ;;  %v9483_v47 = vld [vmem:[%s15254_s5 + $0x6c] sm:$0xf0]  ;;  %v7080_v52 = vor.u32 %v9591_v44, %v7077_v45  ;;  %v9559_v35 = vld [vmem:[%s15254_s5 + $0x2d4] sm:$0xf] }
 0x179   :  { %v7267_v48 = vld [vmem:[%s15254_s5 + $0x550] sm:$0xf] }
 0x17a   :  { %2441 = vmatpush.bf16.msra.mxu2 %v6788_v49  ;;  %2419 = vmatpush.bf16.msra.mxu0 %v7168_v60  ;;  %v9643_v49 = vld [vmem:[%s15254_s5 + $0x56c] sm:$0xf0] }
 0x17b   :  { %v7459_v53 = vld [vmem:[%s15254_s5 + $0x6d0] sm:$0xf]  ;;  %v7268_v56 = vor.u32 %v9643_v49, %v7267_v48  ;;  %v6917_v48 = vld [vmem:[%s15254_s5 + $0x2b0] sm:$0xf0] }
 0x17c   :  { %2456 = vmatpush.bf16.msra.mxu3 %v6980_v55  ;;  %2434 = vmatpush.bf16.msra.mxu1 %v7360_v5  ;;  %v9691_v54 = vld [vmem:[%s15254_s5 + $0x6ec] sm:$0xf0]  ;;  %v6628_v55 = vor.u32 %v9483_v47, %v6627_v46  ;;  %v7048_v5 = vor.u32 %v9583_v58, %v7045_v59  ;;  %v9551_v47 = vld [vmem:[%s15254_s5 + $0x294] sm:$0xf] }
 0x17d   :  { %v6595_v60 = vld [vmem:[%s15254_s5 + $0x10] sm:$0xf]  ;;  %v7460_v4 = vor.u32 %v9691_v54, %v7459_v53  ;;  %v9655_v58 = vld [vmem:[%s15254_s5 + $0x5d4] sm:$0xf] }
 0x17e   :  { %2442 = vmatpush.bf16.msra.mxu2 %v6756_v2  ;;  %2420 = vmatpush.bf16.msra.mxu0 %v7136_v9  ;;  %v9475_v61 = vld [vmem:[%s15254_s5 + $0x2c] sm:$0xf0]  ;;  %v9527_v2 = vld [vmem:[%s15254_s5 + $0x1d4] sm:$0xf] }
 0x17f   :  { %2435 = vmatmul.bf16.vlgmr.msra.gmra.mxu1 %v11207_v57  ;;  %v7235_v62 = vld [vmem:[%s15254_s5 + $0x510] sm:$0xf]  ;;  %v6596_v63 = vor.u32 %v9475_v61, %v6595_v60  ;;  %v6824_v9 = vor.u32 %v9527_v2, %v6821_v3  ;;  %v7333_v59 = vld [vmem:[%s15254_s5 + $0x5f0] sm:$0xf0]  ;;  %v6920_v60 = vor.u32 %v9551_v47, %v6917_v48  ;;  %v7019_v47 = vld [vmem:[%s15254_s5 + $0x358] sm:$0xf] }
 0x180   :  { %2457 = vmatpush.bf16.msra.mxu3 %v6948_v6  ;;  %2479 = vmatpush.bf16.msrb.mxu1 %v7588_v7  ;;  %v9635_v1 = vld [vmem:[%s15254_s5 + $0x52c] sm:$0xf0]  ;;  %v9543_v2 = vld [vmem:[%s15254_s5 + $0x254] sm:$0xf] }
 0x181   :  { %v7236_v0 = vor.u32 %v9635_v1, %v7235_v62  ;;  %v7427_v6 = vld [vmem:[%s15254_s5 + $0x690] sm:$0xf]  ;;  %v6885_v3 = vld [vmem:[%s15254_s5 + $0x270] sm:$0xf0] }
 0x182   :  { %2443 = vmatpush.bf16.msra.mxu2 %v6724_v15  ;;  %2421 = vmatpush.bf16.msra.mxu0 %v7104_v25  ;;  %v9683_v7 = vld [vmem:[%s15254_s5 + $0x6ac] sm:$0xf0]  ;;  %v9519_v15 = vld [vmem:[%s15254_s5 + $0x194] sm:$0xf] }
 0x183   :  { %v7203_v12 = vld [vmem:[%s15254_s5 + $0x4d0] sm:$0xf]  ;;  %v7428_v17 = vor.u32 %v9683_v7, %v7427_v6  ;;  %v6981_v25 = vld [vmem:[%s15254_s5 + $0x330] sm:$0xf0] }
 0x184   :  { %2458 = vmatpush.bf16.msra.mxu3 %v6916_v22  ;;  %2480 = vmatpush.bf16.msrb.mxu1 %v7556_v23  ;;  %v9627_v13 = vld [vmem:[%s15254_s5 + $0x4ec] sm:$0xf0]  ;;  %v9567_v22 = vld [vmem:[%s15254_s5 + $0x314] sm:$0xf]  ;;  %v6792_v23 = vor.u32 %v9519_v15, %v6789_v16 }
 0x185   :  { %2422 = vmatmul.bf16.vlgmr.msra.gmra.mxu0 %v11244_v14  ;;  %v7204_v19 = vor.u32 %v9627_v13, %v7203_v12  ;;  %v9675_v21 = vld [vmem:[%s15254_s5 + $0x66c] sm:$0xf0]  ;;  %v6984_v32 = vor.u32 %v9567_v22, %v6981_v25  ;;  %v6661_v6 = vld [vmem:[%s15254_s5 + $0xb0] sm:$0xf0] }
 0x186   :  { %2444 = vmatpush.bf16.msra.mxu2 %v6692_v28  ;;  %2466 = vmatpush.bf16.msrb.mxu0 %v7332_v29  ;;  %v7171_v26 = vld [vmem:[%s15254_s5 + $0x490] sm:$0xf]  ;;  %v9511_v28 = vld [vmem:[%s15254_s5 + $0x154] sm:$0xf]  ;;  %v7396_v30 = vor.u32 %v9675_v21, %v7395_v20  ;;  %v9596_v20 = vld [vmem:[%s15254_s5 + $0x3f4] sm:$0xf0] }
 0x187   :  { %v9619_v27 = vld [vmem:[%s15254_s5 + $0x4ac] sm:$0xf0]  ;;  %v6757_v29 = vld [vmem:[%s15254_s5 + $0x170] sm:$0xf0] }
 0x188   :  { %2459 = vmatpush.bf16.msra.mxu3 %v6884_v36  ;;  %2481 = vmatpush.bf16.msrb.mxu1 %v7524_v38  ;;  %v7363_v31 = vld [vmem:[%s15254_s5 + $0x610] sm:$0xf]  ;;  %v7172_v33 = vor.u32 %v9619_v27, %v7171_v26  ;;  %v6949_v36 = vld [vmem:[%s15254_s5 + $0x2f0] sm:$0xf0]  ;;  %v6760_v37 = vor.u32 %v9511_v28, %v6757_v29 }
 0x189   :  { %v9667_v34 = vld [vmem:[%s15254_s5 + $0x62c] sm:$0xf0]  ;;  %v9719_v38 = vld [vmem:[%s15254_s5 + $0x7d4] sm:$0xf]  ;;  %v6952_v45 = vor.u32 %v9559_v35, %v6949_v36 }
 0x18a   :  { %2445 = vmatpush.bf16.msra.mxu2 %v6660_v42  ;;  %2467 = vmatpush.bf16.msrb.mxu0 %v7300_v43  ;;  %v7139_v40 = vld [vmem:[%s15254_s5 + $0x450] sm:$0xf]  ;;  %v9503_v42 = vld [vmem:[%s15254_s5 + $0x114] sm:$0xf]  ;;  %v7364_v44 = vor.u32 %v9667_v34, %v7363_v31  ;;  %v7592_v46 = vor.u32 %v9719_v38, %v7589_v39  ;;  %v9588_v34 = vld [vmem:[%s15254_s5 + $0x3b4] sm:$0xf0] }
 0x18b   :  { %v9611_v41 = vld [vmem:[%s15254_s5 + $0x46c] sm:$0xf0]  ;;  %v6725_v43 = vld [vmem:[%s15254_s5 + $0x130] sm:$0xf0]  ;;  %v6827_v39 = vld [vmem:[%s15254_s5 + $0x1d8] sm:$0xf] }
 0x18c   :  { %2460 = vmatpush.bf16.msra.mxu3 %v6852_v50  ;;  %2482 = vmatpush.bf16.msrb.mxu1 %v7492_v51  ;;  %v7140_v49 = vor.u32 %v9611_v41, %v7139_v40  ;;  %v6728_v50 = vor.u32 %v9503_v42, %v6725_v43  ;;  %v9711_v51 = vld [vmem:[%s15254_s5 + $0x794] sm:$0xf]  ;;  %v7107_v53 = vld [vmem:[%s15254_s5 + $0x410] sm:$0xf]  ;;  %v9532_v40 = vld [vmem:[%s15254_s5 + $0x1f4] sm:$0xf0] }
 0x18d   :  { %v9603_v54 = vld [vmem:[%s15254_s5 + $0x42c] sm:$0xf0]  ;;  %v9647_v7 = vld [vmem:[%s15254_s5 + $0x594] sm:$0xf]  ;;  %v6828_v48 = vor.u32 %v9532_v40, %v6827_v39 }
 0x18e   :  { %2446 = vmatpush.bf16.msra.mxu2 %v6628_v55  ;;  %2468 = vmatpush.bf16.msrb.mxu0 %v7268_v56  ;;  %v9495_v55 = vld [vmem:[%s15254_s5 + $0xd4] sm:$0xf]  ;;  %v7108_v62 = vor.u32 %v9603_v54, %v7107_v53  ;;  %v9524_v53 = vld [vmem:[%s15254_s5 + $0x1b4] sm:$0xf0] }
 0x18f   :  { %2461 = vmatmul.bf16.vlgmr.msra.gmra.mxu3 %v11142_v10  ;;  %v6693_v56 = vld [vmem:[%s15254_s5 + $0xf0] sm:$0xf0] }
 0x190   :  { %2505 = vmatpush.bf16.msrb.mxu3 %v7080_v52  ;;  %2483 = vmatpush.bf16.msrb.mxu1 %v7460_v4  ;;  %v7557_v52 = vld [vmem:[%s15254_s5 + $0x7b0] sm:$0xf0]  ;;  %v6696_v1 = vor.u32 %v9495_v55, %v6693_v56 }
 0x191   :  { %v7560_v61 = vor.u32 %v9711_v51, %v7557_v52  ;;  %v9703_v4 = vld [vmem:[%s15254_s5 + $0x754] sm:$0xf]  ;;  %v6795_v52 = vld [vmem:[%s15254_s5 + $0x198] sm:$0xf] }
 0x192   :  { %2447 = vmatpush.bf16.msra.mxu2 %v6596_v63  ;;  %2469 = vmatpush.bf16.msrb.mxu0 %v7236_v0  ;;  %v7525_v63 = vld [vmem:[%s15254_s5 + $0x770] sm:$0xf0] }
 0x193   :  { %v9487_v0 = vld [vmem:[%s15254_s5 + $0x94] sm:$0xf]  ;;  %v7528_v12 = vor.u32 %v9703_v4, %v7525_v63  ;;  %v9516_v4 = vld [vmem:[%s15254_s5 + $0x174] sm:$0xf0] }
 0x194   :  { %2506 = vmatpush.bf16.msrb.mxu3 %v7048_v5  ;;  %2484 = vmatpush.bf16.msrb.mxu1 %v7428_v17  ;;  %v7336_v5 = vor.u32 %v9655_v58, %v7333_v59  ;;  %v6664_v13 = vor.u32 %v9487_v0, %v6661_v6  ;;  %v6853_v15 = vld [vmem:[%s15254_s5 + $0x230] sm:$0xf0] }
 0x195   :  { %2448 = vmatmul.bf16.vlgmr.msra.gmra.mxu2 %v11163_v24  ;;  %v9695_v16 = vld [vmem:[%s15254_s5 + $0x714] sm:$0xf]  ;;  %v6856_v26 = vor.u32 %v9535_v11, %v6853_v15 }
 0x196   :  { %2492 = vmatpush.bf16.msrb.mxu2 %v6824_v9  ;;  %2470 = vmatpush.bf16.msrb.mxu0 %v7204_v19  ;;  %v6888_v9 = vor.u32 %v9543_v2, %v6885_v3  ;;  %v7493_v17 = vld [vmem:[%s15254_s5 + $0x730] sm:$0xf0]  ;;  %v7083_v19 = vld [vmem:[%s15254_s5 + $0x3d8] sm:$0xf] }
 0x197   :  { %v9479_v21 = vld [vmem:[%s15254_s5 + $0x54] sm:$0xf]  ;;  %v7496_v27 = vor.u32 %v9695_v16, %v7493_v17  ;;  %v7084_v28 = vor.u32 %v9596_v20, %v7083_v19  ;;  %v6763_v3 = vld [vmem:[%s15254_s5 + $0x158] sm:$0xf]  ;;  %v11993_v20 = vld [vmem:[%s15255_s6] sm:$0xff] }
 0x198   :  { %2507 = vmatpush.bf16.msrb.mxu3 %v7016_v18  ;;  %2485 = vmatpush.bf16.msrb.mxu1 %v7396_v30  ;;  %v7304_v18 = vor.u32 %v9647_v7, %v7301_v8  ;;  %v6629_v22 = vld [vmem:[%s15254_s5 + $0x70] sm:$0xf0]  ;;  %v6955_v8 = vld [vmem:[%s15254_s5 + $0x2d8] sm:$0xf]  ;;  %v6764_v11 = vor.u32 %v9516_v4, %v6763_v3  ;;  %v9592_v3 = vld [vmem:[%s15254_s5 + $0x3dc] sm:$0xf] }
 0x199   :  { %v7269_v25 = vld [vmem:[%s15254_s5 + $0x570] sm:$0xf0]  ;;  %v6632_v31 = vor.u32 %v9479_v21, %v6629_v22  ;;  %v6731_v17 = vld [vmem:[%s15254_s5 + $0x118] sm:$0xf]  ;;  %v7085_v4 = vld [vmem:[%s15254_s5 + $0x3f8] sm:$0xf0] }
 0x19a   :  { %2493 = vmatpush.bf16.msrb.mxu2 %v6792_v23  ;;  %2471 = vmatpush.bf16.msrb.mxu0 %v7172_v33  ;;  %v9639_v23 = vld [vmem:[%s15254_s5 + $0x554] sm:$0xf]  ;;  %v7051_v33 = vld [vmem:[%s15254_s5 + $0x398] sm:$0xf] }
 0x19b   :  { %v9687_v29 = vld [vmem:[%s15254_s5 + $0x6d4] sm:$0xf]  ;;  %v7052_v42 = vor.u32 %v9588_v34, %v7051_v33  ;;  %v936_v33 = vperm.slane %v11993_v20, 0  ;;  %v6699_v34 = vld [vmem:[%s15254_s5 + $0xd8] sm:$0xf] }
 0x19c   :  { %2508 = vmatpush.bf16.msrb.mxu3 %v6984_v32  ;;  %2486 = vmatpush.bf16.msrb.mxu1 %v7364_v44  ;;  %v7461_v30 = vld [vmem:[%s15254_s5 + $0x6f0] sm:$0xf0]  ;;  %v7272_v32 = vor.u32 %v9639_v23, %v7269_v25  ;;  %v6923_v25 = vld [vmem:[%s15254_s5 + $0x298] sm:$0xf] }
 0x19d   :  { %v9471_v35 = vld [vmem:[%s15254_s5 + $0x14] sm:$0xf]  ;;  %v7464_v41 = vor.u32 %v9687_v29, %v7461_v30  ;;  %v9716_v30 = vld [vmem:[%s15254_s5 + $0x7b4] sm:$0xf0] }
 0x19e   :  { %2494 = vmatpush.bf16.msrb.mxu2 %v6760_v37  ;;  %2472 = vmatpush.bf16.msrb.mxu0 %v7140_v49  ;;  %v6597_v36 = vld [vmem:[%s15254_s5 + $0x30] sm:$0xf0]  ;;  %v9580_v49 = vld [vmem:[%s15254_s5 + $0x374] sm:$0xf0] }
 0x19f   :  { %2487 = vmatmul.bf16.vlgmr.msrb.gmra.mxu1 %v11207_v57  ;;  %v9631_v37 = vld [vmem:[%s15254_s5 + $0x514] sm:$0xf]  ;;  %v6600_v43 = vor.u32 %v9471_v35, %v6597_v36  ;;  %v7020_v55 = vor.u32 %v9580_v49, %v7019_v47  ;;  %v9500_v35 = vld [vmem:[%s15254_s5 + $0xf4] sm:$0xf0] }
 0x1a0   :  { %2509 = vmatpush.bf16.msrb.mxu3 %v6952_v45  ;;  %2531 = vmatpush.bf16.msra.mxu1 %v7592_v46  ;;  %v7237_v38 = vld [vmem:[%s15254_s5 + $0x530] sm:$0xf0]  ;;  %v7339_v36 = vld [vmem:[%s15254_s5 + $0x5d8] sm:$0xf] }
 0x1a1   :  { %v7240_v44 = vor.u32 %v9631_v37, %v7237_v38  ;;  %v9679_v45 = vld [vmem:[%s15254_s5 + $0x694] sm:$0xf]  ;;  %v9660_v37 = vld [vmem:[%s15254_s5 + $0x5f4] sm:$0xf0] }
 0x1a2   :  { %2495 = vmatpush.bf16.msrb.mxu2 %v6728_v50  ;;  %2473 = vmatpush.bf16.msrb.mxu0 %v7108_v62  ;;  %v7429_v46 = vld [vmem:[%s15254_s5 + $0x6b0] sm:$0xf0]  ;;  %v9572_v62 = vld [vmem:[%s15254_s5 + $0x334] sm:$0xf0]  ;;  %v7340_v47 = vor.u32 %v9660_v37, %v7339_v36  ;;  %v9576_v37 = vld [vmem:[%s15254_s5 + $0x35c] sm:$0xf] }
 0x1a3   :  { %v9623_v50 = vld [vmem:[%s15254_s5 + $0x4d4] sm:$0xf]  ;;  %v7432_v54 = vor.u32 %v9679_v45, %v7429_v46  ;;  %v7531_v45 = vld [vmem:[%s15254_s5 + $0x758] sm:$0xf] }
 0x1a4   :  { %2510 = vmatpush.bf16.msrb.mxu3 %v6920_v60  ;;  %2532 = vmatpush.bf16.msra.mxu1 %v7560_v61  ;;  %v7205_v51 = vld [vmem:[%s15254_s5 + $0x4f0] sm:$0xf0]  ;;  %v6987_v60 = vld [vmem:[%s15254_s5 + $0x318] sm:$0xf]  ;;  %v6796_v61 = vor.u32 %v9524_v53, %v6795_v52 }
 0x1a5   :  { %2474 = vmatmul.bf16.vlgmr.msrb.gmra.mxu0 %v11244_v14  ;;  %v7208_v56 = vor.u32 %v9623_v50, %v7205_v51  ;;  %v9671_v58 = vld [vmem:[%s15254_s5 + $0x654] sm:$0xf]  ;;  %v6988_v0 = vor.u32 %v9572_v62, %v6987_v60  ;;  %v6667_v49 = vld [vmem:[%s15254_s5 + $0x98] sm:$0xf] }
 0x1a6   :  { %2496 = vmatpush.bf16.msrb.mxu2 %v6696_v1  ;;  %2518 = vmatpush.bf16.msra.mxu0 %v7336_v5  ;;  %v7397_v59 = vld [vmem:[%s15254_s5 + $0x670] sm:$0xf0]  ;;  %v9492_v50 = vld [vmem:[%s15254_s5 + $0xb4] sm:$0xf0] }
 0x1a7   :  { %v9615_v1 = vld [vmem:[%s15254_s5 + $0x494] sm:$0xf]  ;;  %v7400_v5 = vor.u32 %v9671_v58, %v7397_v59  ;;  %v7307_v51 = vld [vmem:[%s15254_s5 + $0x598] sm:$0xf]  ;;  %v6668_v59 = vor.u32 %v9492_v50, %v6667_v49 }
 0x1a8   :  { %2511 = vmatpush.bf16.msrb.mxu3 %v6888_v9  ;;  %2533 = vmatpush.bf16.msra.mxu1 %v7528_v12  ;;  %v7173_v2 = vld [vmem:[%s15254_s5 + $0x4b0] sm:$0xf0]  ;;  %v9564_v9 = vld [vmem:[%s15254_s5 + $0x2f4] sm:$0xf0] }
 0x1a9   :  { %v9663_v63 = vld [vmem:[%s15254_s5 + $0x614] sm:$0xf]  ;;  %v7176_v6 = vor.u32 %v9615_v1, %v7173_v2  ;;  %v7595_v12 = vld [vmem:[%s15254_s5 + $0x7d8] sm:$0xf]  ;;  %v6956_v22 = vor.u32 %v9564_v9, %v6955_v8 }
 0x1aa   :  { %2497 = vmatpush.bf16.msrb.mxu2 %v6664_v13  ;;  %2519 = vmatpush.bf16.msra.mxu0 %v7304_v18  ;;  %v7365_v7 = vld [vmem:[%s15254_s5 + $0x630] sm:$0xf0]  ;;  %v9724_v13 = vld [vmem:[%s15254_s5 + $0x7f4] sm:$0xf0] }
 0x1ab   :  { %v9607_v15 = vld [vmem:[%s15254_s5 + $0x454] sm:$0xf]  ;;  %v9508_v18 = vld [vmem:[%s15254_s5 + $0x134] sm:$0xf0]  ;;  %v7368_v19 = vor.u32 %v9663_v63, %v7365_v7  ;;  %v7596_v23 = vor.u32 %v9724_v13, %v7595_v12 }
 0x1ac   :  { %2512 = vmatpush.bf16.msrb.mxu3 %v6856_v26  ;;  %2534 = vmatpush.bf16.msra.mxu1 %v7496_v27  ;;  %v7141_v16 = vld [vmem:[%s15254_s5 + $0x470] sm:$0xf0]  ;;  %v9556_v26 = vld [vmem:[%s15254_s5 + $0x2b4] sm:$0xf0]  ;;  %v6732_v29 = vor.u32 %v9508_v18, %v6731_v17  ;;  %v9584_v17 = vld [vmem:[%s15254_s5 + $0x39c] sm:$0xf] }
 0x1ad   :  { %v7563_v27 = vld [vmem:[%s15254_s5 + $0x798] sm:$0xf]  ;;  %v6924_v38 = vor.u32 %v9556_v26, %v6923_v25  ;;  %v7053_v18 = vld [vmem:[%s15254_s5 + $0x3b8] sm:$0xf0] }
 0x1ae   :  { %2498 = vmatpush.bf16.msrb.mxu2 %v6632_v31  ;;  %2520 = vmatpush.bf16.msra.mxu0 %v7272_v32  ;;  %v9599_v31 = vld [vmem:[%s15254_s5 + $0x414] sm:$0xf]  ;;  %v7564_v39 = vor.u32 %v9716_v30, %v7563_v27  ;;  %v9652_v52 = vld [vmem:[%s15254_s5 + $0x5b4] sm:$0xf0]  ;;  %v9528_v27 = vld [vmem:[%s15254_s5 + $0x1dc] sm:$0xf] }
 0x1af   :  { %2513 = vmatmul.bf16.vlgmr.msrb.gmra.mxu3 %v11142_v10  ;;  %v7109_v32 = vld [vmem:[%s15254_s5 + $0x430] sm:$0xf0]  ;;  %v9540_v60 = vld [vmem:[%s15254_s5 + $0x234] sm:$0xf0]  ;;  %v7308_v2 = vor.u32 %v9652_v52, %v7307_v51  ;;  %v9568_v51 = vld [vmem:[%s15254_s5 + $0x31c] sm:$0xf] }
 0x1b0   :  { %2557 = vmatpush.bf16.msra.mxu3 %v7084_v28  ;;  %2535 = vmatpush.bf16.msra.mxu1 %v7464_v41  ;;  %v7144_v28 = vor.u32 %v9607_v15, %v7141_v16  ;;  %v7112_v41 = vor.u32 %v9599_v31, %v7109_v32  ;;  %v9700_v62 = vld [vmem:[%s15254_s5 + $0x734] sm:$0xf0]  ;;  %v7056_v31 = vor.u32 %v9584_v17, %v7053_v18  ;;  %v9552_v18 = vld [vmem:[%s15254_s5 + $0x29c] sm:$0xf] }
 0x1b1   :  { %v9484_v63 = vld [vmem:[%s15254_s5 + $0x74] sm:$0xf0] }
 0x1b2   :  { %2499 = vmatpush.bf16.msrb.mxu2 %v6600_v43  ;;  %2521 = vmatpush.bf16.msra.mxu0 %v7240_v44  ;;  %v2254_v21 = vpop.f32.mrf.mxu3  ;;  %v6891_v43 = vld [vmem:[%s15254_s5 + $0x258] sm:$0xf] }
 0x1b3   :  { %v9548_v44 = vld [vmem:[%s15254_s5 + $0x274] sm:$0xf0] }
 0x1b4   :  { %2558 = vmatpush.bf16.msra.mxu3 %v7052_v42  ;;  %2536 = vmatpush.bf16.msra.mxu1 %v7432_v54  ;;  %v6700_v42 = vor.u32 %v9500_v35, %v6699_v34  ;;  %v6892_v54 = vor.u32 %v9548_v44, %v6891_v43  ;;  %v7467_v12 = vld [vmem:[%s15254_s5 + $0x6d8] sm:$0xf]  ;;  %v9520_v43 = vld [vmem:[%s15254_s5 + $0x19c] sm:$0xf] }
 0x1b5   :  { %2500 = vmatmul.bf16.vlgmr.msrb.gmra.mxu2 %v11163_v24  ;;  %v9692_v13 = vld [vmem:[%s15254_s5 + $0x6f4] sm:$0xf0]  ;;  %v6797_v44 = vld [vmem:[%s15254_s5 + $0x1b8] sm:$0xf0] }
 0x1b6   :  { %2544 = vmatpush.bf16.msra.mxu2 %v6828_v48  ;;  %2522 = vmatpush.bf16.msra.mxu0 %v7208_v56  ;;  %v9708_v48 = vld [vmem:[%s15254_s5 + $0x774] sm:$0xf0]  ;;  %v7468_v30 = vor.u32 %v9692_v13, %v7467_v12  ;;  %v6800_v52 = vor.u32 %v9520_v43, %v6797_v44  ;;  %v6733_v12 = vld [vmem:[%s15254_s5 + $0x138] sm:$0xf0] }
 0x1b7   :  { %v2241_v40 = vpop.f32.mrf.mxu2  ;;  %v7532_v58 = vor.u32 %v9708_v48, %v7531_v45  ;;  %v7435_v35 = vld [vmem:[%s15254_s5 + $0x698] sm:$0xf]  ;;  %v9704_v43 = vld [vmem:[%s15254_s5 + $0x75c] sm:$0xf] }
 0x1b8   :  { %2559 = vmatpush.bf16.msra.mxu3 %v7020_v55  ;;  %2537 = vmatpush.bf16.msra.mxu1 %v7400_v5  ;;  %v2242_v46 = vadd.f32 %v2241_v40, %v936_v33  ;;  %v6859_v55 = vld [vmem:[%s15254_s5 + $0x218] sm:$0xf]  ;;  %v7021_v40 = vld [vmem:[%s15254_s5 + $0x378] sm:$0xf0] }
 0x1b9   :  { %v6635_v5 = vld [vmem:[%s15254_s5 + $0x58] sm:$0xf]  ;;  %v6860_v7 = vor.u32 %v9540_v60, %v6859_v55  ;;  %v6765_v60 = vld [vmem:[%s15254_s5 + $0x178] sm:$0xf0] }
 0x1ba   :  { %2545 = vmatpush.bf16.msra.mxu2 %v6796_v61  ;;  %2523 = vmatpush.bf16.msra.mxu0 %v7176_v6  ;;  %v2256_v53 = vpop.f32.mrf.mxu3  ;;  %v2255_v56 = vadd.f32 %v2254_v21, %v2242_v46  ;;  %v7499_v61 = vld [vmem:[%s15254_s5 + $0x718] sm:$0xf]  ;;  %v6636_v15 = vor.u32 %v9484_v63, %v6635_v5  ;;  %v9560_v5 = vld [vmem:[%s15254_s5 + $0x2dc] sm:$0xf] }
 0x1bb   :  { %v9644_v6 = vld [vmem:[%s15254_s5 + $0x574] sm:$0xf0]  ;;  %v7500_v8 = vor.u32 %v9700_v62, %v7499_v61  ;;  %v6989_v53 = vld [vmem:[%s15254_s5 + $0x338] sm:$0xf0] }
 0x1bc   :  { %2560 = vmatpush.bf16.msra.mxu3 %v6988_v0  ;;  %2538 = vmatpush.bf16.msra.mxu1 %v7368_v19  ;;  %v2280_v1 = vpop.f32.mrf.mxu1  ;;  %v7275_v0 = vld [vmem:[%s15254_s5 + $0x558] sm:$0xf]  ;;  %v6957_v63 = vld [vmem:[%s15254_s5 + $0x2f8] sm:$0xf0] }
 0x1bd   :  { %v7276_v16 = vor.u32 %v9644_v6, %v7275_v0  ;;  %v6603_v19 = vld [vmem:[%s15254_s5 + $0x18] sm:$0xf]  ;;  %v9720_v6 = vld [vmem:[%s15254_s5 + $0x7dc] sm:$0xf] }
 0x1be   :  { %2546 = vmatpush.bf16.msra.mxu2 %v6764_v11  ;;  %2524 = vmatpush.bf16.msra.mxu0 %v7144_v28  ;;  %v7088_v11 = vor.u32 %v9592_v3, %v7085_v4  ;;  %v9476_v21 = vld [vmem:[%s15254_s5 + $0x34] sm:$0xf0]  ;;  %v6829_v28 = vld [vmem:[%s15254_s5 + $0x1f8] sm:$0xf0] }
 0x1bf   :  { %2539 = vmatmul.bf16.vlgmr.msra.gmra.mxu1 %v11207_v57  ;;  %v2243_v9 = vpop.f32.mrf.mxu2  ;;  %v6604_v33 = vor.u32 %v9476_v21, %v6603_v19  ;;  %v9684_v36 = vld [vmem:[%s15254_s5 + $0x6b4] sm:$0xf0]  ;;  %v6925_v19 = vld [vmem:[%s15254_s5 + $0x2b8] sm:$0xf0] }
 0x1c0   :  { %2561 = vmatpush.bf16.msra.mxu3 %v6956_v22  ;;  %2583 = vmatpush.bf16.msrb.mxu1 %v7596_v23  ;;  %v7243_v22 = vld [vmem:[%s15254_s5 + $0x518] sm:$0xf]  ;;  %v7436_v45 = vor.u32 %v9684_v36, %v7435_v35  ;;  %v6928_v36 = vor.u32 %v9552_v18, %v6925_v19  ;;  %v9472_v18 = vld [vmem:[%s15254_s5 + $0x1c] sm:$0xf] }
 0x1c1   :  { %v9636_v23 = vld [vmem:[%s15254_s5 + $0x534] sm:$0xf0]  ;;  %v6605_v19 = vld [vmem:[%s15254_s5 + $0x38] sm:$0xf0] }
 0x1c2   :  { %2547 = vmatpush.bf16.msra.mxu2 %v6732_v29  ;;  %2525 = vmatpush.bf16.msra.mxu0 %v7112_v41  ;;  %v2267_v25 = vpop.f32.mrf.mxu0  ;;  %v12106_v26 = vpop.f32.mrf.mxu3  ;;  %v7244_v34 = vor.u32 %v9636_v23, %v7243_v22  ;;  %v7211_v41 = vld [vmem:[%s15254_s5 + $0x4d8] sm:$0xf]  ;;  %v9712_v23 = vld [vmem:[%s15254_s5 + $0x79c] sm:$0xf] }
 0x1c3   :  { %v2268_v29 = vadd.f32 %v2267_v25, %v2255_v56  ;;  %v7403_v49 = vld [vmem:[%s15254_s5 + $0x658] sm:$0xf]  ;;  %v7565_v25 = vld [vmem:[%s15254_s5 + $0x7b8] sm:$0xf0] }
 0x1c4   :  { %2562 = vmatpush.bf16.msra.mxu3 %v6924_v38  ;;  %2584 = vmatpush.bf16.msrb.mxu1 %v7564_v39  ;;  %v2282_v32 = vpop.f32.mrf.mxu1  ;;  %v6832_v39 = vor.u32 %v9528_v27, %v6829_v28  ;;  %v9676_v50 = vld [vmem:[%s15254_s5 + $0x674] sm:$0xf0] }
 0x1c5   :  { %2526 = vmatmul.bf16.vlgmr.msra.gmra.mxu0 %v11244_v14  ;;  %v12123_v38 = vadd.f32 %v2280_v1, %v2268_v29  ;;  %v9620_v55 = vld [vmem:[%s15254_s5 + $0x4b4] sm:$0xf0]  ;;  %v7404_v61 = vor.u32 %v9676_v50, %v7403_v49  ;;  %v6701_v32 = vld [vmem:[%s15254_s5 + $0xf8] sm:$0xf0] }
 0x1c6   :  { %2548 = vmatpush.bf16.msra.mxu2 %v6700_v42  ;;  %2570 = vmatpush.bf16.msrb.mxu0 %v7340_v47  ;;  %v9628_v42 = vld [vmem:[%s15254_s5 + $0x4f4] sm:$0xf0]  ;;  %v7024_v47 = vor.u32 %v9576_v37, %v7021_v40  ;;  %v7568_v37 = vor.u32 %v9712_v23, %v7565_v25  ;;  %v9648_v49 = vld [vmem:[%s15254_s5 + $0x59c] sm:$0xf]  ;;  %v7799_v23 = vld [vmem:[%s15256_s7 + $0x188] sm:$0xf] }
 0x1c7   :  { %v7212_v48 = vor.u32 %v9628_v42, %v7211_v41  ;;  %v7371_v62 = vld [vmem:[%s15254_s5 + $0x618] sm:$0xf]  ;;  %v9544_v41 = vld [vmem:[%s15254_s5 + $0x25c] sm:$0xf]  ;;  %v9777_v25 = vld [vmem:[%s15256_s7 + $0x1a0] sm:$0xf0] }
 0x1c8   :  { %2563 = vmatpush.bf16.msra.mxu3 %v6892_v54  ;;  %2585 = vmatpush.bf16.msrb.mxu1 %v7532_v58  ;;  %v12141_v46 = vpop.f32.mrf.mxu2  ;;  %v7179_v54 = vld [vmem:[%s15254_s5 + $0x498] sm:$0xf]  ;;  %v6893_v42 = vld [vmem:[%s15254_s5 + $0x278] sm:$0xf0]  ;;  %vm2648_vm9 = vcmp.gt.f32.partialorder %v12123_v38, 0.0 }
 0x1c9   :  { %v7180_v3 = vor.u32 %v9620_v55, %v7179_v54  ;;  %v9668_v4 = vld [vmem:[%s15254_s5 + $0x634] sm:$0xf0]  ;;  %v7309_v50 = vld [vmem:[%s15254_s5 + $0x5b8] sm:$0xf0] }
 0x1ca   :  { %2549 = vmatpush.bf16.msra.mxu2 %v6668_v59  ;;  %2571 = vmatpush.bf16.msrb.mxu0 %v7308_v2  ;;  %v2269_v56 = vpop.f32.mrf.mxu0  ;;  %v2308_v58 = vpop.f32.mrf.mxu3  ;;  %v9512_v59 = vld [vmem:[%s15254_s5 + $0x15c] sm:$0xf]  ;;  %v6992_v2 = vor.u32 %v9568_v51, %v6989_v53  ;;  %v9612_v9 = vld [vmem:[%s15254_s5 + $0x474] sm:$0xf0]  ;;  %v7372_v13 = vor.u32 %v9668_v4, %v7371_v62  ;;  %v6896_v51 = vor.u32 %v9544_v41, %v6893_v42 }
 0x1cb   :  { %v6768_v0 = vor.u32 %v9512_v59, %v6765_v60  ;;  %v7115_v27 = vld [vmem:[%s15254_s5 + $0x418] sm:$0xf]  ;;  %v6861_v56 = vld [vmem:[%s15254_s5 + $0x238] sm:$0xf0]  ;;  %v7312_v62 = vor.u32 %v9648_v49, %v7309_v50 }
 0x1cc   :  { %2564 = vmatpush.bf16.msra.mxu3 %v6860_v7  ;;  %2586 = vmatpush.bf16.msrb.mxu1 %v7500_v8  ;;  %v12171_v1 = vpop.f32.mrf.mxu1  ;;  %v7597_v7 = vld [vmem:[%s15254_s5 + $0x7f8] sm:$0xf0]  ;;  %v7147_v8 = vld [vmem:[%s15254_s5 + $0x458] sm:$0xf] }
 0x1cd   :  { %v7600_v17 = vor.u32 %v9720_v6, %v7597_v7  ;;  %v7148_v21 = vor.u32 %v9612_v9, %v7147_v8  ;;  %v9696_v58 = vld [vmem:[%s15254_s5 + $0x71c] sm:$0xf] }
 0x1ce   :  { %2550 = vmatpush.bf16.msra.mxu2 %v6636_v15  ;;  %2572 = vmatpush.bf16.msrb.mxu0 %v7276_v16  ;;  %v6960_v16 = vor.u32 %v9560_v5, %v6957_v63  ;;  %v7501_v59 = vld [vmem:[%s15254_s5 + $0x738] sm:$0xf0] }
 0x1cf   :  { %2565 = vmatmul.bf16.vlgmr.msra.gmra.mxu3 %v11142_v10  ;;  %v9480_v4 = vld [vmem:[%s15254_s5 + $0x5c] sm:$0xf]  ;;  %v7504_v8 = vor.u32 %v9696_v58, %v7501_v59 }
 0x1d0   :  { %2609 = vmatpush.bf16.msrb.mxu3 %v7088_v11  ;;  %2587 = vmatpush.bf16.msrb.mxu1 %v7468_v30  ;;  %v9504_v11 = vld [vmem:[%s15254_s5 + $0x11c] sm:$0xf]  ;;  %v2295_v15 = vpop.f32.mrf.mxu2  ;;  %v9604_v30 = vld [vmem:[%s15254_s5 + $0x434] sm:$0xf0] }
 0x1d1   :  { %v6736_v22 = vor.u32 %v9504_v11, %v6733_v12  ;;  %v6637_v5 = vld [vmem:[%s15254_s5 + $0x78] sm:$0xf0] }
 0x1d2   :  { %2551 = vmatpush.bf16.msra.mxu2 %v6604_v33  ;;  %2573 = vmatpush.bf16.msrb.mxu0 %v7244_v34  ;;  %v12215_v28 = vpop.f32.mrf.mxu0  ;;  %v12217_v29 = vpop.f32.mrf.mxu3  ;;  %v9656_v33 = vld [vmem:[%s15254_s5 + $0x5dc] sm:$0xf] }
 0x1d3   :  { %v7341_v34 = vld [vmem:[%s15254_s5 + $0x5f8] sm:$0xf0] }
 0x1d4   :  { %2610 = vmatpush.bf16.msrb.mxu3 %v7056_v31  ;;  %2588 = vmatpush.bf16.msrb.mxu1 %v7436_v45  ;;  %v9496_v31 = vld [vmem:[%s15254_s5 + $0xdc] sm:$0xf]  ;;  %v2334_v35 = vpop.f32.mrf.mxu1  ;;  %v7344_v44 = vor.u32 %v9656_v33, %v7341_v34 }
 0x1d5   :  { %2552 = vmatmul.bf16.vlgmr.msra.gmra.mxu2 %v11163_v24  ;;  %v6704_v40 = vor.u32 %v9496_v31, %v6701_v32  ;;  %v7533_v45 = vld [vmem:[%s15254_s5 + $0x778] sm:$0xf0]  ;;  %v6608_v32 = vor.u32 %v9472_v18, %v6605_v19  ;;  %v7883_v19 = vld [vmem:[%s15256_s7 + $0x230] sm:$0xf] }
 0x1d6   :  { %2596 = vmatpush.bf16.msrb.mxu2 %v6832_v39  ;;  %2574 = vmatpush.bf16.msrb.mxu0 %v7212_v48  ;;  %v7116_v39 = vor.u32 %v9604_v30, %v7115_v27  ;;  %v6669_v48 = vld [vmem:[%s15254_s5 + $0xb8] sm:$0xf0]  ;;  %v7536_v54 = vor.u32 %v9704_v43, %v7533_v45  ;;  %v937_v43 = vperm.slane %v11993_v20, 1  ;;  %v9770_v45 = vld [vmem:[%s15256_s7 + $0x168] sm:$0xf0] }
 0x1d7   :  { %v9640_v63 = vld [vmem:[%s15254_s5 + $0x55c] sm:$0xf] }
 0x1d8   :  { %2611 = vmatpush.bf16.msrb.mxu3 %v7024_v47  ;;  %2589 = vmatpush.bf16.msrb.mxu1 %v7404_v61  ;;  %v9488_v47 = vld [vmem:[%s15254_s5 + $0x9c] sm:$0xf]  ;;  %v12262_v53 = vpop.f32.mrf.mxu2  ;;  %v2294_v59 = vadd.f32 %v12141_v46, %v937_v43  ;;  %v7855_v43 = vld [vmem:[%s15256_s7 + $0x1f8] sm:$0xf] }
 0x1d9   :  { %v6672_v55 = vor.u32 %v9488_v47, %v6669_v48  ;;  %v9688_v11 = vld [vmem:[%s15254_s5 + $0x6dc] sm:$0xf] }
 0x1da   :  { %2597 = vmatpush.bf16.msrb.mxu2 %v6800_v52  ;;  %2575 = vmatpush.bf16.msrb.mxu0 %v7180_v3  ;;  %v9536_v52 = vld [vmem:[%s15254_s5 + $0x21c] sm:$0xf]  ;;  %v2321_v60 = vpop.f32.mrf.mxu0  ;;  %v2360_v61 = vpop.f32.mrf.mxu3  ;;  %v9833_v3 = vld [vmem:[%s15256_s7 + $0x360] sm:$0xf0] }
 0x1db   :  { %v6864_v7 = vor.u32 %v9536_v52, %v6861_v56  ;;  %v7469_v12 = vld [vmem:[%s15254_s5 + $0x6f8] sm:$0xf0]  ;;  %v7939_v52 = vld [vmem:[%s15256_s7 + $0x2a0] sm:$0xf]  ;;  %v7743_v60 = vld [vmem:[%s15256_s7 + $0x118] sm:$0xf] }
 0x1dc   :  { %2612 = vmatpush.bf16.msrb.mxu3 %v6992_v2  ;;  %2590 = vmatpush.bf16.msrb.mxu1 %v7372_v13  ;;  %v8023_v2 = vld [vmem:[%s15256_s7 + $0x348] sm:$0xf]  ;;  %v12292_v6 = vpop.f32.mrf.mxu1  ;;  %v6640_v13 = vor.u32 %v9480_v4, %v6637_v5  ;;  %v7472_v30 = vor.u32 %v9688_v11, %v7469_v12  ;;  %v9680_v34 = vld [vmem:[%s15254_s5 + $0x69c] sm:$0xf]  ;;  %v9763_v61 = vld [vmem:[%s15256_s7 + $0x130] sm:$0xf0]  ;;  %v2307_v11 = vadd.f32 %v12106_v26, %v2294_v59 }
 0x1dd   :  { %v8024_v9 = vor.u32 %v9833_v3, %v8023_v2  ;;  %v7437_v35 = vld [vmem:[%s15254_s5 + $0x6b8] sm:$0xf0]  ;;  %v7911_v5 = vld [vmem:[%s15256_s7 + $0x268] sm:$0xf] }
 0x1de   :  { %2598 = vmatpush.bf16.msrb.mxu2 %v6768_v0  ;;  %2576 = vmatpush.bf16.msrb.mxu0 %v7148_v21  ;;  %v7277_v0 = vld [vmem:[%s15254_s5 + $0x578] sm:$0xf0]  ;;  %v7440_v47 = vor.u32 %v9680_v34, %v7437_v35  ;;  %v8247_v34 = vld [vmem:[%s15256_s7 + $0x508] sm:$0xf]  ;;  %v9889_v35 = vld [vmem:[%s15256_s7 + $0x520] sm:$0xf0] }
 0x1df   :  { %2591 = vmatmul.bf16.vlgmr.msrb.gmra.mxu1 %v11207_v57  ;;  %v7280_v15 = vor.u32 %v9640_v63, %v7277_v0  ;;  %v9632_v21 = vld [vmem:[%s15254_s5 + $0x51c] sm:$0xf]  ;;  %v7744_v0 = vor.u32 %v9763_v61, %v7743_v60  ;;  %v8387_v61 = vld [vmem:[%s15256_s7 + $0x620] sm:$0xf] }
 0x1e0   :  { %2613 = vmatpush.bf16.msrb.mxu3 %v6960_v16  ;;  %2635 = vmatpush.bf16.msra.mxu1 %v7600_v17  ;;  %v7995_v16 = vld [vmem:[%s15256_s7 + $0x310] sm:$0xf]  ;;  %v9826_v17 = vld [vmem:[%s15256_s7 + $0x328] sm:$0xf0]  ;;  %v2347_v27 = vpop.f32.mrf.mxu2  ;;  %v9624_v41 = vld [vmem:[%s15254_s5 + $0x4dc] sm:$0xf] }
 0x1e1   :  { %v7996_v31 = vor.u32 %v9826_v17, %v7995_v16  ;;  %v7213_v42 = vld [vmem:[%s15254_s5 + $0x4f8] sm:$0xf0]  ;;  %v2320_v17 = vadd.f32 %v12215_v28, %v2307_v11  ;;  %v8443_v28 = vld [vmem:[%s15256_s7 + $0x690] sm:$0xf]  ;;  %v9938_v27 = vld [vmem:[%s15256_s7 + $0x6a8] sm:$0xf0] }
 0x1e2   :  { %2599 = vmatpush.bf16.msrb.mxu2 %v6736_v22  ;;  %2577 = vmatpush.bf16.msrb.mxu0 %v7116_v39  ;;  %v7245_v22 = vld [vmem:[%s15254_s5 + $0x538] sm:$0xf0]  ;;  %v7800_v39 = vor.u32 %v9777_v25, %v7799_v23  ;;  %v7216_v49 = vor.u32 %v9624_v41, %v7213_v42  ;;  %v2656_v11 = vmul.f32 0.2, %v12123_v38 }
 0x1e3   :  { %v7248_v33 = vor.u32 %v9632_v21, %v7245_v22  ;;  %v9672_v50 = vld [vmem:[%s15254_s5 + $0x65c] sm:$0xf]  ;;  %v9798_v21 = vld [vmem:[%s15256_s7 + $0x248] sm:$0xf0] }
 0x1e4   :  { %2614 = vmatpush.bf16.msrb.mxu3 %v6928_v36  ;;  %2636 = vmatpush.bf16.msra.mxu1 %v7568_v37  ;;  %v7967_v36 = vld [vmem:[%s15256_s7 + $0x2d8] sm:$0xf]  ;;  %v12334_v37 = vpop.f32.mrf.mxu0  ;;  %v9616_v56 = vld [vmem:[%s15254_s5 + $0x49c] sm:$0xf] }
 0x1e5   :  { %2578 = vmatmul.bf16.vlgmr.msrb.gmra.mxu0 %v11244_v14  ;;  %v7181_v58 = vld [vmem:[%s15254_s5 + $0x4b8] sm:$0xf0] }
 0x1e6   :  { %2600 = vmatpush.bf16.msrb.mxu2 %v6704_v40  ;;  %2622 = vmatpush.bf16.msra.mxu0 %v7344_v44  ;;  %v9819_v40 = vld [vmem:[%s15256_s7 + $0x2f0] sm:$0xf0]  ;;  %v2386_v44 = vpop.f32.mrf.mxu1  ;;  %v9664_v2 = vld [vmem:[%s15254_s5 + $0x61c] sm:$0xf]  ;;  %v7184_v46 = vor.u32 %v9616_v56, %v7181_v58 }
 0x1e7   :  { %v7968_v48 = vor.u32 %v9819_v40, %v7967_v36  ;;  %v7373_v4 = vld [vmem:[%s15254_s5 + $0x638] sm:$0xf0]  ;;  %v2333_v36 = vadd.f32 %v12171_v1, %v2320_v17  ;;  %v8444_v40 = vor.u32 %v9938_v27, %v8443_v28  ;;  %v9791_v44 = vld [vmem:[%s15256_s7 + $0x210] sm:$0xf0]  ;;  %v8415_v1 = vld [vmem:[%s15256_s7 + $0x658] sm:$0xf] }
 0x1e8   :  { %2615 = vmatpush.bf16.msrb.mxu3 %v6896_v51  ;;  %2637 = vmatpush.bf16.msra.mxu1 %v7536_v54  ;;  %v7405_v51 = vld [vmem:[%s15254_s5 + $0x678] sm:$0xf0]  ;;  %v7376_v16 = vor.u32 %v9664_v2, %v7373_v4  ;;  %v8191_v4 = vld [vmem:[%s15256_s7 + $0x498] sm:$0xf]  ;;  %v9917_v17 = vld [vmem:[%s15256_s7 + $0x600] sm:$0xf0] }
 0x1e9   :  { %v7149_v12 = vld [vmem:[%s15254_s5 + $0x478] sm:$0xf0]  ;;  %vm2649_vm8 = vcmp.gt.f32.partialorder %v2333_v36, 0.0  ;;  %v8695_v28 = vld [vmem:[%s15256_s7 + $0x888] sm:$0xf] }
 0x1ea   :  { %2601 = vmatpush.bf16.msrb.mxu2 %v6672_v55  ;;  %2623 = vmatpush.bf16.msra.mxu0 %v7312_v62  ;;  %v9812_v55 = vld [vmem:[%s15256_s7 + $0x2b8] sm:$0xf0]  ;;  %v7408_v62 = vor.u32 %v9672_v50, %v7405_v51  ;;  %v8219_v50 = vld [vmem:[%s15256_s7 + $0x4d0] sm:$0xf]  ;;  %v2657_v51 = vmul.f32 0.2, %v2333_v36 }
 0x1eb   :  { %v7940_v3 = vor.u32 %v9812_v55, %v7939_v52  ;;  %v939_v52 = vperm.slane %v11993_v20, 3  ;;  %v7827_v55 = vld [vmem:[%s15256_s7 + $0x1c0] sm:$0xf]  ;;  %v9784_v60 = vld [vmem:[%s15256_s7 + $0x1d8] sm:$0xf0] }
 0x1ec   :  { %2616 = vmatpush.bf16.msrb.mxu3 %v6864_v7  ;;  %2638 = vmatpush.bf16.msra.mxu1 %v7504_v8  ;;  %v2373_v63 = vpop.f32.mrf.mxu0  ;;  %v8471_v7 = vld [vmem:[%s15256_s7 + $0x6c8] sm:$0xf]  ;;  %v9945_v8 = vld [vmem:[%s15256_s7 + $0x6e0] sm:$0xf0] }
 0x1ed   :  { %v8472_v26 = vor.u32 %v9945_v8, %v8471_v7  ;;  %v8919_v63 = vld [vmem:[%s15256_s7 + $0xa48] sm:$0xf]  ;;  %v2665_v7 = vsel %vm2649_vm8, %v2333_v36, %v2657_v51  ;;  %v938_v8 = vperm.slane %v11993_v20, 2  ;;  %v10001_v27 = vld [vmem:[%s15256_s7 + $0x8a0] sm:$0xf0] }
 0x1ee   :  { %2602 = vmatpush.bf16.msrb.mxu2 %v6640_v13  ;;  %2624 = vmatpush.bf16.msra.mxu0 %v7280_v15  ;;  %v7715_v13 = vld [vmem:[%s15256_s7 + $0xe0] sm:$0xf]  ;;  %v9756_v15 = vld [vmem:[%s15256_s7 + $0xf8] sm:$0xf0] }
 0x1ef   :  { %2617 = vmatmul.bf16.vlgmr.msrb.gmra.mxu3 %v11142_v10  ;;  %v7771_v10 = vld [vmem:[%s15256_s7 + $0x150] sm:$0xf]  ;;  %v7716_v25 = vor.u32 %v9756_v15, %v7715_v13 }
 0x1f0   :  { %5525 = vmatpush.bf16.msra.mxu3 %v8024_v9  ;;  %2639 = vmatpush.bf16.msra.mxu1 %v7472_v30  ;;  %v7772_v54 = vor.u32 %v9770_v45, %v7771_v10  ;;  %v9608_v9 = vld [vmem:[%s15254_s5 + $0x45c] sm:$0xf]  ;;  %v8248_v10 = vor.u32 %v9889_v35, %v8247_v34  ;;  %v9931_v45 = vld [vmem:[%s15256_s7 + $0x670] sm:$0xf0] }
 0x1f1   :  { %v7152_v23 = vor.u32 %v9608_v9, %v7149_v12  ;;  %v9600_v30 = vld [vmem:[%s15254_s5 + $0x41c] sm:$0xf]  ;;  %v8416_v56 = vor.u32 %v9931_v45, %v8415_v1  ;;  %v7828_v9 = vor.u32 %v9784_v60, %v7827_v55  ;;  %v9861_v1 = vld [vmem:[%s15256_s7 + $0x440] sm:$0xf0]  ;;  %v9994_v45 = vld [vmem:[%s15256_s7 + $0x868] sm:$0xf0] }
 0x1f2   :  { %2603 = vmatpush.bf16.msrb.mxu2 %v6608_v32  ;;  %2625 = vmatpush.bf16.msra.mxu0 %v7248_v33  ;;  %v12416_v22 = vpop.f32.mrf.mxu3  ;;  %v7687_v32 = vld [vmem:[%s15256_s7 + $0xa8] sm:$0xf]  ;;  %v9749_v33 = vld [vmem:[%s15256_s7 + $0xc0] sm:$0xf0]  ;;  %v8639_v60 = vld [vmem:[%s15256_s7 + $0x818] sm:$0xf] }
 0x1f3   :  { %v7688_v42 = vor.u32 %v9749_v33, %v7687_v32  ;;  %v8891_v32 = vld [vmem:[%s15256_s7 + $0xa10] sm:$0xf]  ;;  %v10050_v33 = vld [vmem:[%s15256_s7 + $0xa28] sm:$0xf0] }
 0x1f4   :  { %5526 = vmatpush.bf16.msra.mxu3 %v7996_v31  ;;  %2640 = vmatpush.bf16.msra.mxu1 %v7440_v47  ;;  %v7117_v31 = vld [vmem:[%s15254_s5 + $0x438] sm:$0xf0]  ;;  %v7659_v47 = vld [vmem:[%s15256_s7 + $0x70] sm:$0xf] }
 0x1f5   :  { %2604 = vmatmul.bf16.vlgmr.msrb.gmra.mxu2 %v11163_v24  ;;  %v9805_v24 = vld [vmem:[%s15256_s7 + $0x280] sm:$0xf0]  ;;  %v7120_v41 = vor.u32 %v9600_v30, %v7117_v31  ;;  %v12530_v30 = vpack.c.bf16 %v2665_v7, %v2665_v7  ;;  %v2346_v31 = vadd.f32 %v12262_v53, %v938_v8  ;;  %v2664_v53 = vsel %vm2648_vm9, %v12123_v38, %v2656_v11  ;;  %v9896_v7 = vld [vmem:[%s15256_s7 + $0x558] sm:$0xf0]  ;;  %v8079_v8 = vld [vmem:[%s15256_s7 + $0x3b8] sm:$0xf] }
 0x1f6   :  { %5512 = vmatpush.bf16.msra.mxu2 %v7800_v39  ;;  %2626 = vmatpush.bf16.msra.mxu0 %v7216_v49  ;;  %v7912_v18 = vor.u32 %v9805_v24, %v7911_v5  ;;  %v7884_v39 = vor.u32 %v9798_v21, %v7883_v19  ;;  %v9875_v24 = vld [vmem:[%s15256_s7 + $0x4b0] sm:$0xf0]  ;;  %v8163_v19 = vld [vmem:[%s15256_s7 + $0x460] sm:$0xf] }
 0x1f8   :  { %5527 = vmatpush.bf16.msra.mxu3 %v7968_v48  ;;  %2641 = vmatpush.bf16.msra.mxu1 %v7408_v62  ;;  %v9742_v48 = vld [vmem:[%s15256_s7 + $0x88] sm:$0xf0]  ;;  %v2397_v49 = vpop.f32.mrf.mxu2  ;;  %v9924_v62 = vld [vmem:[%s15256_s7 + $0x638] sm:$0xf0] }
 0x1f9   :  { %v7660_v59 = vor.u32 %v9742_v48, %v7659_v47  ;;  %v2398_v12 = vadd.f32 %v2397_v49, %v939_v52  ;;  %v8388_v13 = vor.u32 %v9924_v62, %v8387_v61  ;;  %v8892_v47 = vor.u32 %v10050_v33, %v8891_v32  ;;  %v8863_v49 = vld [vmem:[%s15256_s7 + $0x9d8] sm:$0xf]  ;;  %v9987_v61 = vld [vmem:[%s15256_s7 + $0x830] sm:$0xf0]  ;;  %v8779_v32 = vld [vmem:[%s15256_s7 + $0x930] sm:$0xf] }
 0x1fa   :  { %5513 = vmatpush.bf16.msra.mxu2 %v7772_v54  ;;  %2627 = vmatpush.bf16.msra.mxu0 %v7184_v46  ;;  %v7856_v54 = vor.u32 %v9791_v44, %v7855_v43  ;;  %v2412_v58 = vpop.f32.mrf.mxu3  ;;  %v9735_v46 = vld [vmem:[%s15256_s7 + $0x50] sm:$0xf0]  ;;  %v9910_v43 = vld [vmem:[%s15256_s7 + $0x5c8] sm:$0xf0]  ;;  %v2359_v48 = vadd.f32 %v12217_v29, %v2346_v31  ;;  %v8303_v29 = vld [vmem:[%s15256_s7 + $0x578] sm:$0xf] }
 0x1fb   :  { %v2411_v35 = vadd.f32 %v12416_v22, %v2398_v12  ;;  %v8135_v22 = vld [vmem:[%s15256_s7 + $0x428] sm:$0xf]  ;;  %v8107_v58 = vld [vmem:[%s15256_s7 + $0x3f0] sm:$0xf]  ;;  %v9980_v12 = vld [vmem:[%s15256_s7 + $0x7f8] sm:$0xf0] }
 0x1fc   :  { %5528 = vmatpush.bf16.msra.mxu3 %v7940_v3  ;;  %2642 = vmatpush.bf16.msra.mxu1 %v7376_v16  ;;  %v7631_v3 = vld [vmem:[%s15256_s7 + $0x38] sm:$0xf]  ;;  %v12490_v5 = vpop.f32.mrf.mxu1  ;;  %v8359_v16 = vld [vmem:[%s15256_s7 + $0x5e8] sm:$0xf]  ;;  %v2372_v52 = vadd.f32 %v12334_v37, %v2359_v48  ;;  %v9854_v37 = vld [vmem:[%s15256_s7 + $0x408] sm:$0xf0] }
 0x1fd   :  { %v7632_v15 = vor.u32 %v9735_v46, %v7631_v3  ;;  %v8360_v34 = vor.u32 %v9917_v17, %v8359_v16  ;;  %v10036_v3 = vld [vmem:[%s15256_s7 + $0x9b8] sm:$0xf0]  ;;  %v10029_v16 = vld [vmem:[%s15256_s7 + $0x980] sm:$0xf0]  ;;  %v10022_v33 = vld [vmem:[%s15256_s7 + $0x948] sm:$0xf0] }
 0x1fe   :  { %5514 = vmatpush.bf16.msra.mxu2 %v7744_v0  ;;  %2628 = vmatpush.bf16.msra.mxu0 %v7152_v23  ;;  %v10057_v0 = vld [vmem:[%s15256_s7 + $0xa60] sm:$0xf0] }
 0x1ff   :  { %2643 = vmatmul.bf16.vlgmr.msra.gmra.mxu1 %v11207_v57  ;;  %v9882_v57 = vld [vmem:[%s15256_s7 + $0x4e8] sm:$0xf0]  ;;  %v8920_v21 = vor.u32 %v10057_v0, %v8919_v63  ;;  %v8108_v63 = vor.u32 %v9854_v37, %v8107_v58  ;;  %v8640_v0 = vor.u32 %v9987_v61, %v8639_v60  ;;  %v10099_v58 = vld [vmem:[%s15256_s7 + $0xbb0] sm:$0xf0]  ;;  %v8025_v60 = vld [vmem:[%s15256_s7 + $0x364] sm:$0xf0] }
 0x200   :  { %5529 = vmatpush.bf16.msra.mxu3 %v7912_v18  ;;  %5551 = vmatpush.bf16.msrb.mxu1 %v8472_v26  ;;  %v8220_v2 = vor.u32 %v9882_v57, %v8219_v50  ;;  %v8192_v18 = vor.u32 %v9875_v24, %v8191_v4  ;;  %v9728_v26 = vld [vmem:[%s15256_s7 + $0x18] sm:$0xf0]  ;;  %v2399_v23 = vpop.f32.mrf.mxu2  ;;  %v10043_v50 = vld [vmem:[%s15256_s7 + $0x9f0] sm:$0xf0]  ;;  %v12569_v57 = vpack.c.bf16 %v2664_v53, %v2664_v53  ;;  %v9830_v37 = vld [vmem:[%s15256_s7 + $0x34c] sm:$0xf] }
 0x201   :  { %v8864_v62 = vor.u32 %v10043_v50, %v8863_v49  ;;  %v2385_v24 = vadd.f32 %v12292_v6, %v2372_v52  ;;  %v8611_v6 = vld [vmem:[%s15256_s7 + $0x7e0] sm:$0xf]  ;;  %v9840_v23 = vld [vmem:[%s15256_s7 + $0x398] sm:$0xf0]  ;;  %v9959_v52 = vld [vmem:[%s15256_s7 + $0x750] sm:$0xf0] }
 0x202   :  { %5515 = vmatpush.bf16.msra.mxu2 %v7716_v25  ;;  %2629 = vmatpush.bf16.msra.mxu0 %v7120_v41  ;;  %v9868_v25 = vld [vmem:[%s15256_s7 + $0x478] sm:$0xf0]  ;;  %v2423_v36 = vpop.f32.mrf.mxu0  ;;  %v8696_v41 = vor.u32 %v10001_v27, %v8695_v28  ;;  %v8583_v28 = vld [vmem:[%s15256_s7 + $0x7a8] sm:$0xf]  ;;  %v9973_v27 = vld [vmem:[%s15256_s7 + $0x7c0] sm:$0xf0] }
 0x203   :  { %v2424_v44 = vadd.f32 %v2423_v36, %v2411_v35  ;;  %v10113_v35 = vld [vmem:[%s15256_s7 + $0xc20] sm:$0xf0]  ;;  %vm2650_vm11 = vcmp.gt.f32.partialorder %v2385_v24, 0.0  ;;  %v8584_v53 = vor.u32 %v9973_v27, %v8583_v28  ;;  %v7969_v28 = vld [vmem:[%s15256_s7 + $0x2f4] sm:$0xf0] }
 0x204   :  { %5530 = vmatpush.bf16.msra.mxu3 %v7884_v39  ;;  %5552 = vmatpush.bf16.msrb.mxu1 %v8444_v40  ;;  %v8164_v40 = vor.u32 %v9868_v25, %v8163_v19  ;;  %v2438_v38 = vpop.f32.mrf.mxu1  ;;  %v8612_v19 = vor.u32 %v9980_v12, %v8611_v6 }
 0x205   :  { %2630 = vmatmul.bf16.vlgmr.msra.gmra.mxu0 %v11244_v14  ;;  %v7603_v14 = vld [vmem:[%s15256_s7] sm:$0xf] }
 0x206   :  { %5516 = vmatpush.bf16.msra.mxu2 %v7688_v42  ;;  %5538 = vmatpush.bf16.msrb.mxu0 %v8248_v10  ;;  %v7604_v39 = vor.u32 %v9728_v26, %v7603_v14  ;;  %v8331_v42 = vld [vmem:[%s15256_s7 + $0x5b0] sm:$0xf] }
 0x207   :  { %v8667_v10 = vld [vmem:[%s15256_s7 + $0x850] sm:$0xf]  ;;  %v8332_v51 = vor.u32 %v9910_v43, %v8331_v42  ;;  %v8780_v42 = vor.u32 %v10022_v33, %v8779_v32  ;;  %v8751_v43 = vld [vmem:[%s15256_s7 + $0x8f8] sm:$0xf]  ;;  %v9760_v32 = vld [vmem:[%s15256_s7 + $0x11c] sm:$0xf] }
 0x208   :  { %5531 = vmatpush.bf16.msra.mxu3 %v7856_v54  ;;  %5553 = vmatpush.bf16.msrb.mxu1 %v8416_v56  ;;  %v8136_v54 = vor.u32 %v9861_v1, %v8135_v22  ;;  %v8668_v55 = vor.u32 %v9994_v45, %v8667_v10  ;;  %v9903_v56 = vld [vmem:[%s15256_s7 + $0x590] sm:$0xf0]  ;;  %v9115_v10 = vld [vmem:[%s15256_s7 + $0xbd0] sm:$0xf]  ;;  %v10106_v45 = vld [vmem:[%s15256_s7 + $0xbe8] sm:$0xf0] }
 0x209   :  { %v8304_v46 = vor.u32 %v9903_v56, %v8303_v29  ;;  %v10015_v1 = vld [vmem:[%s15256_s7 + $0x910] sm:$0xf0]  ;;  %v10008_v29 = vld [vmem:[%s15256_s7 + $0x8d8] sm:$0xf0]  ;;  %v9087_v56 = vld [vmem:[%s15256_s7 + $0xb98] sm:$0xf] }
 0x20a   :  { %5517 = vmatpush.bf16.msra.mxu2 %v7660_v59  ;;  %5539 = vmatpush.bf16.msrb.mxu0 %v8220_v2  ;;  %v2437_v59 = vadd.f32 %v12490_v5, %v2424_v44  ;;  %v8835_v2 = vld [vmem:[%s15256_s7 + $0x9a0] sm:$0xf]  ;;  %v2425_v4 = vpop.f32.mrf.mxu0  ;;  %v7745_v33 = vld [vmem:[%s15256_s7 + $0x134] sm:$0xf0] }
 0x20b   :  { %v8275_v5 = vld [vmem:[%s15256_s7 + $0x540] sm:$0xf] }
 0x20c   :  { %5532 = vmatpush.bf16.msra.mxu3 %v7828_v9  ;;  %5554 = vmatpush.bf16.msrb.mxu1 %v8388_v13  ;;  %v9847_v9 = vld [vmem:[%s15256_s7 + $0x3d0] sm:$0xf0]  ;;  %v2659_v11 = vmul.f32 0.2, %v2437_v59  ;;  %v8836_v13 = vor.u32 %v10036_v3, %v8835_v2  ;;  %vm2651_vm10 = vcmp.gt.f32.partialorder %v2437_v59, 0.0  ;;  %v8276_v17 = vor.u32 %v9896_v7, %v8275_v5 }
 0x20d   :  { %v8080_v26 = vor.u32 %v9847_v9, %v8079_v8  ;;  %v8499_v2 = vld [vmem:[%s15256_s7 + $0x700] sm:$0xf]  ;;  %v9952_v3 = vld [vmem:[%s15256_s7 + $0x718] sm:$0xf0]  ;;  %v9088_v5 = vor.u32 %v10099_v58, %v9087_v56  ;;  %v9823_v9 = vld [vmem:[%s15256_s7 + $0x314] sm:$0xf] }
 0x20e   :  { %5518 = vmatpush.bf16.msra.mxu2 %v7632_v15  ;;  %5540 = vmatpush.bf16.msrb.mxu0 %v8192_v18  ;;  %v8807_v15 = vld [vmem:[%s15256_s7 + $0x968] sm:$0xf]  ;;  %v2658_v18 = vmul.f32 0.2, %v2385_v24  ;;  %v2667_v25 = vsel %vm2651_vm10, %v2437_v59, %v2659_v11  ;;  %v9059_v7 = vld [vmem:[%s15256_s7 + $0xb60] sm:$0xf]  ;;  %v8500_v12 = vor.u32 %v9952_v3, %v8499_v2 }
 0x20f   :  { %5533 = vmatmul.bf16.vlgmr.msra.gmra.mxu3 %v12530_v30  ;;  %v8808_v31 = vor.u32 %v10029_v16, %v8807_v15  ;;  %v12649_v36 = vpack.c.bf16 %v2667_v25, %v2667_v25  ;;  %v10092_v8 = vld [vmem:[%s15256_s7 + $0xb78] sm:$0xf0]  ;;  %v7997_v11 = vld [vmem:[%s15256_s7 + $0x32c] sm:$0xf0]  ;;  %v9767_v16 = vld [vmem:[%s15256_s7 + $0x154] sm:$0xf] }
 0x210   :  { %5577 = vmatpush.bf16.msrb.mxu3 %v8920_v21  ;;  %5555 = vmatpush.bf16.msrb.mxu1 %v8360_v34  ;;  %v8051_v21 = vld [vmem:[%s15256_s7 + $0x380] sm:$0xf]  ;;  %v9143_v34 = vld [vmem:[%s15256_s7 + $0xc08] sm:$0xf]  ;;  %v2666_v44 = vsel %vm2650_vm11, %v2385_v24, %v2658_v18  ;;  %v9816_v25 = vld [vmem:[%s15256_s7 + $0x2dc] sm:$0xf] }
 0x211   :  { %v9144_v22 = vor.u32 %v10113_v35, %v9143_v34  ;;  %v12671_v50 = vpack.c.bf16 %v2666_v44, %v2666_v44  ;;  %v9003_v35 = vld [vmem:[%s15256_s7 + $0xaf0] sm:$0xf]  ;;  %v10162_v58 = vld [vmem:[%s15256_s7 + $0xda8] sm:$0xf0] }
 0x212   :  { %5519 = vmatpush.bf16.msra.mxu2 %v7604_v39  ;;  %5541 = vmatpush.bf16.msrb.mxu0 %v8164_v40  ;;  %v12623_v14 = vpop.f32.mrf.mxu3  ;;  %v8052_v39 = vor.u32 %v9840_v23, %v8051_v21  ;;  %v8555_v40 = vld [vmem:[%s15256_s7 + $0x770] sm:$0xf]  ;;  %v10085_v21 = vld [vmem:[%s15256_s7 + $0xb40] sm:$0xf0] }
 0x213   :  { %v9339_v56 = vld [vmem:[%s15256_s7 + $0xd90] sm:$0xf] }
 0x214   :  { %5578 = vmatpush.bf16.msrb.mxu3 %v8892_v47  ;;  %5556 = vmatpush.bf16.msrb.mxu1 %v8332_v51  ;;  %v940_v47 = vperm.slane %v11993_v20, 4  ;;  %v8527_v51 = vld [vmem:[%s15256_s7 + $0x738] sm:$0xf]  ;;  %v9116_v20 = vor.u32 %v10106_v45, %v9115_v10  ;;  %v9367_v45 = vld [vmem:[%s15256_s7 + $0xdc8] sm:$0xf]  ;;  %v9340_v2 = vor.u32 %v10162_v58, %v9339_v56 }
 0x215   :  { %5520 = vmatmul.bf16.vlgmr.msra.gmra.mxu2 %v12569_v57  ;;  %v9227_v58 = vld [vmem:[%s15256_s7 + $0xcb0] sm:$0xf] }
 0x216   :  { %5564 = vmatpush.bf16.msrb.mxu2 %v8696_v41  ;;  %5542 = vmatpush.bf16.msrb.mxu0 %v8136_v54  ;;  %v9966_v41 = vld [vmem:[%s15256_s7 + $0x788] sm:$0xf0]  ;;  %v8752_v54 = vor.u32 %v10015_v1, %v8751_v43  ;;  %v9753_v1 = vld [vmem:[%s15256_s7 + $0xe4] sm:$0xf] }
 0x217   :  { %v8556_v49 = vor.u32 %v9966_v41, %v8555_v40  ;;  %v10078_v40 = vld [vmem:[%s15256_s7 + $0xb08] sm:$0xf0]  ;;  %v9809_v41 = vld [vmem:[%s15256_s7 + $0x2a4] sm:$0xf] }
 0x218   :  { %5579 = vmatpush.bf16.msrb.mxu3 %v8864_v62  ;;  %5557 = vmatpush.bf16.msrb.mxu1 %v8304_v46  ;;  %v2449_v38 = vpop.f32.mrf.mxu2  ;;  %v8528_v62 = vor.u32 %v9959_v52, %v8527_v51  ;;  %v9774_v46 = vld [vmem:[%s15256_s7 + $0x18c] sm:$0xf]  ;;  %v9004_v10 = vor.u32 %v10078_v40, %v9003_v35  ;;  %v8975_v51 = vld [vmem:[%s15256_s7 + $0xab8] sm:$0xf]  ;;  %v10071_v52 = vld [vmem:[%s15256_s7 + $0xad0] sm:$0xf0] }
 0x219   :  { %v2450_v61 = vadd.f32 %v2449_v38, %v940_v47  ;;  %v7748_v38 = vor.u32 %v9760_v32, %v7745_v33  ;;  %v10169_v47 = vld [vmem:[%s15256_s7 + $0xde0] sm:$0xf0]  ;;  %v9872_v40 = vld [vmem:[%s15256_s7 + $0x49c] sm:$0xf] }
 0x21a   :  { %5565 = vmatpush.bf16.msrb.mxu2 %v8668_v55  ;;  %5543 = vmatpush.bf16.msrb.mxu0 %v8108_v63  ;;  %v2464_v48 = vpop.f32.mrf.mxu3  ;;  %v8723_v55 = vld [vmem:[%s15256_s7 + $0x8c0] sm:$0xf]  ;;  %v7801_v63 = vld [vmem:[%s15256_s7 + $0x1a4] sm:$0xf0]  ;;  %v9781_v35 = vld [vmem:[%s15256_s7 + $0x1c4] sm:$0xf] }
 0x21b   :  { %v8724_v4 = vor.u32 %v10008_v29, %v8723_v55  ;;  %v2463_v6 = vadd.f32 %v12623_v14, %v2450_v61  ;;  %v7804_v15 = vor.u32 %v9774_v46, %v7801_v63  ;;  %v9031_v14 = vld [vmem:[%s15256_s7 + $0xb28] sm:$0xf]  ;;  %v7717_v48 = vld [vmem:[%s15256_s7 + $0xfc] sm:$0xf0]  ;;  %v9802_v55 = vld [vmem:[%s15256_s7 + $0x26c] sm:$0xf] }
 0x21c   :  { %5580 = vmatpush.bf16.msrb.mxu3 %v8836_v13  ;;  %5558 = vmatpush.bf16.msrb.mxu1 %v8276_v17  ;;  %v2488_v59 = vpop.f32.mrf.mxu1  ;;  %v9060_v17 = vor.u32 %v10092_v8, %v9059_v7  ;;  %v9032_v34 = vor.u32 %v10085_v21, %v9031_v14  ;;  %v9746_v29 = vld [vmem:[%s15256_s7 + $0xac] sm:$0xf]  ;;  %v7885_v61 = vld [vmem:[%s15256_s7 + $0x24c] sm:$0xf0]  ;;  %v10155_v7 = vld [vmem:[%s15256_s7 + $0xd70] sm:$0xf0] }
 0x21d   :  { %v9886_v63 = vld [vmem:[%s15256_s7 + $0x50c] sm:$0xf]  ;;  %v9283_v14 = vld [vmem:[%s15256_s7 + $0xd20] sm:$0xf]  ;;  %v10148_v21 = vld [vmem:[%s15256_s7 + $0xd38] sm:$0xf0] }
 0x21e   :  { %5566 = vmatpush.bf16.msrb.mxu2 %v8640_v0  ;;  %5544 = vmatpush.bf16.msrb.mxu0 %v8080_v26  ;;  %v8028_v0 = vor.u32 %v9830_v37, %v8025_v60  ;;  %v7773_v26 = vld [vmem:[%s15256_s7 + $0x16c] sm:$0xf0]  ;;  %v7689_v37 = vld [vmem:[%s15256_s7 + $0xc4] sm:$0xf0]  ;;  %v9795_v60 = vld [vmem:[%s15256_s7 + $0x234] sm:$0xf]  ;;  %v9284_v32 = vor.u32 %v10148_v21, %v9283_v14 }
 0x21f   :  { %5559 = vmatmul.bf16.vlgmr.msrb.gmra.mxu1 %v12649_v36  ;;  %v10120_v14 = vld [vmem:[%s15256_s7 + $0xc58] sm:$0xf0] }
 0x220   :  { %5581 = vmatpush.bf16.msrb.mxu3 %v8808_v31  ;;  %v2451_v24 = vpop.f32.mrf.mxu2  ;;  %v7776_v31 = vor.u32 %v9767_v16, %v7773_v26  ;;  %v8221_v26 = vld [vmem:[%s15256_s7 + $0x4ec] sm:$0xf0] }
 0x221   :  { %v9311_v24 = vld [vmem:[%s15256_s7 + $0xd58] sm:$0xf] }
 0x222   :  { %5567 = vmatpush.bf16.msrb.mxu2 %v8612_v19  ;;  %5545 = vmatpush.bf16.msrb.mxu0 %v8052_v39  ;;  %v2475_v13 = vpop.f32.mrf.mxu0  ;;  %v8000_v19 = vor.u32 %v9823_v9, %v7997_v11  ;;  %v9312_v8 = vor.u32 %v10155_v7, %v9311_v24  ;;  %v7692_v9 = vor.u32 %v9746_v29, %v7689_v37  ;;  %v10127_v7 = vld [vmem:[%s15256_s7 + $0xc90] sm:$0xf0] }
 0x223   :  { %v2476_v18 = vadd.f32 %v2475_v13, %v2463_v6  ;;  %v9739_v6 = vld [vmem:[%s15256_s7 + $0x74] sm:$0xf]  ;;  %v7888_v13 = vor.u32 %v9795_v60, %v7885_v61  ;;  %v8669_v61 = vld [vmem:[%s15256_s7 + $0x86c] sm:$0xf0] }
 0x224   :  { %5582 = vmatpush.bf16.msrb.mxu3 %v8780_v42  ;;  %v2490_v23 = vpop.f32.mrf.mxu1  ;;  %v7941_v42 = vld [vmem:[%s15256_s7 + $0x2bc] sm:$0xf0]  ;;  %v9991_v60 = vld [vmem:[%s15256_s7 + $0x854] sm:$0xf] }
 0x225   :  { %5546 = vmatmul.bf16.vlgmr.msrb.gmra.mxu0 %v12671_v50  ;;  %v2489_v27 = vadd.f32 %v2488_v59, %v2476_v18  ;;  %v7720_v59 = vor.u32 %v9753_v1, %v7717_v48  ;;  %v9879_v18 = vld [vmem:[%s15256_s7 + $0x4d4] sm:$0xf]  ;;  %v12851_v23 = vld [vmem:[%s15255_s6] sm:$0xff]  ;;  %v9998_v48 = vld [vmem:[%s15256_s7 + $0x88c] sm:$0xf] }
 0x226   :  { %5568 = vmatpush.bf16.msrb.mxu2 %v8584_v53  ;;  %5590 = vmatpush.bf16.msra.mxu0 %v9144_v22  ;;  %v7972_v53 = vor.u32 %v9816_v25, %v7969_v28  ;;  %v941_v25 = vperm.slane %v12851_v23, 5 }
 0x227   :  { %vm2652_vm12 = vcmp.gt.f32.partialorder %v2489_v27, 0.0  ;;  %v2660_v39 = vmul.f32 0.2, %v2489_v27 }
 0x228   :  { %5583 = vmatpush.bf16.msrb.mxu3 %v8752_v54  ;;  %v9368_v54 = vor.u32 %v10169_v47, %v9367_v45  ;;  %v7605_v47 = vld [vmem:[%s15256_s7 + $0x1c] sm:$0xf0] }
 0x229   :  { %v2668_v43 = vsel %vm2652_vm12, %v2489_v27, %v2660_v39  ;;  %v9732_v27 = vld [vmem:[%s15256_s7 + $0x3c] sm:$0xf]  ;;  %v7829_v39 = vld [vmem:[%s15256_s7 + $0x1dc] sm:$0xf0] }
 0x22a   :  { %5569 = vmatpush.bf16.msrb.mxu2 %v8556_v49  ;;  %5591 = vmatpush.bf16.msra.mxu0 %v9116_v20  ;;  %v12759_v22 = vpack.c.bf16 %v2668_v43, %v2668_v43  ;;  %v2477_v44 = vpop.f32.mrf.mxu0  ;;  %v7944_v49 = vor.u32 %v9809_v41, %v7941_v42  ;;  %v7913_v20 = vld [vmem:[%s15256_s7 + $0x284] sm:$0xf0]  ;;  %v8193_v41 = vld [vmem:[%s15256_s7 + $0x4b4] sm:$0xf0]  ;;  %v10141_v43 = vld [vmem:[%s15256_s7 + $0xd00] sm:$0xf0] }
 0x22b   :  { %5603 = vmatpush.bf16.msra.mxu1 %v9368_v54  ;;  %v7916_v46 = vor.u32 %v9802_v55, %v7913_v20  ;;  %v9255_v42 = vld [vmem:[%s15256_s7 + $0xce8] sm:$0xf]  ;;  %v9865_v54 = vld [vmem:[%s15256_s7 + $0x464] sm:$0xf]  ;;  %v8165_v55 = vld [vmem:[%s15256_s7 + $0x47c] sm:$0xf0] }
 0x22c   :  { %5584 = vmatpush.bf16.msrb.mxu3 %v8724_v4  ;;  %v8947_v4 = vld [vmem:[%s15256_s7 + $0xa80] sm:$0xf]  ;;  %v9256_v44 = vor.u32 %v10141_v43, %v9255_v42  ;;  %v8081_v42 = vld [vmem:[%s15256_s7 + $0x3d4] sm:$0xf0] }
 0x22e   :  { %5570 = vmatpush.bf16.msrb.mxu2 %v8528_v62  ;;  %5592 = vmatpush.bf16.msra.mxu0 %v9088_v5  ;;  %v8976_v62 = vor.u32 %v10071_v52, %v8975_v51  ;;  %v10064_v5 = vld [vmem:[%s15256_s7 + $0xa98] sm:$0xf0]  ;;  %v7832_v51 = vor.u32 %v9781_v35, %v7829_v39  ;;  %v8196_v52 = vor.u32 %v9872_v40, %v8193_v41  ;;  %v8893_v35 = vld [vmem:[%s15256_s7 + $0xa2c] sm:$0xf0]  ;;  %v8473_v40 = vld [vmem:[%s15256_s7 + $0x6e4] sm:$0xf0] }
 0x22f   :  { %5604 = vmatpush.bf16.msra.mxu1 %v9340_v2  ;;  %v8948_v11 = vor.u32 %v10064_v5, %v8947_v4  ;;  %v9858_v4 = vld [vmem:[%s15256_s7 + $0x42c] sm:$0xf]  ;;  %v9844_v41 = vld [vmem:[%s15256_s7 + $0x3bc] sm:$0xf] }
 0x230   :  { %5629 = vmatpush.bf16.msra.mxu3 %v8028_v0  ;;  %v8249_v0 = vld [vmem:[%s15256_s7 + $0x524] sm:$0xf0] }
 0x231   :  { %v8252_v16 = vor.u32 %v9886_v63, %v8249_v0  ;;  %v8672_v63 = vor.u32 %v9991_v60, %v8669_v61  ;;  %v9199_v0 = vld [vmem:[%s15256_s7 + $0xc78] sm:$0xf]  ;;  %v8557_v60 = vld [vmem:[%s15256_s7 + $0x78c] sm:$0xf0]  ;;  %v10033_v61 = vld [vmem:[%s15256_s7 + $0x9a4] sm:$0xf] }
 0x232   :  { %5571 = vmatpush.bf16.msrb.mxu2 %v8500_v12  ;;  %5593 = vmatpush.bf16.msra.mxu0 %v9060_v17  ;;  %v12804_v3 = vpop.f32.mrf.mxu3  ;;  %v7661_v12 = vld [vmem:[%s15256_s7 + $0x8c] sm:$0xf0]  ;;  %v7857_v17 = vld [vmem:[%s15256_s7 + $0x214] sm:$0xf0] }
 0x233   :  { %5605 = vmatpush.bf16.msra.mxu1 %v9312_v8  ;;  %v7664_v28 = vor.u32 %v9739_v6, %v7661_v12  ;;  %v9200_v12 = vor.u32 %v10127_v7, %v9199_v0  ;;  %v8389_v0 = vld [vmem:[%s15256_s7 + $0x63c] sm:$0xf0]  ;;  %v8529_v7 = vld [vmem:[%s15256_s7 + $0x754] sm:$0xf0] }
 0x234   :  { %5630 = vmatpush.bf16.msra.mxu3 %v8000_v19 }
 0x235   :  { %5572 = vmatmul.bf16.vlgmr.msrb.gmra.mxu2 %v12759_v22 }
 0x236   :  { %5616 = vmatpush.bf16.msra.mxu2 %v7804_v15  ;;  %5594 = vmatpush.bf16.msra.mxu0 %v9032_v34  ;;  %v9788_v15 = vld [vmem:[%s15256_s7 + $0x1fc] sm:$0xf] }
 0x237   :  { %v7860_v34 = vor.u32 %v9788_v15, %v7857_v17  ;;  %5606 = vmatpush.bf16.msra.mxu1 %v9284_v32  ;;  %v8921_v15 = vld [vmem:[%s15256_s7 + $0xa64] sm:$0xf0] }
 0x238   :  { %5631 = vmatpush.bf16.msra.mxu3 %v7972_v53  ;;  %v2501_v19 = vpop.f32.mrf.mxu2  ;;  %v8224_v53 = vor.u32 %v9879_v18, %v8221_v26  ;;  %v8109_v18 = vld [vmem:[%s15256_s7 + $0x40c] sm:$0xf0] }
 0x239   :  { %v2502_v45 = vadd.f32 %v2501_v19, %v941_v25  ;;  %v9171_v19 = vld [vmem:[%s15256_s7 + $0xc40] sm:$0xf] }
 0x23a   :  { %5617 = vmatpush.bf16.msra.mxu2 %v7776_v31  ;;  %5595 = vmatpush.bf16.msra.mxu0 %v9004_v10  ;;  %v7633_v31 = vld [vmem:[%s15256_s7 + $0x54] sm:$0xf0]  ;;  %v2516_v33 = vpop.f32.mrf.mxu3  ;;  %v9725_v10 = vld [vmem:[%s15256_s7 + $0x4] sm:$0xf]  ;;  %v9172_v32 = vor.u32 %v10120_v14, %v9171_v19  ;;  %v8501_v19 = vld [vmem:[%s15256_s7 + $0x71c] sm:$0xf0] }
 0x23b   :  { %v7636_v1 = vor.u32 %v9732_v27, %v7633_v31  ;;  %5607 = vmatpush.bf16.msra.mxu1 %v9256_v44  ;;  %v7608_v29 = vor.u32 %v9725_v10, %v7605_v47  ;;  %v2515_v37 = vadd.f32 %v12804_v3, %v2502_v45  ;;  %v8137_v3 = vld [vmem:[%s15256_s7 + $0x444] sm:$0xf0]  ;;  %v8613_v27 = vld [vmem:[%s15256_s7 + $0x7fc] sm:$0xf0]  ;;  %v10047_v31 = vld [vmem:[%s15256_s7 + $0xa14] sm:$0xf] }
 0x23c   :  { %5632 = vmatpush.bf16.msra.mxu3 %v7944_v49  ;;  %v8697_v49 = vld [vmem:[%s15256_s7 + $0x8a4] sm:$0xf0]  ;;  %v8140_v6 = vor.u32 %v9858_v4, %v8137_v3  ;;  %v9935_v10 = vld [vmem:[%s15256_s7 + $0x694] sm:$0xf]  ;;  %v8445_v45 = vld [vmem:[%s15256_s7 + $0x6ac] sm:$0xf0] }
 0x23d   :  { %v8700_v56 = vor.u32 %v9998_v48, %v8697_v49  ;;  %v8585_v47 = vld [vmem:[%s15256_s7 + $0x7c4] sm:$0xf0]  ;;  %v10040_v48 = vld [vmem:[%s15256_s7 + $0x9dc] sm:$0xf]  ;;  %v8865_v49 = vld [vmem:[%s15256_s7 + $0x9f4] sm:$0xf0] }
 0x23e   :  { %5618 = vmatpush.bf16.msra.mxu2 %v7748_v38  ;;  %5596 = vmatpush.bf16.msra.mxu0 %v8976_v62  ;;  %v2540_v38 = vpop.f32.mrf.mxu1  ;;  %v8168_v62 = vor.u32 %v9865_v54, %v8165_v55  ;;  %v9837_v55 = vld [vmem:[%s15256_s7 + $0x384] sm:$0xf]  ;;  %v10019_v14 = vld [vmem:[%s15256_s7 + $0x934] sm:$0xf] }
 0x240   :  { %5633 = vmatpush.bf16.msra.mxu3 %v7916_v46  ;;  %v2503_v20 = vpop.f32.mrf.mxu2 }
 0x241   :  { %v8053_v20 = vld [vmem:[%s15256_s7 + $0x39c] sm:$0xf0] }
 0x242   :  { %5619 = vmatpush.bf16.msra.mxu2 %v7720_v59  ;;  %5597 = vmatpush.bf16.msra.mxu0 %v8948_v11  ;;  %v10134_v59 = vld [vmem:[%s15256_s7 + $0xcc8] sm:$0xf0]  ;;  %v2527_v46 = vpop.f32.mrf.mxu0  ;;  %v8641_v11 = vld [vmem:[%s15256_s7 + $0x834] sm:$0xf0] }
 0x243   :  { %v9228_v2 = vor.u32 %v10134_v59, %v9227_v58  ;;  %v2528_v5 = vadd.f32 %v2527_v46, %v2515_v37  ;;  %v8868_v59 = vor.u32 %v10040_v48, %v8865_v49  ;;  %v9963_v37 = vld [vmem:[%s15256_s7 + $0x774] sm:$0xf]  ;;  %v9900_v48 = vld [vmem:[%s15256_s7 + $0x57c] sm:$0xf]  ;;  %v8305_v49 = vld [vmem:[%s15256_s7 + $0x594] sm:$0xf0] }
 0x244   :  { %5634 = vmatpush.bf16.msra.mxu3 %v7888_v13  ;;  %v10054_v13 = vld [vmem:[%s15256_s7 + $0xa4c] sm:$0xf]  ;;  %v8560_v3 = vor.u32 %v9963_v37, %v8557_v60  ;;  %v9145_v37 = vld [vmem:[%s15256_s7 + $0xc24] sm:$0xf0]  ;;  %v8031_v60 = vld [vmem:[%s15256_s7 + $0x350] sm:$0xf] }
 0x245   :  { %5608 = vmatpush.bf16.msra.mxu1 %v9228_v2  ;;  %v2541_v8 = vadd.f32 %v2540_v38, %v2528_v5  ;;  %v8924_v25 = vor.u32 %v10054_v13, %v8921_v15  ;;  %v8896_v38 = vor.u32 %v10047_v31, %v8893_v35  ;;  %v8056_v2 = vor.u32 %v9837_v55, %v8053_v20  ;;  %v9778_v31 = vld [vmem:[%s15256_s7 + $0x1a8] sm:$0xf0]  ;;  %v8725_v55 = vld [vmem:[%s15256_s7 + $0x8dc] sm:$0xf0] }
 0x246   :  { %5620 = vmatpush.bf16.msra.mxu2 %v7692_v9  ;;  %5642 = vmatpush.bf16.msrb.mxu0 %v8252_v16  ;;  %v2542_v24 = vpop.f32.mrf.mxu1  ;;  %v9984_v9 = vld [vmem:[%s15256_s7 + $0x81c] sm:$0xf]  ;;  %v9851_v16 = vld [vmem:[%s15256_s7 + $0x3f4] sm:$0xf]  ;;  %v8308_v20 = vor.u32 %v9900_v48, %v8305_v49  ;;  %v9033_v48 = vld [vmem:[%s15256_s7 + $0xb44] sm:$0xf0] }
 0x247   :  { %vm2653_vm13 = vcmp.gt.f32.partialorder %v2541_v8, 0.0  ;;  %v2661_v17 = vmul.f32 0.2, %v2541_v8  ;;  %v8644_v26 = vor.u32 %v9984_v9, %v8641_v11  ;;  %v8112_v39 = vor.u32 %v9851_v16, %v8109_v18  ;;  %v9956_v24 = vld [vmem:[%s15256_s7 + $0x73c] sm:$0xf] }
 0x248   :  { %5635 = vmatpush.bf16.msra.mxu3 %v7860_v34  ;;  %v8809_v9 = vld [vmem:[%s15256_s7 + $0x984] sm:$0xf0]  ;;  %v8532_v13 = vor.u32 %v9956_v24, %v8529_v7  ;;  %v9949_v16 = vld [vmem:[%s15256_s7 + $0x704] sm:$0xf]  ;;  %v7919_v49 = vld [vmem:[%s15256_s7 + $0x270] sm:$0xf] }
 0x249   :  { %5609 = vmatpush.bf16.msra.mxu1 %v9200_v12  ;;  %v2669_v21 = vsel %vm2653_vm13, %v2541_v8, %v2661_v17  ;;  %v10026_v8 = vld [vmem:[%s15256_s7 + $0x96c] sm:$0xf]  ;;  %v8361_v18 = vld [vmem:[%s15256_s7 + $0x604] sm:$0xf0] }
 0x24a   :  { %5621 = vmatpush.bf16.msra.mxu2 %v7664_v28  ;;  %5643 = vmatpush.bf16.msrb.mxu0 %v8224_v53  ;;  %v9977_v28 = vld [vmem:[%s15256_s7 + $0x7e4] sm:$0xf]  ;;  %v12955_v33 = vpack.c.bf16 %v2669_v21, %v2669_v21  ;;  %v2529_v34 = vpop.f32.mrf.mxu0  ;;  %v9942_v53 = vld [vmem:[%s15256_s7 + $0x6cc] sm:$0xf]  ;;  %v8812_v15 = vor.u32 %v10026_v8, %v8809_v9  ;;  %v8781_v21 = vld [vmem:[%s15256_s7 + $0x94c] sm:$0xf0] }
 0x24b   :  { %v8476_v43 = vor.u32 %v9942_v53, %v8473_v40  ;;  %v8616_v44 = vor.u32 %v9977_v28, %v8613_v27  ;;  %v9914_v17 = vld [vmem:[%s15256_s7 + $0x5ec] sm:$0xf]  ;;  %v7807_v27 = vld [vmem:[%s15256_s7 + $0x190] sm:$0xf]  ;;  %v8504_v34 = vor.u32 %v9949_v16, %v8501_v19  ;;  %v8784_v35 = vor.u32 %v10019_v14, %v8781_v21  ;;  %v7723_v7 = vld [vmem:[%s15256_s7 + $0xe8] sm:$0xf] }
 0x24c   :  { %5636 = vmatpush.bf16.msra.mxu3 %v7832_v51  ;;  %v8084_v51 = vor.u32 %v9844_v41, %v8081_v42  ;;  %v8333_v53 = vld [vmem:[%s15256_s7 + $0x5cc] sm:$0xf0]  ;;  %v7808_v40 = vor.u32 %v9778_v31, %v7807_v27  ;;  %v10012_v41 = vld [vmem:[%s15256_s7 + $0x8fc] sm:$0xf]  ;;  %v8753_v42 = vld [vmem:[%s15256_s7 + $0x914] sm:$0xf0] }
 0x24d   :  { %5610 = vmatpush.bf16.msra.mxu1 %v9172_v32  ;;  %5585 = vmatmul.bf16.vlgmr.msrb.gmra.mxu3 %v12955_v33  ;;  %v9757_v8 = vld [vmem:[%s15256_s7 + $0x100] sm:$0xf0]  ;;  %v7695_v19 = vld [vmem:[%s15256_s7 + $0xb0] sm:$0xf]  ;;  %v9750_v14 = vld [vmem:[%s15256_s7 + $0xc8] sm:$0xf0] }
 0x24e   :  { %5622 = vmatpush.bf16.msra.mxu2 %v7636_v1  ;;  %5644 = vmatpush.bf16.msrb.mxu0 %v8196_v52  ;;  %v9970_v1 = vld [vmem:[%s15256_s7 + $0x7ac] sm:$0xf]  ;;  %v8448_v52 = vor.u32 %v9935_v10, %v8445_v45  ;;  %v7724_v16 = vor.u32 %v9757_v8, %v7723_v7  ;;  %v9089_v21 = vld [vmem:[%s15256_s7 + $0xbb4] sm:$0xf0]  ;;  %v7696_v31 = vor.u32 %v9750_v14, %v7695_v19  ;;  %v7863_v8 = vld [vmem:[%s15256_s7 + $0x200] sm:$0xf] }
 0x24f   :  { %v8588_v58 = vor.u32 %v9970_v1, %v8585_v47  ;;  %v9771_v1 = vld [vmem:[%s15256_s7 + $0x170] sm:$0xf0]  ;;  %v8756_v47 = vor.u32 %v10012_v41, %v8753_v42  ;;  %v7947_v41 = vld [vmem:[%s15256_s7 + $0x2a8] sm:$0xf]  ;;  %v9813_v42 = vld [vmem:[%s15256_s7 + $0x2c0] sm:$0xf0] }
 0x250   :  { %5681 = vmatpush.bf16.msrb.mxu3 %v8924_v25  ;;  %v8364_v25 = vor.u32 %v9914_v17, %v8361_v18  ;;  %v8977_v7 = vld [vmem:[%s15256_s7 + $0xad4] sm:$0xf0]  ;;  %v8949_v19 = vld [vmem:[%s15256_s7 + $0xa9c] sm:$0xf0] }
 0x251   :  { %5655 = vmatpush.bf16.msrb.mxu1 %v8476_v43 }
 0x252   :  { %5623 = vmatpush.bf16.msra.mxu2 %v7608_v29  ;;  %5645 = vmatpush.bf16.msrb.mxu0 %v8168_v62  ;;  %v2566_v54 = vpop.f32.mrf.mxu3  ;;  %v9928_v29 = vld [vmem:[%s15256_s7 + $0x65c] sm:$0xf]  ;;  %v8837_v62 = vld [vmem:[%s15256_s7 + $0x9bc] sm:$0xf0] }
 0x253   :  { %v8840_v5 = vor.u32 %v10033_v61, %v8837_v62  ;;  %v9834_v61 = vld [vmem:[%s15256_s7 + $0x368] sm:$0xf0] }
 0x254   :  { %5682 = vmatpush.bf16.msrb.mxu3 %v8896_v38  ;;  %v7779_v38 = vld [vmem:[%s15256_s7 + $0x158] sm:$0xf] }
 0x255   :  { %5624 = vmatmul.bf16.vlgmr.msra.gmra.mxu2 %v12569_v57  ;;  %5656 = vmatpush.bf16.msrb.mxu1 %v8448_v52  ;;  %v7780_v52 = vor.u32 %v9771_v1, %v7779_v38  ;;  %v7948_v1 = vor.u32 %v9813_v42, %v7947_v41 }
 0x256   :  { %5668 = vmatpush.bf16.msrb.mxu2 %v8700_v56  ;;  %5646 = vmatpush.bf16.msrb.mxu0 %v8140_v6  ;;  %v8417_v56 = vld [vmem:[%s15256_s7 + $0x674] sm:$0xf0]  ;;  %v942_v6 = vperm.slane %v12851_v23, 6 }
 0x257   :  { %v8420_v46 = vor.u32 %v9928_v29, %v8417_v56  ;;  %v10110_v56 = vld [vmem:[%s15256_s7 + $0xc0c] sm:$0xf] }
 0x258   :  { %5683 = vmatpush.bf16.msrb.mxu3 %v8868_v59  ;;  %v2553_v4 = vpop.f32.mrf.mxu2  ;;  %v9764_v59 = vld [vmem:[%s15256_s7 + $0x138] sm:$0xf0]  ;;  %v9148_v24 = vor.u32 %v10110_v56, %v9145_v37  ;;  %v10075_v56 = vld [vmem:[%s15256_s7 + $0xaf4] sm:$0xf]  ;;  %v9005_v37 = vld [vmem:[%s15256_s7 + $0xb0c] sm:$0xf0] }
 0x259   :  { %5657 = vmatpush.bf16.msrb.mxu1 %v8420_v46  ;;  %v2554_v28 = vadd.f32 %v2553_v4, %v942_v6  ;;  %v9893_v46 = vld [vmem:[%s15256_s7 + $0x544] sm:$0xf]  ;;  %v9117_v6 = vld [vmem:[%s15256_s7 + $0xbec] sm:$0xf0] }
 0x25a   :  { %5669 = vmatpush.bf16.msrb.mxu2 %v8672_v63  ;;  %5647 = vmatpush.bf16.msrb.mxu0 %v8112_v39  ;;  %v9921_v63 = vld [vmem:[%s15256_s7 + $0x624] sm:$0xf]  ;;  %v2568_v12 = vpop.f32.mrf.mxu3  ;;  %v9907_v39 = vld [vmem:[%s15256_s7 + $0x5b4] sm:$0xf] }
 0x25b   :  { %v8392_v11 = vor.u32 %v9921_v63, %v8389_v0  ;;  %v8336_v43 = vor.u32 %v9907_v39, %v8333_v53  ;;  %v8032_v63 = vor.u32 %v9834_v61, %v8031_v60  ;;  %v10103_v0 = vld [vmem:[%s15256_s7 + $0xbd4] sm:$0xf]  ;;  %v8003_v12 = vld [vmem:[%s15256_s7 + $0x318] sm:$0xf] }
 0x25c   :  { %5684 = vmatpush.bf16.msrb.mxu3 %v8840_v5  ;;  %v9120_v17 = vor.u32 %v10103_v0, %v9117_v6  ;;  %v7667_v39 = vld [vmem:[%s15256_s7 + $0x78] sm:$0xf]  ;;  %v9743_v53 = vld [vmem:[%s15256_s7 + $0x90] sm:$0xf0] }
 0x25d   :  { %5658 = vmatpush.bf16.msrb.mxu1 %v8392_v11  ;;  %5637 = vmatmul.bf16.vlgmr.msra.gmra.mxu3 %v12530_v30  ;;  %v7891_v60 = vld [vmem:[%s15256_s7 + $0x238] sm:$0xf]  ;;  %v9799_v61 = vld [vmem:[%s15256_s7 + $0x250] sm:$0xf0] }
 0x25e   :  { %5670 = vmatpush.bf16.msrb.mxu2 %v8644_v26  ;;  %5648 = vmatpush.bf16.msrb.mxu0 %v8084_v51  ;;  %v2592_v26 = vpop.f32.mrf.mxu1 }
 0x260   :  { %5685 = vmatpush.bf16.msrb.mxu3 %v8812_v15  ;;  %v2555_v32 = vpop.f32.mrf.mxu2 }
 0x261   :  { %5659 = vmatpush.bf16.msrb.mxu1 %v8364_v25  ;;  %v7975_v25 = vld [vmem:[%s15256_s7 + $0x2e0] sm:$0xf] }
 0x262   :  { %5671 = vmatpush.bf16.msrb.mxu2 %v8616_v44  ;;  %5649 = vmatpush.bf16.msrb.mxu0 %v8056_v2  ;;  %v2567_v44 = vadd.f32 %v2566_v54, %v2554_v28  ;;  %v2579_v10 = vpop.f32.mrf.mxu0  ;;  %v10005_v54 = vld [vmem:[%s15256_s7 + $0x8c4] sm:$0xf]  ;;  %v9820_v28 = vld [vmem:[%s15256_s7 + $0x2f8] sm:$0xf0] }
 0x263   :  { %v8728_v2 = vor.u32 %v10005_v54, %v8725_v55 }
 0x264   :  { %v2580_v45 = vadd.f32 %v2579_v10, %v2567_v44  ;;  %5686 = vmatpush.bf16.msrb.mxu3 %v8784_v35  ;;  %v10089_v35 = vld [vmem:[%s15256_s7 + $0xb64] sm:$0xf]  ;;  %v10082_v10 = vld [vmem:[%s15256_s7 + $0xb2c] sm:$0xf] }
 0x265   :  { %5660 = vmatpush.bf16.msrb.mxu1 %v8336_v43  ;;  %v7668_v43 = vor.u32 %v9743_v53, %v7667_v39  ;;  %v8647_v39 = vld [vmem:[%s15256_s7 + $0x820] sm:$0xf]  ;;  %v9988_v53 = vld [vmem:[%s15256_s7 + $0x838] sm:$0xf0] }
 0x266   :  { %5672 = vmatpush.bf16.msrb.mxu2 %v8588_v58  ;;  %v2594_v51 = vpop.f32.mrf.mxu1  ;;  %v2593_v29 = vadd.f32 %v2592_v26, %v2580_v45  ;;  %v7751_v58 = vld [vmem:[%s15256_s7 + $0x120] sm:$0xf]  ;;  %v10096_v26 = vld [vmem:[%s15256_s7 + $0xb9c] sm:$0xf] }
 0x267   :  { %v7752_v4 = vor.u32 %v9764_v59, %v7751_v58  ;;  %v9092_v32 = vor.u32 %v10096_v26, %v9089_v21  ;;  %v7639_v45 = vld [vmem:[%s15256_s7 + $0x40] sm:$0xf]  ;;  %v9806_v51 = vld [vmem:[%s15256_s7 + $0x288] sm:$0xf0]  ;;  %v7611_v58 = vld [vmem:[%s15256_s7 + $0x8] sm:$0xf] }
 0x268   :  { %vm2654_vm14 = vcmp.gt.f32.partialorder %v2593_v29, 0.0  ;;  %v2662_v62 = vmul.f32 0.2, %v2593_v29  ;;  %5687 = vmatpush.bf16.msrb.mxu3 %v8756_v47  ;;  %v9736_v47 = vld [vmem:[%s15256_s7 + $0x58] sm:$0xf0] }
 0x269   :  { %5661 = vmatpush.bf16.msrb.mxu1 %v8308_v20  ;;  %v7640_v55 = vor.u32 %v9736_v47, %v7639_v45  ;;  %v9036_v20 = vor.u32 %v10082_v10, %v9033_v48  ;;  %v9729_v59 = vld [vmem:[%s15256_s7 + $0x20] sm:$0xf0]  ;;  %v8648_v45 = vor.u32 %v9988_v53, %v8647_v39  ;;  %v10159_v47 = vld [vmem:[%s15256_s7 + $0xd94] sm:$0xf]  ;;  %v8227_v48 = vld [vmem:[%s15256_s7 + $0x4d8] sm:$0xf] }
 0x26a   :  { %5673 = vmatpush.bf16.msrb.mxu2 %v8560_v3  ;;  %v8277_v3 = vld [vmem:[%s15256_s7 + $0x55c] sm:$0xf0]  ;;  %v2670_v5 = vsel %vm2654_vm14, %v2593_v29, %v2662_v62  ;;  %v2581_v11 = vpop.f32.mrf.mxu0  ;;  %v7920_v29 = vor.u32 %v9806_v51, %v7919_v49  ;;  %v10061_v26 = vld [vmem:[%s15256_s7 + $0xa84] sm:$0xf]  ;;  %v9883_v49 = vld [vmem:[%s15256_s7 + $0x4f0] sm:$0xf0] }
 0x26b   :  { %v13123_v9 = vpack.c.bf16 %v2670_v5, %v2670_v5  ;;  %v8280_v15 = vor.u32 %v9893_v46, %v8277_v3  ;;  %v10002_v46 = vld [vmem:[%s15256_s7 + $0x8a8] sm:$0xf0]  ;;  %v9008_v5 = vor.u32 %v10075_v56, %v9005_v37  ;;  %v9792_v11 = vld [vmem:[%s15256_s7 + $0x218] sm:$0xf0]  ;;  %v8952_v42 = vor.u32 %v10061_v26, %v8949_v19  ;;  %v8899_v56 = vld [vmem:[%s15256_s7 + $0xa18] sm:$0xf] }
 0x26c   :  { %5688 = vmatpush.bf16.msrb.mxu3 %v8728_v2  ;;  %v8703_v2 = vld [vmem:[%s15256_s7 + $0x890] sm:$0xf]  ;;  %v9967_v26 = vld [vmem:[%s15256_s7 + $0x790] sm:$0xf0]  ;;  %v8843_v19 = vld [vmem:[%s15256_s7 + $0x9a8] sm:$0xf] }
 0x26d   :  { %5598 = vmatmul.bf16.vlgmr.msra.gmra.mxu0 %v13123_v9  ;;  %5662 = vmatpush.bf16.msrb.mxu1 %v8280_v15  ;;  %v8704_v0 = vor.u32 %v10002_v46, %v8703_v2  ;;  %v3192_v2 = vld [vmem:[%s15257_s8] sm:$0xff]  ;;  %v9257_v53 = vld [vmem:[%s15256_s7 + $0xd04] sm:$0xf0] }
 0x26e   :  { %5674 = vmatpush.bf16.msrb.mxu2 %v8532_v13  ;;  %v9827_v13 = vld [vmem:[%s15256_s7 + $0x330] sm:$0xf0]  ;;  %5694 = vmatpush.bf16.msra.mxu0 %v9148_v24  ;;  %v7892_v24 = vor.u32 %v9799_v61, %v7891_v60  ;;  %v8199_v61 = vld [vmem:[%s15256_s7 + $0x4a0] sm:$0xf] }
 0x26f   :  { %v8004_v18 = vor.u32 %v9827_v13, %v8003_v12  ;;  %5689 = vmatmul.bf16.vlgmr.msrb.gmra.mxu3 %v12955_v33  ;;  %v8675_v12 = vld [vmem:[%s15256_s7 + $0x858] sm:$0xf]  ;;  %v9995_v13 = vld [vmem:[%s15256_s7 + $0x870] sm:$0xf0] }
 0x270   :  { %5733 = vmatpush.bf16.msra.mxu3 %v8032_v63  ;;  %v10068_v63 = vld [vmem:[%s15256_s7 + $0xabc] sm:$0xf]  ;;  %v8676_v21 = vor.u32 %v9995_v13, %v8675_v12  ;;  %v10145_v12 = vld [vmem:[%s15256_s7 + $0xd24] sm:$0xf]  ;;  %v8171_v13 = vld [vmem:[%s15256_s7 + $0x468] sm:$0xf] }
 0x272   :  { %5675 = vmatpush.bf16.msrb.mxu2 %v8504_v34  ;;  %v2618_v27 = vpop.f32.mrf.mxu3  ;;  %5695 = vmatpush.bf16.msra.mxu0 %v9120_v17  ;;  %v7976_v34 = vor.u32 %v9820_v28, %v7975_v25  ;;  %v8980_v17 = vor.u32 %v10068_v63, %v8977_v7  ;;  %v7835_v25 = vld [vmem:[%s15256_s7 + $0x1c8] sm:$0xf]  ;;  %v9785_v28 = vld [vmem:[%s15256_s7 + $0x1e0] sm:$0xf0]  ;;  %v8871_v63 = vld [vmem:[%s15256_s7 + $0x9e0] sm:$0xf] }
 0x274   :  { %5734 = vmatpush.bf16.msra.mxu3 %v8004_v18  ;;  %v7864_v18 = vor.u32 %v9792_v11, %v7863_v8  ;;  %v3194_v8 = vperm.slane %v3192_v2, 0  ;;  %v8087_v2 = vld [vmem:[%s15256_s7 + $0x3c0] sm:$0xf] }
 0x275   :  { %5676 = vmatmul.bf16.vlgmr.msrb.gmra.mxu2 %v12759_v22 }
 0x276   :  { %5720 = vmatpush.bf16.msra.mxu2 %v7808_v40  ;;  %v9061_v40 = vld [vmem:[%s15256_s7 + $0xb7c] sm:$0xf0]  ;;  %5696 = vmatpush.bf16.msra.mxu0 %v9092_v32  ;;  %v9369_v32 = vld [vmem:[%s15256_s7 + $0xde4] sm:$0xf0] }
 0x277   :  { %v9064_v38 = vor.u32 %v10089_v35, %v9061_v40  ;;  %v9890_v35 = vld [vmem:[%s15256_s7 + $0x528] sm:$0xf0]  ;;  %v8927_v40 = vld [vmem:[%s15256_s7 + $0xa50] sm:$0xf] }
 0x278   :  { %5735 = vmatpush.bf16.msra.mxu3 %v7976_v34  ;;  %v2605_v44 = vpop.f32.mrf.mxu2  ;;  %v8255_v34 = vld [vmem:[%s15256_s7 + $0x510] sm:$0xf] }
 0x27a   :  { %5721 = vmatpush.bf16.msra.mxu2 %v7780_v52  ;;  %v943_v52 = vperm.slane %v12851_v23, 7  ;;  %v2620_v54 = vpop.f32.mrf.mxu3  ;;  %5697 = vmatpush.bf16.msra.mxu0 %v9064_v38  ;;  %v8256_v38 = vor.u32 %v9890_v35, %v8255_v34  ;;  %v8143_v34 = vld [vmem:[%s15256_s7 + $0x430] sm:$0xf]  ;;  %v9862_v35 = vld [vmem:[%s15256_s7 + $0x448] sm:$0xf0] }
 0x27c   :  { %5736 = vmatpush.bf16.msra.mxu3 %v7948_v1  ;;  %v2644_v23 = vpop.f32.mrf.mxu1  ;;  %v2606_v62 = vadd.f32 %v2605_v44, %v943_v52  ;;  %v10058_v44 = vld [vmem:[%s15256_s7 + $0xa68] sm:$0xf0] }
 0x27d   :  { %5650 = vmatmul.bf16.vlgmr.msrb.gmra.mxu0 %v12671_v50  ;;  %v8928_v54 = vor.u32 %v10058_v44, %v8927_v40  ;;  %v8535_v40 = vld [vmem:[%s15256_s7 + $0x740] sm:$0xf]  ;;  %v10030_v44 = vld [vmem:[%s15256_s7 + $0x988] sm:$0xf0] }
 0x27e   :  { %5722 = vmatpush.bf16.msra.mxu2 %v7752_v4  ;;  %v7612_v4 = vor.u32 %v9729_v59, %v7611_v58  ;;  %5698 = vmatpush.bf16.msra.mxu0 %v9036_v20  ;;  %v2619_v6 = vadd.f32 %v2618_v27, %v2606_v62  ;;  %v10166_v27 = vld [vmem:[%s15256_s7 + $0xdcc] sm:$0xf]  ;;  %v8619_v20 = vld [vmem:[%s15256_s7 + $0x7e8] sm:$0xf]  ;;  %v10051_v58 = vld [vmem:[%s15256_s7 + $0xa30] sm:$0xf0]  ;;  %v8228_v59 = vor.u32 %v9883_v49, %v8227_v48 }
 0x27f   :  { %v9372_v10 = vor.u32 %v10166_v27, %v9369_v32  ;;  %v9876_v62 = vld [vmem:[%s15256_s7 + $0x4b8] sm:$0xf0]  ;;  %v8900_v46 = vor.u32 %v10051_v58, %v8899_v56  ;;  %v10138_v32 = vld [vmem:[%s15256_s7 + $0xcec] sm:$0xf]  ;;  %v9229_v48 = vld [vmem:[%s15256_s7 + $0xccc] sm:$0xf0] }
 0x280   :  { %5737 = vmatpush.bf16.msra.mxu3 %v7920_v29  ;;  %v2607_v3 = vpop.f32.mrf.mxu2  ;;  %v9981_v29 = vld [vmem:[%s15256_s7 + $0x800] sm:$0xf0]  ;;  %v8200_v7 = vor.u32 %v9876_v62, %v8199_v61  ;;  %v8115_v49 = vld [vmem:[%s15256_s7 + $0x3f8] sm:$0xf]  ;;  %v10023_v58 = vld [vmem:[%s15256_s7 + $0x950] sm:$0xf0] }
 0x281   :  { %v8620_v60 = vor.u32 %v9981_v29, %v8619_v20  ;;  %v8591_v3 = vld [vmem:[%s15256_s7 + $0x7b0] sm:$0xf]  ;;  %v8507_v20 = vld [vmem:[%s15256_s7 + $0x708] sm:$0xf]  ;;  %v9953_v29 = vld [vmem:[%s15256_s7 + $0x720] sm:$0xf0] }
 0x282   :  { %5723 = vmatpush.bf16.msra.mxu2 %v7724_v16  ;;  %v2631_v15 = vpop.f32.mrf.mxu0  ;;  %5699 = vmatpush.bf16.msra.mxu0 %v9008_v5  ;;  %v9974_v5 = vld [vmem:[%s15256_s7 + $0x7c8] sm:$0xf0]  ;;  %v8787_v56 = vld [vmem:[%s15256_s7 + $0x938] sm:$0xf]  ;;  %v8508_v62 = vor.u32 %v9953_v29, %v8507_v20  ;;  %v9824_v20 = vld [vmem:[%s15256_s7 + $0x31c] sm:$0xf] }
 0x283   :  { %v2632_v16 = vadd.f32 %v2631_v15, %v2619_v6  ;;  %v8592_v6 = vor.u32 %v9974_v5, %v8591_v3  ;;  %v9869_v15 = vld [vmem:[%s15256_s7 + $0x480] sm:$0xf0]  ;;  %v10124_v5 = vld [vmem:[%s15256_s7 + $0xc7c] sm:$0xf]  ;;  %v8005_v29 = vld [vmem:[%s15256_s7 + $0x334] sm:$0xf0] }
 0x284   :  { %5738 = vmatpush.bf16.msra.mxu3 %v7892_v24  ;;  %v2646_v14 = vpop.f32.mrf.mxu1 }
 0x285   :  { %v10037_v14 = vld [vmem:[%s15256_s7 + $0x9c0] sm:$0xf0] }
 0x286   :  { %5724 = vmatpush.bf16.msra.mxu2 %v7696_v31  ;;  %v2645_v31 = vadd.f32 %v2644_v23, %v2632_v16  ;;  %5700 = vmatpush.bf16.msra.mxu0 %v8980_v17  ;;  %v10152_v23 = vld [vmem:[%s15256_s7 + $0xd5c] sm:$0xf]  ;;  %v9285_v17 = vld [vmem:[%s15256_s7 + $0xd3c] sm:$0xf0]  ;;  %v8844_v39 = vor.u32 %v10037_v14, %v8843_v19 }
 0x287   :  { %v9288_v27 = vor.u32 %v10145_v12, %v9285_v17  ;;  %v8059_v17 = vld [vmem:[%s15256_s7 + $0x388] sm:$0xf] }
 0x288   :  { %vm2655_vm15 = vcmp.gt.f32.partialorder %v2645_v31, 0.0  ;;  %v2663_v41 = vmul.f32 0.2, %v2645_v31  ;;  %5739 = vmatpush.bf16.msra.mxu3 %v7864_v18  ;;  %v8563_v18 = vld [vmem:[%s15256_s7 + $0x778] sm:$0xf] }
 0x28a   :  { %5725 = vmatpush.bf16.msra.mxu2 %v7668_v43  ;;  %v7836_v43 = vor.u32 %v9785_v28, %v7835_v25  ;;  %v2671_v1 = vsel %vm2655_vm15, %v2645_v31, %v2663_v41  ;;  %v2633_v52 = vpop.f32.mrf.mxu0  ;;  %5701 = vmatpush.bf16.msra.mxu0 %v8952_v42  ;;  %v8172_v25 = vor.u32 %v9869_v15, %v8171_v13  ;;  %v9960_v41 = vld [vmem:[%s15256_s7 + $0x758] sm:$0xf0]  ;;  %v10117_v13 = vld [vmem:[%s15256_s7 + $0xc44] sm:$0xf]  ;;  %v9173_v15 = vld [vmem:[%s15256_s7 + $0xc5c] sm:$0xf0] }
 0x28b   :  { %v13280_v51 = vpack.c.bf16 %v2671_v1, %v2671_v1  ;;  %v8564_v31 = vor.u32 %v9967_v26, %v8563_v18  ;;  %v8144_v1 = vor.u32 %v9862_v35, %v8143_v34  ;;  %v9855_v52 = vld [vmem:[%s15256_s7 + $0x410] sm:$0xf0]  ;;  %v9841_v18 = vld [vmem:[%s15256_s7 + $0x3a0] sm:$0xf0]  ;;  %v8731_v26 = vld [vmem:[%s15256_s7 + $0x8c8] sm:$0xf] }
 0x28c   :  { %5740 = vmatpush.bf16.msra.mxu3 %v7836_v43  ;;  %v8815_v43 = vld [vmem:[%s15256_s7 + $0x970] sm:$0xf]  ;;  %v9946_v34 = vld [vmem:[%s15256_s7 + $0x6e8] sm:$0xf0]  ;;  %v9761_v35 = vld [vmem:[%s15256_s7 + $0x124] sm:$0xf] }
 0x28d   :  { %5611 = vmatmul.bf16.vlgmr.msra.gmra.mxu1 %v13280_v51  ;;  %5702 = vmatmul.bf16.vlgmr.msra.gmra.mxu0 %v13123_v9 }
 0x28e   :  { %5726 = vmatpush.bf16.msra.mxu2 %v7640_v55  ;;  %v9341_v55 = vld [vmem:[%s15256_s7 + $0xdac] sm:$0xf0]  ;;  %5746 = vmatpush.bf16.msrb.mxu0 %v8256_v38 }
 0x28f   :  { %5707 = vmatpush.bf16.msra.mxu1 %v9372_v10  ;;  %v9344_v37 = vor.u32 %v10159_v47, %v9341_v55  ;;  %5741 = vmatmul.bf16.vlgmr.msra.gmra.mxu3 %v12530_v30  ;;  %v10131_v10 = vld [vmem:[%s15256_s7 + $0xcb4] sm:$0xf]  ;;  %v8536_v47 = vor.u32 %v9960_v41, %v8535_v40  ;;  %v8816_v55 = vor.u32 %v10030_v44, %v8815_v43  ;;  %v8033_v41 = vld [vmem:[%s15256_s7 + $0x36c] sm:$0xf0] }
 0x290   :  { %5785 = vmatpush.bf16.msrb.mxu3 %v8928_v54  ;;  %v9232_v61 = vor.u32 %v10131_v10, %v9229_v48  ;;  %v9831_v40 = vld [vmem:[%s15256_s7 + $0x354] sm:$0xf] }
 0x291   :  { %v10107_v10 = vld [vmem:[%s15256_s7 + $0xbf0] sm:$0xf0]  ;;  %v8036_v48 = vor.u32 %v9831_v40, %v8033_v41 }
 0x292   :  { %5727 = vmatpush.bf16.msra.mxu2 %v7612_v4  ;;  %v9313_v4 = vld [vmem:[%s15256_s7 + $0xd74] sm:$0xf0]  ;;  %v5534_v24 = vpop.f32.mrf.mxu3  ;;  %5747 = vmatpush.bf16.msrb.mxu0 %v8228_v59  ;;  %v9775_v59 = vld [vmem:[%s15256_s7 + $0x194] sm:$0xf] }
 0x293   :  { %5708 = vmatpush.bf16.msra.mxu1 %v9344_v37  ;;  %v9316_v11 = vor.u32 %v10152_v23, %v9313_v4  ;;  %v7809_v23 = vld [vmem:[%s15256_s7 + $0x1ac] sm:$0xf0]  ;;  %v8788_v4 = vor.u32 %v10023_v58, %v8787_v56 }
 0x294   :  { %5786 = vmatpush.bf16.msrb.mxu3 %v8900_v46  ;;  %v9848_v46 = vld [vmem:[%s15256_s7 + $0x3d8] sm:$0xf0]  ;;  %v7812_v3 = vor.u32 %v9775_v59, %v7809_v23  ;;  %v9095_v59 = vld [vmem:[%s15256_s7 + $0xba0] sm:$0xf] }
 0x295   :  { %5728 = vmatmul.bf16.vlgmr.msra.gmra.mxu2 %v12569_v57  ;;  %v8088_v12 = vor.u32 %v9848_v46, %v8087_v2  ;;  %v10100_v23 = vld [vmem:[%s15256_s7 + $0xbb8] sm:$0xf0]  ;;  %v9747_v2 = vld [vmem:[%s15256_s7 + $0xb4] sm:$0xf]  ;;  %v7697_v46 = vld [vmem:[%s15256_s7 + $0xcc] sm:$0xf0] }
 0x296   :  { %5772 = vmatpush.bf16.msrb.mxu2 %v8704_v0  ;;  %v10044_v0 = vld [vmem:[%s15256_s7 + $0x9f8] sm:$0xf0]  ;;  %5748 = vmatpush.bf16.msrb.mxu0 %v8200_v7 }
 0x297   :  { %v8872_v16 = vor.u32 %v10044_v0, %v8871_v63  ;;  %5709 = vmatpush.bf16.msra.mxu1 %v9316_v11  ;;  %v8759_v63 = vld [vmem:[%s15256_s7 + $0x900] sm:$0xf]  ;;  %v10016_v7 = vld [vmem:[%s15256_s7 + $0x918] sm:$0xf0]  ;;  %v7781_v11 = vld [vmem:[%s15256_s7 + $0x174] sm:$0xf0] }
 0x298   :  { %v8760_v14 = vor.u32 %v10016_v7, %v8759_v63  ;;  %v9067_v63 = vld [vmem:[%s15256_s7 + $0xb68] sm:$0xf]  ;;  %v7700_v7 = vor.u32 %v9747_v2, %v7697_v46 }
 0x299   :  { %5787 = vmatpush.bf16.msrb.mxu3 %v8872_v16 }
 0x29a   :  { %5773 = vmatpush.bf16.msrb.mxu2 %v8676_v21  ;;  %v5521_v21 = vpop.f32.mrf.mxu2  ;;  %v5536_v42 = vpop.f32.mrf.mxu3  ;;  %5749 = vmatpush.bf16.msrb.mxu0 %v8172_v25  ;;  %v10009_v25 = vld [vmem:[%s15256_s7 + $0x8e0] sm:$0xf0] }
 0x29b   :  { %v5522_v28 = vadd.f32 %v5521_v21, %v3194_v8  ;;  %5710 = vmatpush.bf16.msra.mxu1 %v9288_v27  ;;  %v9768_v8 = vld [vmem:[%s15256_s7 + $0x15c] sm:$0xf]  ;;  %v10114_v27 = vld [vmem:[%s15256_s7 + $0xc28] sm:$0xf0]  ;;  %v9176_v42 = vor.u32 %v10117_v13, %v9173_v15  ;;  %v8732_v44 = vor.u32 %v10009_v25, %v8731_v26  ;;  %v7669_v13 = vld [vmem:[%s15256_s7 + $0x94] sm:$0xf0] }
 0x29c   :  { %v5560_v54 = vpop.f32.mrf.mxu1  ;;  %v7784_v21 = vor.u32 %v9768_v8, %v7781_v11  ;;  %v8395_v11 = vld [vmem:[%s15256_s7 + $0x628] sm:$0xf]  ;;  %v9810_v15 = vld [vmem:[%s15256_s7 + $0x2ac] sm:$0xf]  ;;  %v9039_v26 = vld [vmem:[%s15256_s7 + $0xb30] sm:$0xf] }
 0x29d   :  { %v5535_v38 = vadd.f32 %v5534_v24, %v5522_v28  ;;  %5788 = vmatpush.bf16.msrb.mxu3 %v8844_v39  ;;  %5663 = vmatmul.bf16.vlgmr.msrb.gmra.mxu1 %v12649_v36  ;;  %v9201_v24 = vld [vmem:[%s15256_s7 + $0xc94] sm:$0xf0]  ;;  %v9151_v28 = vld [vmem:[%s15256_s7 + $0xc10] sm:$0xf]  ;;  %v8060_v39 = vor.u32 %v9841_v18, %v8059_v17 }
 0x29e   :  { %5774 = vmatpush.bf16.msrb.mxu2 %v8648_v45  ;;  %v9260_v45 = vor.u32 %v10138_v32, %v9257_v53  ;;  %5750 = vmatpush.bf16.msrb.mxu0 %v8144_v1  ;;  %v9204_v16 = vor.u32 %v10124_v5, %v9201_v24  ;;  %v8479_v32 = vld [vmem:[%s15256_s7 + $0x6d0] sm:$0xf]  ;;  %v7753_v53 = vld [vmem:[%s15256_s7 + $0x13c] sm:$0xf0]  ;;  %v9152_v43 = vor.u32 %v10114_v27, %v9151_v28  ;;  %v9123_v1 = vld [vmem:[%s15256_s7 + $0xbd8] sm:$0xf] }
 0x29f   :  { %v9124_v56 = vor.u32 %v10107_v10, %v9123_v1  ;;  %v9096_v5 = vor.u32 %v10100_v23, %v9095_v59  ;;  %v8367_v25 = vld [vmem:[%s15256_s7 + $0x5f0] sm:$0xf]  ;;  %v9918_v28 = vld [vmem:[%s15256_s7 + $0x608] sm:$0xf0]  ;;  %v9733_v27 = vld [vmem:[%s15256_s7 + $0x44] sm:$0xf] }
 0x2a0   :  { %5711 = vmatpush.bf16.msra.mxu1 %v9260_v45  ;;  %v8368_v41 = vor.u32 %v9918_v28, %v8367_v25  ;;  %v8339_v1 = vld [vmem:[%s15256_s7 + $0x5b8] sm:$0xf]  ;;  %v9726_v10 = vld [vmem:[%s15256_s7 + $0xc] sm:$0xf]  ;;  %v8311_v59 = vld [vmem:[%s15256_s7 + $0x580] sm:$0xf] }
 0x2a1   :  { %5789 = vmatpush.bf16.msrb.mxu3 %v8816_v55  ;;  %v7725_v55 = vld [vmem:[%s15256_s7 + $0x104] sm:$0xf0]  ;;  %v9904_v23 = vld [vmem:[%s15256_s7 + $0x598] sm:$0xf0] }
 0x2a2   :  { %5775 = vmatpush.bf16.msrb.mxu2 %v8620_v60  ;;  %v5523_v37 = vpop.f32.mrf.mxu2  ;;  %v8116_v60 = vor.u32 %v9855_v52, %v8115_v49  ;;  %v5547_v0 = vpop.f32.mrf.mxu0  ;;  %v8451_v49 = vld [vmem:[%s15256_s7 + $0x698] sm:$0xf]  ;;  %v9939_v52 = vld [vmem:[%s15256_s7 + $0x6b0] sm:$0xf0] }
 0x2a3   :  { %v8452_v58 = vor.u32 %v9939_v52, %v8451_v49  ;;  %v9999_v52 = vld [vmem:[%s15256_s7 + $0x894] sm:$0xf] }
 0x2a4   :  { %5751 = vmatpush.bf16.msrb.mxu0 %v8116_v60  ;;  %5712 = vmatpush.bf16.msra.mxu1 %v9232_v61  ;;  %v5562_v19 = vpop.f32.mrf.mxu1  ;;  %v8008_v60 = vor.u32 %v9824_v20, %v8005_v29  ;;  %v8423_v61 = vld [vmem:[%s15256_s7 + $0x660] sm:$0xf]  ;;  %v10072_v29 = vld [vmem:[%s15256_s7 + $0xad8] sm:$0xf0] }
 0x2a5   :  { %5790 = vmatpush.bf16.msrb.mxu3 %v8788_v4  ;;  %v9817_v4 = vld [vmem:[%s15256_s7 + $0x2e4] sm:$0xf]  ;;  %v10086_v19 = vld [vmem:[%s15256_s7 + $0xb48] sm:$0xf0]  ;;  %v8983_v20 = vld [vmem:[%s15256_s7 + $0xac0] sm:$0xf] }
 0x2a6   :  { %5776 = vmatpush.bf16.msrb.mxu2 %v8592_v6  ;;  %v5548_v6 = vadd.f32 %v5547_v0, %v5535_v38  ;;  %v8480_v38 = vor.u32 %v9946_v34, %v8479_v32  ;;  %v10093_v0 = vld [vmem:[%s15256_s7 + $0xb80] sm:$0xf0]  ;;  %v7641_v32 = vld [vmem:[%s15256_s7 + $0x5c] sm:$0xf0]  ;;  %v9803_v34 = vld [vmem:[%s15256_s7 + $0x274] sm:$0xf]  ;;  %v8984_v46 = vor.u32 %v10072_v29, %v8983_v20 }
 0x2a7   :  { %v9068_v17 = vor.u32 %v10093_v0, %v9067_v63  ;;  %v8955_v63 = vld [vmem:[%s15256_s7 + $0xa88] sm:$0xf]  ;;  %v10065_v0 = vld [vmem:[%s15256_s7 + $0xaa0] sm:$0xf0]  ;;  %v8873_v29 = vld [vmem:[%s15256_s7 + $0x9fc] sm:$0xf0] }
 0x2a8   :  { %5752 = vmatpush.bf16.msrb.mxu0 %v8088_v12  ;;  %5713 = vmatpush.bf16.msra.mxu1 %v9204_v16  ;;  %v9740_v12 = vld [vmem:[%s15256_s7 + $0x7c] sm:$0xf]  ;;  %v7949_v16 = vld [vmem:[%s15256_s7 + $0x2c4] sm:$0xf0]  ;;  %v10041_v20 = vld [vmem:[%s15256_s7 + $0x9e4] sm:$0xf] }
 0x2a9   :  { %5791 = vmatpush.bf16.msrb.mxu3 %v8760_v14  ;;  %v7672_v14 = vor.u32 %v9740_v12, %v7669_v13  ;;  %v8257_v12 = vld [vmem:[%s15256_s7 + $0x52c] sm:$0xf0] }
 0x2aa   :  { %5777 = vmatpush.bf16.msrb.mxu2 %v8564_v31  ;;  %v13454_v31 = vadd.f32 %v5560_v54, %v5548_v6  ;;  %v5549_v45 = vpop.f32.mrf.mxu0  ;;  %v9754_v54 = vld [vmem:[%s15256_s7 + $0xec] sm:$0xf]  ;;  %v9925_v6 = vld [vmem:[%s15256_s7 + $0x640] sm:$0xf0] }
 0x2ab   :  { %v7728_v37 = vor.u32 %v9754_v54, %v7725_v55  ;;  %v8396_v18 = vor.u32 %v9925_v6, %v8395_v11  ;;  %v7613_v45 = vld [vmem:[%s15256_s7 + $0x24] sm:$0xf0]  ;;  %v8705_v54 = vld [vmem:[%s15256_s7 + $0x8ac] sm:$0xf0]  ;;  %v9887_v6 = vld [vmem:[%s15256_s7 + $0x514] sm:$0xf] }
 0x2ac   :  { %5753 = vmatpush.bf16.msrb.mxu0 %v8060_v39  ;;  %5714 = vmatpush.bf16.msra.mxu1 %v9176_v42  ;;  %v9011_v42 = vld [vmem:[%s15256_s7 + $0xaf8] sm:$0xf]  ;;  %v7837_v11 = vld [vmem:[%s15256_s7 + $0x1e4] sm:$0xf0]  ;;  %v8260_v25 = vor.u32 %v9887_v6, %v8257_v12  ;;  %v9263_v6 = vld [vmem:[%s15256_s7 + $0xcf0] sm:$0xf] }
 0x2ad   :  { %5792 = vmatpush.bf16.msrb.mxu3 %v8732_v44  ;;  %v7644_v44 = vor.u32 %v9733_v27, %v7641_v32  ;;  %v9880_v32 = vld [vmem:[%s15256_s7 + $0x4dc] sm:$0xf]  ;;  %v10142_v12 = vld [vmem:[%s15256_s7 + $0xd08] sm:$0xf0] }
 0x2ae   :  { %5778 = vmatpush.bf16.msrb.mxu2 %v8536_v47  ;;  %v7756_v47 = vor.u32 %v9761_v35, %v7753_v53  ;;  %v7921_v35 = vld [vmem:[%s15256_s7 + $0x28c] sm:$0xf0]  ;;  %v9040_v53 = vor.u32 %v10086_v19, %v9039_v26  ;;  %v8649_v26 = vld [vmem:[%s15256_s7 + $0x83c] sm:$0xf0]  ;;  %v10055_v19 = vld [vmem:[%s15256_s7 + $0xa54] sm:$0xf] }
 0x2af   :  { %5754 = vmatmul.bf16.vlgmr.msrb.gmra.mxu0 %v12671_v50  ;;  %5715 = vmatmul.bf16.vlgmr.msra.gmra.mxu1 %v13280_v51 }
 0x2b0   :  { %5798 = vmatpush.bf16.msra.mxu0 %v9152_v43  ;;  %5759 = vmatpush.bf16.msrb.mxu1 %v8480_v38  ;;  %v10079_v43 = vld [vmem:[%s15256_s7 + $0xb10] sm:$0xf0]  ;;  %v7924_v38 = vor.u32 %v9803_v34, %v7921_v35  ;;  %v8229_v34 = vld [vmem:[%s15256_s7 + $0x4f4] sm:$0xf0] }
 0x2b1   :  { %5837 = vmatpush.bf16.msra.mxu3 %v8036_v48  ;;  %v7893_v48 = vld [vmem:[%s15256_s7 + $0x254] sm:$0xf0]  ;;  %v9012_v49 = vor.u32 %v10079_v43, %v9011_v42  ;;  %v9978_v42 = vld [vmem:[%s15256_s7 + $0x7ec] sm:$0xf]  ;;  %v8621_v43 = vld [vmem:[%s15256_s7 + $0x804] sm:$0xf0] }
 0x2b2   :  { %5779 = vmatpush.bf16.msrb.mxu2 %v8508_v62  ;;  %v9932_v62 = vld [vmem:[%s15256_s7 + $0x678] sm:$0xf0]  ;;  %5793 = vmatmul.bf16.vlgmr.msrb.gmra.mxu3 %v12955_v33 }
 0x2b3   :  { %v8424_v24 = vor.u32 %v9932_v62, %v8423_v61  ;;  %v7865_v61 = vld [vmem:[%s15256_s7 + $0x21c] sm:$0xf0]  ;;  %v9992_v62 = vld [vmem:[%s15256_s7 + $0x85c] sm:$0xf] }
 0x2b4   :  { %5799 = vmatpush.bf16.msra.mxu0 %v9124_v56  ;;  %5760 = vmatpush.bf16.msrb.mxu1 %v8452_v58  ;;  %v7616_v56 = vor.u32 %v9726_v10, %v7613_v45  ;;  %v9873_v10 = vld [vmem:[%s15256_s7 + $0x4a4] sm:$0xf]  ;;  %v8201_v45 = vld [vmem:[%s15256_s7 + $0x4bc] sm:$0xf0] }
 0x2b5   :  { %5780 = vmatmul.bf16.vlgmr.msrb.gmra.mxu2 %v12759_v22  ;;  %5838 = vmatpush.bf16.msra.mxu3 %v8008_v60  ;;  %v9789_v60 = vld [vmem:[%s15256_s7 + $0x204] sm:$0xf] }
 0x2b6   :  { %5824 = vmatpush.bf16.msra.mxu2 %v7812_v3  ;;  %v7977_v3 = vld [vmem:[%s15256_s7 + $0x2fc] sm:$0xf0] }
 0x2b7   :  { %v7980_v8 = vor.u32 %v9817_v4, %v7977_v3  ;;  %v8677_v4 = vld [vmem:[%s15256_s7 + $0x874] sm:$0xf0]  ;;  %v8283_v3 = vld [vmem:[%s15256_s7 + $0x548] sm:$0xf] }
 0x2b8   :  { %5800 = vmatpush.bf16.msra.mxu0 %v9096_v5  ;;  %5761 = vmatpush.bf16.msrb.mxu1 %v8424_v24  ;;  %v5573_v39 = vpop.f32.mrf.mxu2  ;;  %v9897_v5 = vld [vmem:[%s15256_s7 + $0x560] sm:$0xf0]  ;;  %v8312_v24 = vor.u32 %v9904_v23, %v8311_v59  ;;  %v8680_v13 = vor.u32 %v9992_v62, %v8677_v4  ;;  %v9866_v59 = vld [vmem:[%s15256_s7 + $0x46c] sm:$0xf]  ;;  %v8173_v23 = vld [vmem:[%s15256_s7 + $0x484] sm:$0xf0] }
 0x2b9   :  { %5839 = vmatpush.bf16.msra.mxu3 %v7980_v8  ;;  %v13575_v40 = vadd.f32 %v5573_v39, %v13454_v31  ;;  %v9911_v31 = vld [vmem:[%s15256_s7 + $0x5d0] sm:$0xf0]  ;;  %v7868_v8 = vor.u32 %v9789_v60, %v7865_v61  ;;  %v8876_v60 = vor.u32 %v10041_v20, %v8873_v29  ;;  %v9291_v61 = vld [vmem:[%s15256_s7 + $0xd28] sm:$0xf]  ;;  %v10149_v62 = vld [vmem:[%s15256_s7 + $0xd40] sm:$0xf0] }
 0x2ba   :  { %5825 = vmatpush.bf16.msra.mxu2 %v7784_v21  ;;  %v7952_v21 = vor.u32 %v9810_v15, %v7949_v16  ;;  %v8340_v55 = vor.u32 %v9911_v31, %v8339_v1  ;;  %v9375_v15 = vld [vmem:[%s15256_s7 + $0xdd0] sm:$0xf]  ;;  %v10170_v16 = vld [vmem:[%s15256_s7 + $0xde8] sm:$0xf0]  ;;  %v8232_v1 = vor.u32 %v9880_v32, %v8229_v34  ;;  %v9235_v32 = vld [vmem:[%s15256_s7 + $0xcb8] sm:$0xf] }
 0x2bb   :  { %v9376_v27 = vor.u32 %v10170_v16, %v9375_v15  ;;  %v10034_v4 = vld [vmem:[%s15256_s7 + $0x9ac] sm:$0xf]  ;;  %v8537_v15 = vld [vmem:[%s15256_s7 + $0x75c] sm:$0xf0]  ;;  %v10027_v16 = vld [vmem:[%s15256_s7 + $0x974] sm:$0xf] }
 0x2bc   :  { %5801 = vmatpush.bf16.msra.mxu0 %v9068_v17  ;;  %5762 = vmatpush.bf16.msrb.mxu1 %v8396_v18  ;;  %v9985_v17 = vld [vmem:[%s15256_s7 + $0x824] sm:$0xf]  ;;  %v8956_v18 = vor.u32 %v10065_v0, %v8955_v63  ;;  %v9292_v63 = vor.u32 %v10149_v62, %v9291_v61  ;;  %v9859_v0 = vld [vmem:[%s15256_s7 + $0x434] sm:$0xf]  ;;  %v9772_v29 = vld [vmem:[%s15256_s7 + $0x178] sm:$0xf0] }
 0x2bd   :  { %5840 = vmatpush.bf16.msra.mxu3 %v7952_v21  ;;  %v8284_v21 = vor.u32 %v9897_v5, %v8283_v3  ;;  %v8652_v35 = vor.u32 %v9985_v17, %v8649_v26  ;;  %v8845_v3 = vld [vmem:[%s15256_s7 + $0x9c4] sm:$0xf0]  ;;  %v8817_v17 = vld [vmem:[%s15256_s7 + $0x98c] sm:$0xf0]  ;;  %v10135_v34 = vld [vmem:[%s15256_s7 + $0xcd0] sm:$0xf0] }
 0x2be   :  { %5826 = vmatpush.bf16.msra.mxu2 %v7756_v47  ;;  %v9796_v47 = vld [vmem:[%s15256_s7 + $0x23c] sm:$0xf]  ;;  %v10006_v61 = vld [vmem:[%s15256_s7 + $0x8cc] sm:$0xf] }
 0x2bf   :  { %v7896_v58 = vor.u32 %v9796_v47, %v7893_v48  ;;  %v8624_v47 = vor.u32 %v9978_v42, %v8621_v43  ;;  %v7815_v43 = vld [vmem:[%s15256_s7 + $0x198] sm:$0xf] }
 0x2c0   :  { %5802 = vmatpush.bf16.msra.mxu0 %v9040_v53  ;;  %5763 = vmatpush.bf16.msrb.mxu1 %v8368_v41  ;;  %v5575_v2 = vpop.f32.mrf.mxu2  ;;  %v9347_v53 = vld [vmem:[%s15256_s7 + $0xd98] sm:$0xf]  ;;  %v10163_v41 = vld [vmem:[%s15256_s7 + $0xdb0] sm:$0xf0] }
 0x2c1   :  { %5841 = vmatpush.bf16.msra.mxu3 %v7924_v38  ;;  %v8901_v38 = vld [vmem:[%s15256_s7 + $0xa34] sm:$0xf0]  ;;  %v9348_v31 = vor.u32 %v10163_v41, %v9347_v53  ;;  %v9964_v2 = vld [vmem:[%s15256_s7 + $0x77c] sm:$0xf] }
 0x2c2   :  { %5827 = vmatpush.bf16.msra.mxu2 %v7728_v37  ;;  %v8708_v37 = vor.u32 %v9999_v52, %v8705_v54  ;;  %v10156_v52 = vld [vmem:[%s15256_s7 + $0xd78] sm:$0xf0]  ;;  %v9971_v54 = vld [vmem:[%s15256_s7 + $0x7b4] sm:$0xf]  ;;  %v8789_v53 = vld [vmem:[%s15256_s7 + $0x954] sm:$0xf0] }
 0x2c4   :  { %5803 = vmatpush.bf16.msra.mxu0 %v9012_v49  ;;  %5764 = vmatpush.bf16.msrb.mxu1 %v8340_v55  ;;  %v9319_v49 = vld [vmem:[%s15256_s7 + $0xd60] sm:$0xf]  ;;  %v8593_v55 = vld [vmem:[%s15256_s7 + $0x7cc] sm:$0xf0] }
 0x2c5   :  { %5842 = vmatpush.bf16.msra.mxu3 %v7896_v58  ;;  %v9320_v58 = vor.u32 %v10156_v52, %v9319_v49  ;;  %v10013_v52 = vld [vmem:[%s15256_s7 + $0x904] sm:$0xf] }
 0x2c6   :  { %5828 = vmatpush.bf16.msra.mxu2 %v7700_v7  ;;  %v9782_v7 = vld [vmem:[%s15256_s7 + $0x1cc] sm:$0xf] }
 0x2c7   :  { %v7840_v28 = vor.u32 %v9782_v7, %v7837_v11  ;;  %v8145_v7 = vld [vmem:[%s15256_s7 + $0x44c] sm:$0xf0]  ;;  %v8848_v11 = vor.u32 %v10034_v4, %v8845_v3 }
 0x2c8   :  { %5804 = vmatpush.bf16.msra.mxu0 %v8984_v46  ;;  %5765 = vmatpush.bf16.msrb.mxu1 %v8312_v24  ;;  %v8565_v46 = vld [vmem:[%s15256_s7 + $0x794] sm:$0xf0]  ;;  %v8176_v24 = vor.u32 %v9866_v59, %v8173_v23  ;;  %v9153_v4 = vld [vmem:[%s15256_s7 + $0xc2c] sm:$0xf0] }
 0x2c9   :  { %5843 = vmatpush.bf16.msra.mxu3 %v7868_v8  ;;  %v8568_v8 = vor.u32 %v9964_v2, %v8565_v46  ;;  %v8733_v2 = vld [vmem:[%s15256_s7 + $0x8e4] sm:$0xf0]  ;;  %v10111_v46 = vld [vmem:[%s15256_s7 + $0xc14] sm:$0xf] }
 0x2ca   :  { %5829 = vmatpush.bf16.msra.mxu2 %v7672_v14  ;;  %v8929_v14 = vld [vmem:[%s15256_s7 + $0xa6c] sm:$0xf0] }
 0x2cb   :  { %v8932_v39 = vor.u32 %v10055_v19, %v8929_v14  ;;  %v9264_v19 = vor.u32 %v10142_v12, %v9263_v6  ;;  %v9852_v14 = vld [vmem:[%s15256_s7 + $0x3fc] sm:$0xf]  ;;  %v9835_v6 = vld [vmem:[%s15256_s7 + $0x370] sm:$0xf0] }
 0x2cc   :  { %5805 = vmatpush.bf16.msra.mxu0 %v8956_v18  ;;  %5766 = vmatpush.bf16.msrb.mxu1 %v8284_v21  ;;  %v8148_v18 = vor.u32 %v9859_v0, %v8145_v7  ;;  %v8117_v21 = vld [vmem:[%s15256_s7 + $0x414] sm:$0xf0]  ;;  %v7759_v0 = vld [vmem:[%s15256_s7 + $0x128] sm:$0xf] }
 0x2cd   :  { %5844 = vmatpush.bf16.msra.mxu3 %v7840_v28  ;;  %v8120_v42 = vor.u32 %v9852_v14, %v8117_v21  ;;  %v9936_v14 = vld [vmem:[%s15256_s7 + $0x69c] sm:$0xf]  ;;  %v8453_v21 = vld [vmem:[%s15256_s7 + $0x6b4] sm:$0xf0] }
 0x2ce   :  { %5830 = vmatpush.bf16.msra.mxu2 %v7644_v44  ;;  %v10048_v44 = vld [vmem:[%s15256_s7 + $0xa1c] sm:$0xf] }
 0x2cf   :  { %v8904_v48 = vor.u32 %v10048_v44, %v8901_v38  ;;  %5767 = vmatmul.bf16.vlgmr.msrb.gmra.mxu1 %v12649_v36  ;;  %5806 = vmatmul.bf16.vlgmr.msra.gmra.mxu0 %v13123_v9  ;;  %v9779_v44 = vld [vmem:[%s15256_s7 + $0x1b0] sm:$0xf0]  ;;  %v9236_v38 = vor.u32 %v10135_v34, %v9235_v32  ;;  %v8011_v32 = vld [vmem:[%s15256_s7 + $0x320] sm:$0xf]  ;;  %v9828_v34 = vld [vmem:[%s15256_s7 + $0x338] sm:$0xf0] }
 0x2d0   :  { %5850 = vmatpush.bf16.msrb.mxu0 %v8260_v25  ;;  %5811 = vmatpush.bf16.msra.mxu1 %v9376_v27  ;;  %v5586_v26 = vpop.f32.mrf.mxu3  ;;  %v8820_v27 = vor.u32 %v10027_v16, %v8817_v17  ;;  %v7816_v49 = vor.u32 %v9779_v44, %v7815_v43  ;;  %v10104_v17 = vld [vmem:[%s15256_s7 + $0xbdc] sm:$0xf]  ;;  %v8012_v43 = vor.u32 %v9828_v34, %v8011_v32  ;;  %v9929_v44 = vld [vmem:[%s15256_s7 + $0x664] sm:$0xf] }
 0x2d1   :  { %5889 = vmatpush.bf16.msrb.mxu3 %v8932_v39  ;;  %v13782_v25 = vadd.f32 %v5586_v26, %v13575_v40  ;;  %v8509_v39 = vld [vmem:[%s15256_s7 + $0x724] sm:$0xf0]  ;;  %v10020_v40 = vld [vmem:[%s15256_s7 + $0x93c] sm:$0xf] }
 0x2d2   :  { %5831 = vmatpush.bf16.msra.mxu2 %v7616_v56  ;;  %5845 = vmatmul.bf16.vlgmr.msra.gmra.mxu3 %v12530_v30  ;;  %v8204_v56 = vor.u32 %v9873_v10, %v8201_v45  ;;  %v8792_v45 = vor.u32 %v10020_v40, %v8789_v53  ;;  %v8456_v40 = vor.u32 %v9936_v14, %v8453_v21  ;;  %v10097_v53 = vld [vmem:[%s15256_s7 + $0xba4] sm:$0xf]  ;;  %v7619_v14 = vld [vmem:[%s15256_s7 + $0x10] sm:$0xf]  ;;  %v9730_v21 = vld [vmem:[%s15256_s7 + $0x28] sm:$0xf0] }
 0x2d4   :  { %5851 = vmatpush.bf16.msrb.mxu0 %v8232_v1  ;;  %5812 = vmatpush.bf16.msra.mxu1 %v9348_v31  ;;  %v9845_v1 = vld [vmem:[%s15256_s7 + $0x3c4] sm:$0xf]  ;;  %v8089_v31 = vld [vmem:[%s15256_s7 + $0x3dc] sm:$0xf0] }
 0x2d5   :  { %5832 = vmatmul.bf16.vlgmr.msra.gmra.mxu2 %v12569_v57  ;;  %5890 = vmatpush.bf16.msrb.mxu3 %v8904_v48  ;;  %v10128_v48 = vld [vmem:[%s15256_s7 + $0xc98] sm:$0xf0]  ;;  %v8092_v20 = vor.u32 %v9845_v1, %v8089_v31  ;;  %v7703_v1 = vld [vmem:[%s15256_s7 + $0xb8] sm:$0xf]  ;;  %v9751_v31 = vld [vmem:[%s15256_s7 + $0xd0] sm:$0xf0] }
 0x2d6   :  { %5876 = vmatpush.bf16.msrb.mxu2 %v8708_v37  ;;  %v8596_v37 = vor.u32 %v9971_v54, %v8593_v55  ;;  %v8761_v54 = vld [vmem:[%s15256_s7 + $0x91c] sm:$0xf0] }
 0x2d7   :  { %v7787_v55 = vld [vmem:[%s15256_s7 + $0x160] sm:$0xf]  ;;  %v8764_v62 = vor.u32 %v10013_v52, %v8761_v54  ;;  %v9069_v52 = vld [vmem:[%s15256_s7 + $0xb84] sm:$0xf0]  ;;  %v7704_v54 = vor.u32 %v9751_v31, %v7703_v1  ;;  %v9901_v31 = vld [vmem:[%s15256_s7 + $0x584] sm:$0xf] }
 0x2d8   :  { %5852 = vmatpush.bf16.msrb.mxu0 %v8204_v56  ;;  %v13749_v5 = vpop.f32.mrf.mxu2  ;;  %5813 = vmatpush.bf16.msra.mxu1 %v9320_v58  ;;  %v9179_v56 = vld [vmem:[%s15256_s7 + $0xc48] sm:$0xf]  ;;  %v10121_v58 = vld [vmem:[%s15256_s7 + $0xc60] sm:$0xf0]  ;;  %v5588_v59 = vpop.f32.mrf.mxu3  ;;  %v7788_v3 = vor.u32 %v9772_v29, %v7787_v55 }
 0x2d9   :  { %5891 = vmatpush.bf16.msrb.mxu3 %v8876_v60  ;;  %v8061_v60 = vld [vmem:[%s15256_s7 + $0x3a4] sm:$0xf0]  ;;  %v9180_v12 = vor.u32 %v10121_v58, %v9179_v56  ;;  %v7675_v56 = vld [vmem:[%s15256_s7 + $0x80] sm:$0xf]  ;;  %v9744_v58 = vld [vmem:[%s15256_s7 + $0x98] sm:$0xf0] }
 0x2da   :  { %5877 = vmatpush.bf16.msrb.mxu2 %v8680_v13  ;;  %v9957_v13 = vld [vmem:[%s15256_s7 + $0x744] sm:$0xf]  ;;  %v8397_v29 = vld [vmem:[%s15256_s7 + $0x644] sm:$0xf0]  ;;  %v7955_v59 = vld [vmem:[%s15256_s7 + $0x2b0] sm:$0xf] }
 0x2db   :  { %v8540_v28 = vor.u32 %v9957_v13, %v8537_v15  ;;  %v9156_v13 = vor.u32 %v10111_v46, %v9153_v4  ;;  %v8736_v15 = vor.u32 %v10006_v61, %v8733_v2  ;;  %v10083_v46 = vld [vmem:[%s15256_s7 + $0xb34] sm:$0xf]  ;;  %v9041_v4 = vld [vmem:[%s15256_s7 + $0xb4c] sm:$0xf0] }
 0x2dc   :  { %5853 = vmatpush.bf16.msrb.mxu0 %v8176_v24  ;;  %5814 = vmatpush.bf16.msra.mxu1 %v9292_v63  ;;  %v9943_v24 = vld [vmem:[%s15256_s7 + $0x6d4] sm:$0xf]  ;;  %v8481_v63 = vld [vmem:[%s15256_s7 + $0x6ec] sm:$0xf0] }
 0x2dd   :  { %5892 = vmatpush.bf16.msrb.mxu3 %v8848_v11  ;;  %v8039_v11 = vld [vmem:[%s15256_s7 + $0x358] sm:$0xf]  ;;  %v8484_v16 = vor.u32 %v9943_v24, %v8481_v63  ;;  %v9915_v63 = vld [vmem:[%s15256_s7 + $0x5f4] sm:$0xf] }
 0x2de   :  { %5878 = vmatpush.bf16.msrb.mxu2 %v8652_v35  ;;  %v9950_v35 = vld [vmem:[%s15256_s7 + $0x70c] sm:$0xf] }
 0x2df   :  { %v8512_v10 = vor.u32 %v9950_v35, %v8509_v39 }
 0x2e0   :  { %5854 = vmatpush.bf16.msrb.mxu0 %v8148_v18  ;;  %v5627_v41 = vpop.f32.mrf.mxu2  ;;  %5815 = vmatpush.bf16.msra.mxu1 %v9264_v19  ;;  %v9125_v18 = vld [vmem:[%s15256_s7 + $0xbf4] sm:$0xf0]  ;;  %v8040_v19 = vor.u32 %v9835_v6, %v8039_v11  ;;  %v13899_v35 = vpop.f32.mrf.mxu3  ;;  %v9807_v6 = vld [vmem:[%s15256_s7 + $0x290] sm:$0xf0] }
 0x2e1   :  { %5893 = vmatpush.bf16.msrb.mxu3 %v8820_v27  ;;  %v9758_v27 = vld [vmem:[%s15256_s7 + $0x108] sm:$0xf0]  ;;  %v9128_v39 = vor.u32 %v10104_v17, %v9125_v18  ;;  %v9097_v41 = vld [vmem:[%s15256_s7 + $0xbbc] sm:$0xf0]  ;;  %v7927_v11 = vld [vmem:[%s15256_s7 + $0x278] sm:$0xf] }
 0x2e2   :  { %5879 = vmatpush.bf16.msrb.mxu2 %v8624_v47  ;;  %v9207_v47 = vld [vmem:[%s15256_s7 + $0xc80] sm:$0xf]  ;;  %v7928_v18 = vor.u32 %v9807_v6, %v7927_v11  ;;  %v10059_v11 = vld [vmem:[%s15256_s7 + $0xa70] sm:$0xf0] }
 0x2e3   :  { %v9208_v23 = vor.u32 %v10128_v48, %v9207_v47  ;;  %v9100_v47 = vor.u32 %v10097_v53, %v9097_v41  ;;  %v10003_v53 = vld [vmem:[%s15256_s7 + $0x8b0] sm:$0xf0] }
 0x2e4   :  { %5855 = vmatpush.bf16.msrb.mxu0 %v8120_v42  ;;  %5816 = vmatpush.bf16.msra.mxu1 %v9236_v38  ;;  %v8425_v38 = vld [vmem:[%s15256_s7 + $0x67c] sm:$0xf0] }
 0x2e5   :  { %5894 = vmatpush.bf16.msrb.mxu3 %v8792_v45  ;;  %v9821_v45 = vld [vmem:[%s15256_s7 + $0x300] sm:$0xf0]  ;;  %v8428_v48 = vor.u32 %v9929_v44, %v8425_v38  ;;  %v8985_v44 = vld [vmem:[%s15256_s7 + $0xadc] sm:$0xf0]  ;;  %v7620_v38 = vor.u32 %v9730_v21, %v7619_v14  ;;  %v10160_v14 = vld [vmem:[%s15256_s7 + $0xd9c] sm:$0xf] }
 0x2e6   :  { %5880 = vmatpush.bf16.msrb.mxu2 %v8596_v37  ;;  %v9838_v37 = vld [vmem:[%s15256_s7 + $0x38c] sm:$0xf]  ;;  %v9349_v21 = vld [vmem:[%s15256_s7 + $0xdb4] sm:$0xf0] }
 0x2e7   :  { %v8064_v7 = vor.u32 %v9838_v37, %v8061_v60 }
 0x2e8   :  { %5856 = vmatpush.bf16.msrb.mxu0 %v8092_v20  ;;  %5817 = vmatpush.bf16.msra.mxu1 %v9208_v23  ;;  %v9922_v20 = vld [vmem:[%s15256_s7 + $0x62c] sm:$0xf] }
 0x2e9   :  { %5895 = vmatpush.bf16.msrb.mxu3 %v8764_v62  ;;  %v9814_v23 = vld [vmem:[%s15256_s7 + $0x2c8] sm:$0xf0]  ;;  %v5640_v62 = vpop.f32.mrf.mxu3  ;;  %v8400_v2 = vor.u32 %v9922_v20, %v8397_v29  ;;  %v8285_v20 = vld [vmem:[%s15256_s7 + $0x564] sm:$0xf0] }
 0x2ea   :  { %5881 = vmatpush.bf16.msrb.mxu2 %v8568_v8  ;;  %v9765_v8 = vld [vmem:[%s15256_s7 + $0x140] sm:$0xf0]  ;;  %v13952_v37 = vpop.f32.mrf.mxu0  ;;  %v7956_v24 = vor.u32 %v9814_v23, %v7955_v59  ;;  %v7843_v59 = vld [vmem:[%s15256_s7 + $0x1d0] sm:$0xf]  ;;  %v8263_v62 = vld [vmem:[%s15256_s7 + $0x518] sm:$0xf] }
 0x2eb   :  { %v7760_v26 = vor.u32 %v9765_v8, %v7759_v0  ;;  %v8369_v0 = vld [vmem:[%s15256_s7 + $0x60c] sm:$0xf0]  ;;  %v9737_v8 = vld [vmem:[%s15256_s7 + $0x60] sm:$0xf0] }
 0x2ec   :  { %5857 = vmatpush.bf16.msrb.mxu0 %v8064_v7  ;;  %5818 = vmatpush.bf16.msra.mxu1 %v9180_v12  ;;  %v7647_v7 = vld [vmem:[%s15256_s7 + $0x48] sm:$0xf]  ;;  %v9044_v12 = vor.u32 %v10083_v46, %v9041_v4  ;;  %v10167_v4 = vld [vmem:[%s15256_s7 + $0xdd4] sm:$0xf] }
 0x2ed   :  { %5896 = vmatpush.bf16.msrb.mxu3 %v8736_v15  ;;  %v10076_v15 = vld [vmem:[%s15256_s7 + $0xafc] sm:$0xf]  ;;  %v7648_v17 = vor.u32 %v9737_v8, %v7647_v7  ;;  %v9989_v7 = vld [vmem:[%s15256_s7 + $0x840] sm:$0xf0]  ;;  %v8935_v8 = vld [vmem:[%s15256_s7 + $0xa58] sm:$0xf] }
 0x2ee   :  { %5882 = vmatpush.bf16.msrb.mxu2 %v8540_v28  ;;  %v7731_v28 = vld [vmem:[%s15256_s7 + $0xf0] sm:$0xf] }
 0x2ef   :  { %v7732_v42 = vor.u32 %v9758_v27, %v7731_v28  ;;  %5819 = vmatmul.bf16.vlgmr.msra.gmra.mxu1 %v13280_v51  ;;  %5858 = vmatmul.bf16.vlgmr.msrb.gmra.mxu0 %v12671_v50  ;;  %v7899_v28 = vld [vmem:[%s15256_s7 + $0x240] sm:$0xf]  ;;  %v9800_v27 = vld [vmem:[%s15256_s7 + $0x258] sm:$0xf0] }
 0x2f0   :  { %5902 = vmatpush.bf16.msra.mxu0 %v9156_v13  ;;  %5863 = vmatpush.bf16.msrb.mxu1 %v8484_v16  ;;  %v8372_v13 = vor.u32 %v9915_v63, %v8369_v0  ;;  %v9013_v16 = vld [vmem:[%s15256_s7 + $0xb14] sm:$0xf0]  ;;  %v7900_v1 = vor.u32 %v9800_v27, %v7899_v28  ;;  %v8627_v28 = vld [vmem:[%s15256_s7 + $0x7f0] sm:$0xf]  ;;  %v9982_v27 = vld [vmem:[%s15256_s7 + $0x808] sm:$0xf0] }
 0x2f1   :  { %5941 = vmatpush.bf16.msra.mxu3 %v8040_v19  ;;  %v8341_v19 = vld [vmem:[%s15256_s7 + $0x5d4] sm:$0xf0] }
 0x2f2   :  { %5883 = vmatpush.bf16.msrb.mxu2 %v8512_v10  ;;  %v7983_v10 = vld [vmem:[%s15256_s7 + $0x2e8] sm:$0xf]  ;;  %5897 = vmatmul.bf16.vlgmr.msrb.gmra.mxu3 %v12955_v33  ;;  %v5601_v32 = vpop.f32.mrf.mxu0  ;;  %v14010_v41 = vpop.f32.mrf.mxu3 }
 0x2f3   :  { %v7984_v55 = vor.u32 %v9821_v45, %v7983_v10  ;;  %v8313_v10 = vld [vmem:[%s15256_s7 + $0x59c] sm:$0xf0] }
 0x2f4   :  { %5903 = vmatpush.bf16.msra.mxu0 %v9128_v39  ;;  %5864 = vmatpush.bf16.msrb.mxu1 %v8456_v40  ;;  %v9016_v39 = vor.u32 %v10076_v15, %v9013_v16  ;;  %v8711_v40 = vld [vmem:[%s15256_s7 + $0x898] sm:$0xf]  ;;  %v8316_v29 = vor.u32 %v9901_v31, %v8313_v10  ;;  %v8907_v32 = vld [vmem:[%s15256_s7 + $0xa20] sm:$0xf] }
 0x2f5   :  { %5884 = vmatmul.bf16.vlgmr.msrb.gmra.mxu2 %v12759_v22  ;;  %5942 = vmatpush.bf16.msra.mxu3 %v8012_v43  ;;  %v10069_v43 = vld [vmem:[%s15256_s7 + $0xac4] sm:$0xf]  ;;  %v8712_v45 = vor.u32 %v10003_v53, %v8711_v40  ;;  %v9352_v40 = vor.u32 %v10160_v14, %v9349_v21  ;;  %v8207_v53 = vld [vmem:[%s15256_s7 + $0x4a8] sm:$0xf]  ;;  %v8599_v31 = vld [vmem:[%s15256_s7 + $0x7b8] sm:$0xf] }
 0x2f6   :  { %5928 = vmatpush.bf16.msra.mxu2 %v7816_v49  ;;  %v10090_v49 = vld [vmem:[%s15256_s7 + $0xb6c] sm:$0xf]  ;;  %v8123_v21 = vld [vmem:[%s15256_s7 + $0x400] sm:$0xf] }
 0x2f7   :  { %v9072_v61 = vor.u32 %v10090_v49, %v9069_v52  ;;  %v8683_v49 = vld [vmem:[%s15256_s7 + $0x860] sm:$0xf]  ;;  %v8988_v52 = vor.u32 %v10069_v43, %v8985_v44  ;;  %v8628_v43 = vor.u32 %v9982_v27, %v8627_v28  ;;  %v9856_v28 = vld [vmem:[%s15256_s7 + $0x418] sm:$0xf0] }
 0x2f8   :  { %5904 = vmatpush.bf16.msra.mxu0 %v9100_v47  ;;  %v13954_v60 = vpop.f32.mrf.mxu2  ;;  %5865 = vmatpush.bf16.msrb.mxu1 %v8428_v48  ;;  %v7871_v47 = vld [vmem:[%s15256_s7 + $0x208] sm:$0xf]  ;;  %v9793_v48 = vld [vmem:[%s15256_s7 + $0x220] sm:$0xf0] }
 0x2f9   :  { %5943 = vmatpush.bf16.msra.mxu3 %v7984_v55  ;;  %v9894_v55 = vld [vmem:[%s15256_s7 + $0x54c] sm:$0xf]  ;;  %v7872_v23 = vor.u32 %v9793_v48, %v7871_v47  ;;  %v8879_v47 = vld [vmem:[%s15256_s7 + $0x9e8] sm:$0xf]  ;;  %v10045_v48 = vld [vmem:[%s15256_s7 + $0xa00] sm:$0xf0] }
 0x2fa   :  { %5929 = vmatpush.bf16.msra.mxu2 %v7788_v3  ;;  %v7676_v3 = vor.u32 %v9744_v58, %v7675_v56  ;;  %v10062_v56 = vld [vmem:[%s15256_s7 + $0xa8c] sm:$0xf]  ;;  %v8957_v58 = vld [vmem:[%s15256_s7 + $0xaa4] sm:$0xf0]  ;;  %v14069_v63 = vpop.f32.mrf.mxu0  ;;  %v5692_v6 = vpop.f32.mrf.mxu3 }
 0x2fb   :  { %v8960_v0 = vor.u32 %v10062_v56, %v8957_v58  ;;  %v10146_v56 = vld [vmem:[%s15256_s7 + $0xd2c] sm:$0xf]  ;;  %v9293_v58 = vld [vmem:[%s15256_s7 + $0xd44] sm:$0xf0]  ;;  %v9265_v6 = vld [vmem:[%s15256_s7 + $0xd0c] sm:$0xf0] }
 0x2fc   :  { %5905 = vmatpush.bf16.msra.mxu0 %v9072_v61  ;;  %5866 = vmatpush.bf16.msrb.mxu1 %v8400_v2  ;;  %v9786_v61 = vld [vmem:[%s15256_s7 + $0x1e8] sm:$0xf0]  ;;  %v9891_v2 = vld [vmem:[%s15256_s7 + $0x530] sm:$0xf0] }
 0x2fd   :  { %5944 = vmatpush.bf16.msra.mxu3 %v7956_v24  ;;  %v8655_v24 = vld [vmem:[%s15256_s7 + $0x828] sm:$0xf]  ;;  %v7844_v15 = vor.u32 %v9786_v61, %v7843_v59  ;;  %v8571_v59 = vld [vmem:[%s15256_s7 + $0x780] sm:$0xf]  ;;  %v8851_v61 = vld [vmem:[%s15256_s7 + $0x9b0] sm:$0xf] }
 0x2fe   :  { %5930 = vmatpush.bf16.msra.mxu2 %v7760_v26  ;;  %v9908_v26 = vld [vmem:[%s15256_s7 + $0x5bc] sm:$0xf] }
 0x300   :  { %5906 = vmatpush.bf16.msra.mxu0 %v9044_v12  ;;  %v5679_v34 = vpop.f32.mrf.mxu2  ;;  %5867 = vmatpush.bf16.msrb.mxu1 %v8372_v13  ;;  %v8288_v12 = vor.u32 %v9894_v55, %v8285_v20  ;;  %v8264_v13 = vor.u32 %v9891_v2, %v8263_v62  ;;  %v9870_v55 = vld [vmem:[%s15256_s7 + $0x488] sm:$0xf0] }
 0x301   :  { %5945 = vmatpush.bf16.msra.mxu3 %v7928_v18  ;;  %v9884_v18 = vld [vmem:[%s15256_s7 + $0x4f8] sm:$0xf0]  ;;  %v10038_v62 = vld [vmem:[%s15256_s7 + $0x9c8] sm:$0xf0] }
 0x302   :  { %5931 = vmatpush.bf16.msra.mxu2 %v7732_v42  ;;  %v8344_v42 = vor.u32 %v9908_v26, %v8341_v19  ;;  %v8656_v26 = vor.u32 %v9989_v7, %v8655_v24  ;;  %v8936_v19 = vor.u32 %v10059_v11, %v8935_v8  ;;  %v10052_v34 = vld [vmem:[%s15256_s7 + $0xa38] sm:$0xf0]  ;;  %v5653_v10 = vpop.f32.mrf.mxu0  ;;  %v8151_v24 = vld [vmem:[%s15256_s7 + $0x438] sm:$0xf]  ;;  %v8852_v8 = vor.u32 %v10038_v62, %v8851_v61  ;;  %v10139_v11 = vld [vmem:[%s15256_s7 + $0xcf4] sm:$0xf] }
 0x303   :  { %v8908_v44 = vor.u32 %v10052_v34, %v8907_v32  ;;  %v9268_v14 = vor.u32 %v10139_v11, %v9265_v6  ;;  %v10132_v34 = vld [vmem:[%s15256_s7 + $0xcbc] sm:$0xf]  ;;  %v8767_v61 = vld [vmem:[%s15256_s7 + $0x908] sm:$0xf]  ;;  %v10017_v62 = vld [vmem:[%s15256_s7 + $0x920] sm:$0xf0] }
 0x304   :  { %5907 = vmatpush.bf16.msra.mxu0 %v9016_v39  ;;  %5868 = vmatpush.bf16.msrb.mxu1 %v8344_v42  ;;  %v9877_v42 = vld [vmem:[%s15256_s7 + $0x4c0] sm:$0xf0]  ;;  %v9842_v11 = vld [vmem:[%s15256_s7 + $0x3a8] sm:$0xf0]  ;;  %v8739_v6 = vld [vmem:[%s15256_s7 + $0x8d0] sm:$0xf] }
 0x305   :  { %5946 = vmatpush.bf16.msra.mxu3 %v7900_v1  ;;  %v9321_v1 = vld [vmem:[%s15256_s7 + $0xd7c] sm:$0xf0] }
 0x306   :  { %5932 = vmatpush.bf16.msra.mxu2 %v7704_v54  ;;  %v9996_v54 = vld [vmem:[%s15256_s7 + $0x878] sm:$0xf0] }
 0x307   :  { %v8684_v46 = vor.u32 %v9996_v54, %v8683_v49  ;;  %v8208_v49 = vor.u32 %v9877_v42, %v8207_v53  ;;  %v8179_v54 = vld [vmem:[%s15256_s7 + $0x470] sm:$0xf]  ;;  %v9954_v53 = vld [vmem:[%s15256_s7 + $0x728] sm:$0xf0]  ;;  %v8795_v42 = vld [vmem:[%s15256_s7 + $0x940] sm:$0xf] }
 0x308   :  { %5908 = vmatpush.bf16.msra.mxu0 %v8988_v52  ;;  %5869 = vmatpush.bf16.msrb.mxu1 %v8316_v29  ;;  %v8880_v29 = vor.u32 %v10045_v48, %v8879_v47  ;;  %v8095_v48 = vld [vmem:[%s15256_s7 + $0x3c8] sm:$0xf] }
 0x309   :  { %5947 = vmatpush.bf16.msra.mxu3 %v7872_v23  ;;  %v9968_v23 = vld [vmem:[%s15256_s7 + $0x798] sm:$0xf0] }
 0x30a   :  { %5933 = vmatpush.bf16.msra.mxu2 %v7676_v3  ;;  %v9377_v3 = vld [vmem:[%s15256_s7 + $0xdec] sm:$0xf0]  ;;  %v8572_v7 = vor.u32 %v9968_v23, %v8571_v59 }
 0x30b   :  { %v9380_v16 = vor.u32 %v10167_v4, %v9377_v3  ;;  %v14156_v4 = vpop.f32.mrf.mxu1  ;;  %v9296_v3 = vor.u32 %v10146_v56, %v9293_v58  ;;  %v9209_v56 = vld [vmem:[%s15256_s7 + $0xc9c] sm:$0xf0] }
 0x30c   :  { %5909 = vmatpush.bf16.msra.mxu0 %v8960_v0  ;;  %5870 = vmatpush.bf16.msrb.mxu1 %v8288_v12  ;;  %v9863_v0 = vld [vmem:[%s15256_s7 + $0x450] sm:$0xf0]  ;;  %v8543_v12 = vld [vmem:[%s15256_s7 + $0x748] sm:$0xf] }
 0x30d   :  { %5948 = vmatpush.bf16.msra.mxu3 %v7844_v15  ;;  %v9961_v15 = vld [vmem:[%s15256_s7 + $0x760] sm:$0xf0] }
 0x30e   :  { %5934 = vmatpush.bf16.msra.mxu2 %v7648_v17  ;;  %v8235_v17 = vld [vmem:[%s15256_s7 + $0x4e0] sm:$0xf]  ;;  %v8544_v27 = vor.u32 %v9961_v15, %v8543_v12  ;;  %v8768_v15 = vor.u32 %v10017_v62, %v8767_v61  ;;  %v8431_v62 = vld [vmem:[%s15256_s7 + $0x668] sm:$0xf] }
 0x30f   :  { %v8236_v39 = vor.u32 %v9884_v18, %v8235_v17  ;;  %5871 = vmatmul.bf16.vlgmr.msrb.gmra.mxu1 %v12649_v36  ;;  %5910 = vmatmul.bf16.vlgmr.msra.gmra.mxu0 %v13123_v9  ;;  %v10031_v17 = vld [vmem:[%s15256_s7 + $0x990] sm:$0xf0]  ;;  %v8152_v18 = vor.u32 %v9863_v0, %v8151_v24  ;;  %v10118_v24 = vld [vmem:[%s15256_s7 + $0xc4c] sm:$0xf]  ;;  %v9181_v0 = vld [vmem:[%s15256_s7 + $0xc64] sm:$0xf0] }
 0x310   :  { %5954 = vmatpush.bf16.msrb.mxu0 %v8264_v13  ;;  %5915 = vmatpush.bf16.msra.mxu1 %v9380_v16  ;;  %v14173_v13 = vpop.f32.mrf.mxu0  ;;  %v8823_v16 = vld [vmem:[%s15256_s7 + $0x978] sm:$0xf] }
 0x311   :  { %5993 = vmatpush.bf16.msrb.mxu3 %v8936_v19  ;;  %v8824_v32 = vor.u32 %v10031_v17, %v8823_v16  ;;  %v10010_v16 = vld [vmem:[%s15256_s7 + $0x8e8] sm:$0xf0]  ;;  %v9159_v17 = vld [vmem:[%s15256_s7 + $0xc18] sm:$0xf] }
 0x312   :  { %5935 = vmatpush.bf16.msra.mxu2 %v7620_v38  ;;  %v10153_v38 = vld [vmem:[%s15256_s7 + $0xd64] sm:$0xf]  ;;  %5949 = vmatmul.bf16.vlgmr.msra.gmra.mxu3 %v12530_v30 }
 0x313   :  { %v9324_v52 = vor.u32 %v10153_v38, %v9321_v1  ;;  %v8124_v38 = vor.u32 %v9856_v28, %v8123_v21  ;;  %v9776_v1 = vld [vmem:[%s15256_s7 + $0x19c] sm:$0xf]  ;;  %v9762_v21 = vld [vmem:[%s15256_s7 + $0x12c] sm:$0xf] }
 0x314   :  { %5955 = vmatpush.bf16.msrb.mxu0 %v8236_v39  ;;  %5916 = vmatpush.bf16.msra.mxu1 %v9352_v40  ;;  %v9237_v39 = vld [vmem:[%s15256_s7 + $0xcd4] sm:$0xf0]  ;;  %v8515_v40 = vld [vmem:[%s15256_s7 + $0x710] sm:$0xf] }
 0x315   :  { %5936 = vmatmul.bf16.vlgmr.msra.gmra.mxu2 %v12569_v57  ;;  %5994 = vmatpush.bf16.msrb.mxu3 %v8908_v44  ;;  %v9240_v47 = vor.u32 %v10132_v34, %v9237_v39  ;;  %v9832_v34 = vld [vmem:[%s15256_s7 + $0x35c] sm:$0xf]  ;;  %v8041_v39 = vld [vmem:[%s15256_s7 + $0x374] sm:$0xf0] }
 0x316   :  { %5980 = vmatpush.bf16.msrb.mxu2 %v8712_v45  ;;  %v9975_v45 = vld [vmem:[%s15256_s7 + $0x7d0] sm:$0xf0] }
 0x317   :  { %v8600_v20 = vor.u32 %v9975_v45, %v8599_v31  ;;  %v7817_v31 = vld [vmem:[%s15256_s7 + $0x1b4] sm:$0xf0]  ;;  %v5614_v45 = vpop.f32.mrf.mxu1 }
 0x318   :  { %5956 = vmatpush.bf16.msrb.mxu0 %v8208_v49  ;;  %v5729_v2 = vpop.f32.mrf.mxu2  ;;  %5917 = vmatpush.bf16.msra.mxu1 %v9324_v52  ;;  %v9849_v49 = vld [vmem:[%s15256_s7 + $0x3e0] sm:$0xf0]  ;;  %v5705_v59 = vpop.f32.mrf.mxu0  ;;  %v7820_v23 = vor.u32 %v9776_v1, %v7817_v31  ;;  %v9131_v1 = vld [vmem:[%s15256_s7 + $0xbe0] sm:$0xf]  ;;  %v10108_v31 = vld [vmem:[%s15256_s7 + $0xbf8] sm:$0xf0]  ;;  %v8044_v45 = vor.u32 %v9832_v34, %v8041_v39 }
 0x319   :  { %5995 = vmatpush.bf16.msrb.mxu3 %v8880_v29  ;;  %v10125_v29 = vld [vmem:[%s15256_s7 + $0xc84] sm:$0xf]  ;;  %v10087_v39 = vld [vmem:[%s15256_s7 + $0xb50] sm:$0xf0] }
 0x31a   :  { %5981 = vmatpush.bf16.msrb.mxu2 %v8684_v46  ;;  %v8180_v46 = vor.u32 %v9870_v55, %v8179_v54  ;;  %v5742_v54 = vpop.f32.mrf.mxu3  ;;  %v8516_v55 = vor.u32 %v9954_v53, %v8515_v40  ;;  %v9184_v53 = vor.u32 %v10118_v24, %v9181_v0  ;;  %v10101_v59 = vld [vmem:[%s15256_s7 + $0xbc0] sm:$0xf0]  ;;  %v7705_v24 = vld [vmem:[%s15256_s7 + $0xd4] sm:$0xf0]  ;;  %v9818_v0 = vld [vmem:[%s15256_s7 + $0x2ec] sm:$0xf] }
 0x31c   :  { %5957 = vmatpush.bf16.msrb.mxu0 %v8180_v46  ;;  %5918 = vmatpush.bf16.msra.mxu1 %v9296_v3  ;;  %v8096_v46 = vor.u32 %v9849_v49, %v8095_v48  ;;  %v7789_v3 = vld [vmem:[%s15256_s7 + $0x17c] sm:$0xf0]  ;;  %v9755_v48 = vld [vmem:[%s15256_s7 + $0xf4] sm:$0xf] }
 0x31d   :  { %5996 = vmatpush.bf16.msrb.mxu3 %v8852_v8  ;;  %v8067_v8 = vld [vmem:[%s15256_s7 + $0x390] sm:$0xf] }
 0x31e   :  { %5982 = vmatpush.bf16.msrb.mxu2 %v8656_v26  ;;  %v14187_v26 = vld [vmem:[%s15257_s8] sm:$0xff] }
 0x31f   :  { %v3196_v19 = vperm.slane %v14187_v26, 2  ;;  %v3195_v52 = vperm.slane %v14187_v26, 1  ;;  %v5664_v40 = vpop.f32.mrf.mxu1 }
 0x320   :  { %5958 = vmatpush.bf16.msrb.mxu0 %v8152_v18  ;;  %v5731_v44 = vpop.f32.mrf.mxu2  ;;  %5919 = vmatpush.bf16.msra.mxu1 %v9268_v14  ;;  %v10115_v18 = vld [vmem:[%s15256_s7 + $0xc30] sm:$0xf0] }
 0x321   :  { %v5730_v10 = vadd.f32 %v5729_v2, %v3196_v19  ;;  %5997 = vmatpush.bf16.msrb.mxu3 %v8824_v32  ;;  %v9769_v2 = vld [vmem:[%s15256_s7 + $0x164] sm:$0xf]  ;;  %v5626_v12 = vadd.f32 %v13749_v5, %v3195_v52  ;;  %v8487_v5 = vld [vmem:[%s15256_s7 + $0x6d8] sm:$0xf]  ;;  %v9947_v14 = vld [vmem:[%s15256_s7 + $0x6f0] sm:$0xf0]  ;;  %v8740_v44 = vor.u32 %v10010_v16, %v8739_v6 }
 0x322   :  { %5983 = vmatpush.bf16.msrb.mxu2 %v8628_v43  ;;  %v10024_v43 = vld [vmem:[%s15256_s7 + $0x958] sm:$0xf0]  ;;  %v7792_v19 = vor.u32 %v9769_v2, %v7789_v3  ;;  %v7761_v32 = vld [vmem:[%s15256_s7 + $0x144] sm:$0xf0]  ;;  %v7733_v52 = vld [vmem:[%s15256_s7 + $0x10c] sm:$0xf0] }
 0x323   :  { %v14233_v58 = vadd.f32 %v5742_v54, %v5730_v10  ;;  %v5639_v28 = vadd.f32 %v13899_v35, %v5626_v12  ;;  %v9160_v35 = vor.u32 %v10115_v18, %v9159_v17  ;;  %v7764_v10 = vor.u32 %v9762_v21, %v7761_v32  ;;  %v9825_v54 = vld [vmem:[%s15256_s7 + $0x324] sm:$0xf]  ;;  %v9075_v6 = vld [vmem:[%s15256_s7 + $0xb70] sm:$0xf]  ;;  %v10094_v12 = vld [vmem:[%s15256_s7 + $0xb88] sm:$0xf0] }
 0x324   :  { %5959 = vmatpush.bf16.msrb.mxu0 %v8124_v38  ;;  %5920 = vmatpush.bf16.msra.mxu1 %v9240_v47  ;;  %v8488_v38 = vor.u32 %v9947_v14, %v8487_v5  ;;  %v8459_v47 = vld [vmem:[%s15256_s7 + $0x6a0] sm:$0xf]  ;;  %v9933_v2 = vld [vmem:[%s15256_s7 + $0x680] sm:$0xf0]  ;;  %v8403_v17 = vld [vmem:[%s15256_s7 + $0x630] sm:$0xf]  ;;  %v9076_v32 = vor.u32 %v10094_v12, %v9075_v6 }
 0x325   :  { %v9926_v18 = vld [vmem:[%s15256_s7 + $0x648] sm:$0xf0]  ;;  %v7677_v14 = vld [vmem:[%s15256_s7 + $0x9c] sm:$0xf0]  ;;  %v9811_v21 = vld [vmem:[%s15256_s7 + $0x2b4] sm:$0xf] }
 0x326   :  { %5984 = vmatpush.bf16.msrb.mxu2 %v8600_v20  ;;  %v8796_v20 = vor.u32 %v10024_v43, %v8795_v42  ;;  %v5652_v42 = vadd.f32 %v14069_v63, %v5639_v28  ;;  %v5744_v43 = vpop.f32.mrf.mxu3  ;;  %v9940_v63 = vld [vmem:[%s15256_s7 + $0x6b8] sm:$0xf0]  ;;  %v7957_v28 = vld [vmem:[%s15256_s7 + $0x2cc] sm:$0xf0]  ;;  %v8404_v34 = vor.u32 %v9926_v18, %v8403_v17  ;;  %v8685_v17 = vld [vmem:[%s15256_s7 + $0x87c] sm:$0xf0] }
 0x327   :  { %v9734_v43 = vld [vmem:[%s15256_s7 + $0x4c] sm:$0xf] }
 0x328   :  { %5998 = vmatpush.bf16.msrb.mxu3 %v8796_v20  ;;  %5960 = vmatpush.bf16.msrb.mxu0 %v8096_v46  ;;  %v5665_v49 = vadd.f32 %v5664_v40, %v5652_v42  ;;  %v9132_v20 = vor.u32 %v10108_v31, %v9131_v1  ;;  %v9748_v46 = vld [vmem:[%s15256_s7 + $0xbc] sm:$0xf]  ;;  %v9919_v42 = vld [vmem:[%s15256_s7 + $0x610] sm:$0xf0]  ;;  %v7929_v1 = vld [vmem:[%s15256_s7 + $0x294] sm:$0xf0] }
 0x32a   :  { %5985 = vmatpush.bf16.msrb.mxu2 %v8572_v7  ;;  %v9212_v7 = vor.u32 %v10125_v29, %v9209_v56  ;;  %v8460_v29 = vor.u32 %v9940_v63, %v8459_v47  ;;  %v9103_v56 = vld [vmem:[%s15256_s7 + $0xba8] sm:$0xf]  ;;  %v5678_v3 = vadd.f32 %v13954_v60, %v5665_v49  ;;  %v10080_v49 = vld [vmem:[%s15256_s7 + $0xb18] sm:$0xf0] }
 0x32b   :  { %v9104_v60 = vor.u32 %v10101_v59, %v9103_v56  ;;  %v9797_v56 = vld [vmem:[%s15256_s7 + $0x244] sm:$0xf]  ;;  %v7901_v59 = vld [vmem:[%s15256_s7 + $0x25c] sm:$0xf0] }
 0x32c   :  { %5921 = vmatpush.bf16.msra.mxu1 %v9212_v7  ;;  %5999 = vmatpush.bf16.msrb.mxu3 %v8768_v15  ;;  %v7985_v7 = vld [vmem:[%s15256_s7 + $0x304] sm:$0xf0]  ;;  %v7708_v15 = vor.u32 %v9748_v46, %v7705_v24  ;;  %v5691_v5 = vadd.f32 %v14010_v41, %v5678_v3  ;;  %v9047_v41 = vld [vmem:[%s15256_s7 + $0xb38] sm:$0xf]  ;;  %v5755_v31 = vpop.f32.mrf.mxu0  ;;  %v10073_v3 = vld [vmem:[%s15256_s7 + $0xae0] sm:$0xf0] }
 0x32d   :  { %v7988_v16 = vor.u32 %v9818_v0, %v7985_v7  ;;  %v14401_v47 = vadd.f32 %v5755_v31, %v14233_v58  ;;  %v8347_v58 = vld [vmem:[%s15256_s7 + $0x5c0] sm:$0xf]  ;;  %v8991_v46 = vld [vmem:[%s15256_s7 + $0xac8] sm:$0xf]  ;;  %v7904_v7 = vor.u32 %v9797_v56, %v7901_v59  ;;  %v10164_v56 = vld [vmem:[%s15256_s7 + $0xdb8] sm:$0xf0] }
 0x32e   :  { %5986 = vmatpush.bf16.msrb.mxu2 %v8544_v27  ;;  %v8068_v27 = vor.u32 %v9842_v11, %v8067_v8  ;;  %v5666_v8 = vpop.f32.mrf.mxu1  ;;  %v8432_v11 = vor.u32 %v9933_v2, %v8431_v62  ;;  %v8713_v62 = vld [vmem:[%s15256_s7 + $0x8b4] sm:$0xf0]  ;;  %v9979_v59 = vld [vmem:[%s15256_s7 + $0x7f4] sm:$0xf] }
 0x32f   :  { %v8319_v8 = vld [vmem:[%s15256_s7 + $0x588] sm:$0xf] }
 0x330   :  { %5961 = vmatpush.bf16.msrb.mxu0 %v8068_v27  ;;  %5922 = vmatpush.bf16.msra.mxu1 %v9184_v53  ;;  %v5600_v27 = vadd.f32 %v13952_v37, %v13782_v25  ;;  %v7960_v25 = vor.u32 %v9811_v21, %v7957_v28  ;;  %v8375_v37 = vld [vmem:[%s15256_s7 + $0x5f8] sm:$0xf]  ;;  %v8291_v21 = vld [vmem:[%s15256_s7 + $0x550] sm:$0xf]  ;;  %v9898_v28 = vld [vmem:[%s15256_s7 + $0x568] sm:$0xf0] }
 0x331   :  { %6000 = vmatpush.bf16.msrb.mxu3 %v8740_v44  ;;  %v7649_v44 = vld [vmem:[%s15256_s7 + $0x64] sm:$0xf0]  ;;  %v8376_v63 = vor.u32 %v9919_v42, %v8375_v37  ;;  %v9383_v37 = vld [vmem:[%s15256_s7 + $0xdd8] sm:$0xf]  ;;  %v9888_v42 = vld [vmem:[%s15256_s7 + $0x51c] sm:$0xf] }
 0x332   :  { %5987 = vmatpush.bf16.msrb.mxu2 %v8516_v55  ;;  %v8013_v55 = vld [vmem:[%s15256_s7 + $0x33c] sm:$0xf0]  ;;  %v5613_v40 = vadd.f32 %v14156_v4, %v5600_v27  ;;  %v5704_v4 = vadd.f32 %v14173_v13, %v5691_v5  ;;  %v8963_v27 = vld [vmem:[%s15256_s7 + $0xa90] sm:$0xf] }
 0x333   :  { %v8016_v61 = vor.u32 %v9825_v54, %v8013_v55  ;;  %5923 = vmatmul.bf16.vlgmr.msra.gmra.mxu1 %v13280_v51  ;;  %5962 = vmatmul.bf16.vlgmr.msrb.gmra.mxu0 %v12671_v50  ;;  %v9912_v55 = vld [vmem:[%s15256_s7 + $0x5d8] sm:$0xf0] }
 0x334   :  { %6006 = vmatpush.bf16.msra.mxu0 %v9160_v35  ;;  %5967 = vmatpush.bf16.msrb.mxu1 %v8488_v38  ;;  %v9804_v38 = vld [vmem:[%s15256_s7 + $0x27c] sm:$0xf]  ;;  %10174 = vtanh.f32 %v5613_v40  ;;  %v8348_v2 = vor.u32 %v9912_v55, %v8347_v58  ;;  %v7845_v40 = vld [vmem:[%s15256_s7 + $0x1ec] sm:$0xf0] }
 0x335   :  { %5988 = vmatmul.bf16.vlgmr.msrb.gmra.mxu2 %v12759_v22  ;;  %6045 = vmatpush.bf16.msra.mxu3 %v8044_v45  ;;  %v9048_v45 = vor.u32 %v10087_v39, %v9047_v41  ;;  %v7932_v54 = vor.u32 %v9804_v38, %v7929_v1  ;;  %v14448_v6 = vpop.f32.mrf.mxu3  ;;  %v10066_v41 = vld [vmem:[%s15256_s7 + $0xaa8] sm:$0xf0]  ;;  %v9783_v39 = vld [vmem:[%s15256_s7 + $0x1d4] sm:$0xf]  ;;  %v8657_v1 = vld [vmem:[%s15256_s7 + $0x844] sm:$0xf0] }
 0x336   :  { %6032 = vmatpush.bf16.msra.mxu2 %v7820_v23  ;;  %v7736_v23 = vor.u32 %v9755_v48, %v7733_v52  ;;  %6001 = vmatmul.bf16.vlgmr.msrb.gmra.mxu3 %v12955_v33  ;;  %v9019_v48 = vld [vmem:[%s15256_s7 + $0xb00] sm:$0xf]  ;;  %v7652_v52 = vor.u32 %v9734_v43, %v7649_v44  ;;  %v8265_v43 = vld [vmem:[%s15256_s7 + $0x534] sm:$0xf0]  ;;  %v10171_v44 = vld [vmem:[%s15256_s7 + $0xdf0] sm:$0xf0]  ;;  %v8964_v31 = vor.u32 %v10066_v41, %v8963_v27 }
 0x337   :  { %v9986_v38 = vld [vmem:[%s15256_s7 + $0x82c] sm:$0xf]  ;;  %v10035_v41 = vld [vmem:[%s15256_s7 + $0x9b4] sm:$0xf] }
 0x338   :  { %6007 = vmatpush.bf16.msra.mxu0 %v9132_v20  ;;  %5968 = vmatpush.bf16.msrb.mxu1 %v8460_v29  ;;  %v14379_v53 = vpop.f32.mrf.mxu2  ;;  %v9727_v20 = vld [vmem:[%s15256_s7 + $0x14] sm:$0xf]  ;;  %v7621_v29 = vld [vmem:[%s15256_s7 + $0x2c] sm:$0xf0]  ;;  %v8660_v55 = vor.u32 %v9986_v38, %v8657_v1  ;;  %v10150_v27 = vld [vmem:[%s15256_s7 + $0xd48] sm:$0xf0] }
 0x339   :  { %6046 = vmatpush.bf16.msra.mxu3 %v8016_v61  ;;  %v10000_v61 = vld [vmem:[%s15256_s7 + $0x89c] sm:$0xf]  ;;  %v7624_v0 = vor.u32 %v9727_v20, %v7621_v29  ;;  %v9355_v29 = vld [vmem:[%s15256_s7 + $0xda0] sm:$0xf]  ;;  %v9958_v38 = vld [vmem:[%s15256_s7 + $0x74c] sm:$0xf] }
 0x33a   :  { %6033 = vmatpush.bf16.msra.mxu2 %v7792_v19  ;;  %v9741_v19 = vld [vmem:[%s15256_s7 + $0x84] sm:$0xf]  ;;  %v8716_v12 = vor.u32 %v10000_v61, %v8713_v62  ;;  %v10175_v18 = vpop.eup %10174  ;;  %v8909_v62 = vld [vmem:[%s15256_s7 + $0xa3c] sm:$0xf0] }
 0x33b   :  { %v7680_v35 = vor.u32 %v9741_v19, %v7677_v14  ;;  %v5757_v19 = vpop.f32.mrf.mxu0  ;;  %v8992_v14 = vor.u32 %v10073_v3, %v8991_v46  ;;  %v10049_v61 = vld [vmem:[%s15256_s7 + $0xa24] sm:$0xf]  ;;  %v9356_v46 = vor.u32 %v10164_v56, %v9355_v29  ;;  %v9874_v3 = vld [vmem:[%s15256_s7 + $0x4ac] sm:$0xf]  ;;  %v9951_v56 = vld [vmem:[%s15256_s7 + $0x714] sm:$0xf] }
 0x33c   :  { %6008 = vmatpush.bf16.msra.mxu0 %v9104_v60  ;;  %5969 = vmatpush.bf16.msrb.mxu1 %v8432_v11  ;;  %v9905_v60 = vld [vmem:[%s15256_s7 + $0x5a0] sm:$0xf0]  ;;  %v9790_v11 = vld [vmem:[%s15256_s7 + $0x20c] sm:$0xf]  ;;  %v9867_v19 = vld [vmem:[%s15256_s7 + $0x474] sm:$0xf] }
 0x33d   :  { %6047 = vmatpush.bf16.msra.mxu3 %v7988_v16  ;;  %v9993_v16 = vld [vmem:[%s15256_s7 + $0x864] sm:$0xf]  ;;  %v5796_v58 = vpop.f32.mrf.mxu3 }
 0x33e   :  { %6034 = vmatpush.bf16.msra.mxu2 %v7764_v10  ;;  %v5716_v10 = vpop.f32.mrf.mxu1  ;;  %v9853_v58 = vld [vmem:[%s15256_s7 + $0x404] sm:$0xf] }
 0x33f   :  { %v5717_v13 = vadd.f32 %v5716_v10, %v5704_v4  ;;  %v8688_v4 = vor.u32 %v9993_v16, %v8685_v17  ;;  %v10056_v10 = vld [vmem:[%s15256_s7 + $0xa5c] sm:$0xf]  ;;  %v8881_v16 = vld [vmem:[%s15256_s7 + $0xa04] sm:$0xf0] }
 0x340   :  { %6009 = vmatpush.bf16.msra.mxu0 %v9076_v32  ;;  %5970 = vmatpush.bf16.msrb.mxu1 %v8404_v34  ;;  %v5783_v24 = vpop.f32.mrf.mxu2  ;;  %v8320_v34 = vor.u32 %v9905_v60, %v8319_v8  ;;  %v9327_v8 = vld [vmem:[%s15256_s7 + $0xd68] sm:$0xf]  ;;  %v10157_v60 = vld [vmem:[%s15256_s7 + $0xd80] sm:$0xf0] }
 0x341   :  { %6048 = vmatpush.bf16.msra.mxu3 %v7960_v25  ;;  %10176 = vtanh.f32 %v5717_v13  ;;  %v8292_v13 = vor.u32 %v9898_v28, %v8291_v21  ;;  %v8209_v24 = vld [vmem:[%s15256_s7 + $0x4c4] sm:$0xf0]  ;;  %v9299_v28 = vld [vmem:[%s15256_s7 + $0xd30] sm:$0xf] }
 0x342   :  { %6035 = vmatpush.bf16.msra.mxu2 %v7736_v23  ;;  %v9020_v23 = vor.u32 %v10080_v49, %v9019_v48  ;;  %v7848_v48 = vor.u32 %v9783_v39, %v7845_v40  ;;  %v9384_v49 = vor.u32 %v10171_v44, %v9383_v37  ;;  %v8212_v17 = vor.u32 %v9874_v3, %v8209_v24  ;;  %v8853_v39 = vld [vmem:[%s15256_s7 + $0x9cc] sm:$0xf0]  ;;  %v8153_v37 = vld [vmem:[%s15256_s7 + $0x454] sm:$0xf0]  ;;  %v10143_v44 = vld [vmem:[%s15256_s7 + $0xd10] sm:$0xf0] }
 0x344   :  { %6010 = vmatpush.bf16.msra.mxu0 %v9048_v45  ;;  %5971 = vmatpush.bf16.msrb.mxu1 %v8376_v63  ;;  %v8937_v45 = vld [vmem:[%s15256_s7 + $0xa74] sm:$0xf0]  ;;  %v8268_v63 = vor.u32 %v9888_v42, %v8265_v43  ;;  %v8856_v43 = vor.u32 %v10035_v41, %v8853_v39  ;;  %v9187_v41 = vld [vmem:[%s15256_s7 + $0xc50] sm:$0xf]  ;;  %v10122_v39 = vld [vmem:[%s15256_s7 + $0xc68] sm:$0xf0] }
 0x345   :  { %6049 = vmatpush.bf16.msra.mxu3 %v7932_v54  ;;  %v8237_v54 = vld [vmem:[%s15256_s7 + $0x4fc] sm:$0xf0]  ;;  %v8940_v20 = vor.u32 %v10056_v10, %v8937_v45  ;;  %v10028_v10 = vld [vmem:[%s15256_s7 + $0x97c] sm:$0xf]  ;;  %v8825_v45 = vld [vmem:[%s15256_s7 + $0x994] sm:$0xf0] }
 0x346   :  { %6036 = vmatpush.bf16.msra.mxu2 %v7708_v15  ;;  %v7873_v15 = vld [vmem:[%s15256_s7 + $0x224] sm:$0xf0]  ;;  %v5718_v5 = vpop.f32.mrf.mxu1  ;;  %v8828_v29 = vor.u32 %v10028_v10, %v8825_v45  ;;  %v7767_v10 = vld [vmem:[%s15256_s7 + $0x130] sm:$0xf] }
 0x347   :  { %v10177_v32 = vpop.eup %10176  ;;  %v7876_v25 = vor.u32 %v9790_v11, %v7873_v15  ;;  %v9972_v11 = vld [vmem:[%s15256_s7 + $0x7bc] sm:$0xf]  ;;  %v10042_v15 = vld [vmem:[%s15256_s7 + $0x9ec] sm:$0xf]  ;;  %v8181_v5 = vld [vmem:[%s15256_s7 + $0x48c] sm:$0xf0] }
 0x348   :  { %6011 = vmatpush.bf16.msra.mxu0 %v9020_v23  ;;  %5972 = vmatpush.bf16.msrb.mxu1 %v8348_v2  ;;  %v8629_v23 = vld [vmem:[%s15256_s7 + $0x80c] sm:$0xf0]  ;;  %v8884_v21 = vor.u32 %v10042_v15, %v8881_v16  ;;  %v8184_v40 = vor.u32 %v9867_v19, %v8181_v5  ;;  %v10014_v19 = vld [vmem:[%s15256_s7 + $0x90c] sm:$0xf]  ;;  %v8769_v5 = vld [vmem:[%s15256_s7 + $0x924] sm:$0xf0] }
 0x349   :  { %6050 = vmatpush.bf16.msra.mxu3 %v7904_v7  ;;  %v8912_v7 = vor.u32 %v10049_v61, %v8909_v62  ;;  %v10021_v61 = vld [vmem:[%s15256_s7 + $0x944] sm:$0xf]  ;;  %v8797_v62 = vld [vmem:[%s15256_s7 + $0x95c] sm:$0xf0] }
 0x34a   :  { %6037 = vmatpush.bf16.msra.mxu2 %v7680_v35  ;;  %v6247_v35 = vpack.c.bf16 %v10177_v32, %v10175_v18  ;;  %v9328_v18 = vor.u32 %v10157_v60, %v9327_v8  ;;  %v9965_v32 = vld [vmem:[%s15256_s7 + $0x784] sm:$0xf] }
 0x34c   :  { %6251 = vst [vmem:[#allocation2] sm:$0xff] %v6247_v35  ;;  %6012 = vmatpush.bf16.msra.mxu0 %v8992_v14  ;;  %5973 = vmatpush.bf16.msrb.mxu1 %v8320_v34  ;;  %v8573_v34 = vld [vmem:[%s15256_s7 + $0x79c] sm:$0xf0]  ;;  %v9300_v35 = vor.u32 %v10150_v27, %v9299_v28 }
 0x34d   :  { %6051 = vmatpush.bf16.msra.mxu3 %v7876_v25  ;;  %v9860_v25 = vld [vmem:[%s15256_s7 + $0x43c] sm:$0xf]  ;;  %v8576_v42 = vor.u32 %v9965_v32, %v8573_v34  ;;  %v9773_v34 = vld [vmem:[%s15256_s7 + $0x180] sm:$0xf0] }
 0x34e   :  { %6038 = vmatpush.bf16.msra.mxu2 %v7652_v52  ;;  %v9881_v52 = vld [vmem:[%s15256_s7 + $0x4e4] sm:$0xf] }
 0x34f   :  { %v8240_v2 = vor.u32 %v9881_v52, %v8237_v54 }
 0x350   :  { %6013 = vmatpush.bf16.msra.mxu0 %v8964_v31  ;;  %5974 = vmatpush.bf16.msrb.mxu1 %v8292_v13  ;;  %v8545_v31 = vld [vmem:[%s15256_s7 + $0x764] sm:$0xf0]  ;;  %v5768_v13 = vpop.f32.mrf.mxu1 }
 0x351   :  { %6052 = vmatpush.bf16.msra.mxu3 %v7848_v48  ;;  %v8156_v48 = vor.u32 %v9860_v25, %v8153_v37  ;;  %v5769_v52 = vadd.f32 %v5768_v13, %v14401_v47  ;;  %v10136_v47 = vld [vmem:[%s15256_s7 + $0xcd8] sm:$0xf0]  ;;  %v8069_v25 = vld [vmem:[%s15256_s7 + $0x3ac] sm:$0xf0]  ;;  %v10007_v37 = vld [vmem:[%s15256_s7 + $0x8d4] sm:$0xf] }
 0x352   :  { %6039 = vmatpush.bf16.msra.mxu2 %v7624_v0  ;;  %v8632_v0 = vor.u32 %v9979_v59, %v8629_v23  ;;  %v8517_v23 = vld [vmem:[%s15256_s7 + $0x72c] sm:$0xf0]  ;;  %v9766_v13 = vld [vmem:[%s15256_s7 + $0x148] sm:$0xf0] }
 0x353   :  { %5975 = vmatmul.bf16.vlgmr.msrb.gmra.mxu1 %v12649_v36  ;;  %6014 = vmatmul.bf16.vlgmr.msra.gmra.mxu0 %v13123_v9  ;;  %v5782_v59 = vadd.f32 %v14379_v53, %v5769_v52  ;;  %v9780_v53 = vld [vmem:[%s15256_s7 + $0x1b8] sm:$0xf0]  ;;  %v8520_v60 = vor.u32 %v9951_v56, %v8517_v23  ;;  %v9937_v56 = vld [vmem:[%s15256_s7 + $0x6a4] sm:$0xf]  ;;  %v7739_v23 = vld [vmem:[%s15256_s7 + $0xf8] sm:$0xf] }
 0x354   :  { %6058 = vmatpush.bf16.msrb.mxu0 %v8268_v63  ;;  %6019 = vmatpush.bf16.msra.mxu1 %v9384_v49  ;;  %v5807_v63 = vpop.f32.mrf.mxu0  ;;  %v3197_v49 = vperm.slane %v14187_v26, 3  ;;  %v9243_v26 = vld [vmem:[%s15256_s7 + $0xcc0] sm:$0xf] }
 0x355   :  { %6040 = vmatmul.bf16.vlgmr.msra.gmra.mxu2 %v12569_v57  ;;  %6097 = vmatpush.bf16.msrb.mxu3 %v8940_v20  ;;  %v8548_v20 = vor.u32 %v9958_v38, %v8545_v31  ;;  %v5795_v3 = vadd.f32 %v14448_v6, %v5782_v59  ;;  %v9244_v24 = vor.u32 %v10136_v47, %v9243_v26  ;;  %v10129_v6 = vld [vmem:[%s15256_s7 + $0xca0] sm:$0xf0]  ;;  %v8489_v31 = vld [vmem:[%s15256_s7 + $0x6f4] sm:$0xf0]  ;;  %v8461_v59 = vld [vmem:[%s15256_s7 + $0x6bc] sm:$0xf0] }
 0x356   :  { %6084 = vmatpush.bf16.msrb.mxu2 %v8716_v12  ;;  %v8601_v12 = vld [vmem:[%s15256_s7 + $0x7d4] sm:$0xf0]  ;;  %6053 = vmatmul.bf16.vlgmr.msra.gmra.mxu3 %v12530_v30  ;;  %v7768_v26 = vor.u32 %v9766_v13, %v7767_v10  ;;  %v9738_v10 = vld [vmem:[%s15256_s7 + $0x68] sm:$0xf0]  ;;  %v9808_v13 = vld [vmem:[%s15256_s7 + $0x298] sm:$0xf0] }
 0x357   :  { %v8604_v14 = vor.u32 %v9972_v11, %v8601_v12  ;;  %v8800_v11 = vor.u32 %v10021_v61, %v8797_v62  ;;  %v9215_v12 = vld [vmem:[%s15256_s7 + $0xc88] sm:$0xf]  ;;  %v14647_v15 = vadd.f32 %v5807_v63, %v5795_v3  ;;  %v8047_v63 = vld [vmem:[%s15256_s7 + $0x360] sm:$0xf]  ;;  %v9759_v61 = vld [vmem:[%s15256_s7 + $0x110] sm:$0xf0] }
 0x358   :  { %6059 = vmatpush.bf16.msrb.mxu0 %v8240_v2  ;;  %6020 = vmatpush.bf16.msra.mxu1 %v9356_v46  ;;  %v5833_v1 = vpop.f32.mrf.mxu2  ;;  %v7823_v46 = vld [vmem:[%s15256_s7 + $0x1a0] sm:$0xf]  ;;  %v5770_v28 = vpop.f32.mrf.mxu1  ;;  %v8019_v62 = vld [vmem:[%s15256_s7 + $0x328] sm:$0xf]  ;;  %v10098_v3 = vld [vmem:[%s15256_s7 + $0xbac] sm:$0xf] }
 0x359   :  { %6098 = vmatpush.bf16.msrb.mxu3 %v8912_v7  ;;  %v8097_v7 = vld [vmem:[%s15256_s7 + $0x3e4] sm:$0xf0]  ;;  %v5834_v8 = vadd.f32 %v5833_v1, %v3197_v49  ;;  %v9944_v1 = vld [vmem:[%s15256_s7 + $0x6dc] sm:$0xf]  ;;  %v9188_v49 = vor.u32 %v10122_v39, %v9187_v41  ;;  %v9745_v41 = vld [vmem:[%s15256_s7 + $0xa0] sm:$0xf0] }
 0x35a   :  { %6085 = vmatpush.bf16.msrb.mxu2 %v8688_v4  ;;  %v9271_v4 = vld [vmem:[%s15256_s7 + $0xcf8] sm:$0xf] }
 0x35b   :  { %v9272_v54 = vor.u32 %v10143_v44, %v9271_v4  ;;  %v10112_v4 = vld [vmem:[%s15256_s7 + $0xc1c] sm:$0xf]  ;;  %v9161_v44 = vld [vmem:[%s15256_s7 + $0xc34] sm:$0xf0] }
 0x35c   :  { %6060 = vmatpush.bf16.msrb.mxu0 %v8212_v17  ;;  %6021 = vmatpush.bf16.msra.mxu1 %v9328_v18  ;;  %v5846_v17 = vpop.f32.mrf.mxu3  ;;  %v7824_v18 = vor.u32 %v9780_v53, %v7823_v46  ;;  %v5809_v27 = vpop.f32.mrf.mxu0  ;;  %v9164_v52 = vor.u32 %v10112_v4, %v9161_v44  ;;  %v8464_v53 = vor.u32 %v9937_v56, %v8461_v59  ;;  %v7963_v39 = vld [vmem:[%s15256_s7 + $0x2b8] sm:$0xf]  ;;  %v9916_v44 = vld [vmem:[%s15256_s7 + $0x5fc] sm:$0xf]  ;;  %v9731_v56 = vld [vmem:[%s15256_s7 + $0x30] sm:$0xf0] }
 0x35d   :  { %6099 = vmatpush.bf16.msrb.mxu3 %v8884_v21  ;;  %v14658_v21 = vadd.f32 %v5846_v17, %v5834_v8  ;;  %v9930_v8 = vld [vmem:[%s15256_s7 + $0x66c] sm:$0xf]  ;;  %v9923_v27 = vld [vmem:[%s15256_s7 + $0x634] sm:$0xf]  ;;  %v7907_v59 = vld [vmem:[%s15256_s7 + $0x248] sm:$0xf] }
 0x35e   :  { %6086 = vmatpush.bf16.msrb.mxu2 %v8660_v55  ;;  %v8125_v55 = vld [vmem:[%s15256_s7 + $0x41c] sm:$0xf0] }
 0x35f   :  { %v8128_v2 = vor.u32 %v9853_v58, %v8125_v55  ;;  %v8492_v58 = vor.u32 %v9944_v1, %v8489_v31  ;;  %v10105_v55 = vld [vmem:[%s15256_s7 + $0xbe4] sm:$0xf]  ;;  %v7655_v1 = vld [vmem:[%s15256_s7 + $0x50] sm:$0xf] }
 0x360   :  { %6061 = vmatpush.bf16.msrb.mxu0 %v8184_v40  ;;  %6022 = vmatpush.bf16.msra.mxu1 %v9300_v35  ;;  %v5835_v16 = vpop.f32.mrf.mxu2  ;;  %v9216_v40 = vor.u32 %v10129_v6, %v9215_v12  ;;  %v9839_v35 = vld [vmem:[%s15256_s7 + $0x394] sm:$0xf]  ;;  %v9752_v12 = vld [vmem:[%s15256_s7 + $0xd8] sm:$0xf0]  ;;  %v7991_v6 = vld [vmem:[%s15256_s7 + $0x2f0] sm:$0xf] }
 0x361   :  { %6100 = vmatpush.bf16.msrb.mxu3 %v8856_v43  ;;  %v8741_v43 = vld [vmem:[%s15256_s7 + $0x8ec] sm:$0xf0]  ;;  %v8072_v45 = vor.u32 %v9839_v35, %v8069_v25  ;;  %v9822_v16 = vld [vmem:[%s15256_s7 + $0x308] sm:$0xf0] }
 0x362   :  { %6087 = vmatpush.bf16.msrb.mxu2 %v8632_v0  ;;  %v9846_v0 = vld [vmem:[%s15256_s7 + $0x3cc] sm:$0xf]  ;;  %v7992_v28 = vor.u32 %v9822_v16, %v7991_v6  ;;  %v7879_v6 = vld [vmem:[%s15256_s7 + $0x210] sm:$0xf] }
 0x363   :  { %v8100_v32 = vor.u32 %v9846_v0, %v8097_v7  ;;  %v7740_v0 = vor.u32 %v9759_v61, %v7739_v23  ;;  %v9801_v23 = vld [vmem:[%s15256_s7 + $0x260] sm:$0xf0]  ;;  %v9794_v16 = vld [vmem:[%s15256_s7 + $0x228] sm:$0xf0] }
 0x364   :  { %6062 = vmatpush.bf16.msrb.mxu0 %v8156_v48  ;;  %6023 = vmatpush.bf16.msra.mxu1 %v9272_v54  ;;  %v9836_v48 = vld [vmem:[%s15256_s7 + $0x378] sm:$0xf0]  ;;  %v8744_v54 = vor.u32 %v10007_v37, %v8741_v43 }
 0x365   :  { %6101 = vmatpush.bf16.msrb.mxu3 %v8828_v29  ;;  %v5848_v29 = vpop.f32.mrf.mxu3  ;;  %v8048_v47 = vor.u32 %v9836_v48, %v8047_v63  ;;  %v10084_v37 = vld [vmem:[%s15256_s7 + $0xb3c] sm:$0xf] }
 0x366   :  { %6088 = vmatpush.bf16.msrb.mxu2 %v8604_v14  ;;  %v7795_v14 = vld [vmem:[%s15256_s7 + $0x168] sm:$0xf]  ;;  %v9909_v29 = vld [vmem:[%s15256_s7 + $0x5c4] sm:$0xf] }
 0x367   :  { %v7796_v38 = vor.u32 %v9773_v34, %v7795_v14  ;;  %v7683_v34 = vld [vmem:[%s15256_s7 + $0x88] sm:$0xf] }
 0x368   :  { %6063 = vmatpush.bf16.msrb.mxu0 %v8128_v2  ;;  %6024 = vmatpush.bf16.msra.mxu1 %v9244_v24  ;;  %v9829_v2 = vld [vmem:[%s15256_s7 + $0x340] sm:$0xf0]  ;;  %v9105_v24 = vld [vmem:[%s15256_s7 + $0xbc4] sm:$0xf0]  ;;  %v7684_v43 = vor.u32 %v9745_v41, %v7683_v34  ;;  %v10063_v34 = vld [vmem:[%s15256_s7 + $0xa94] sm:$0xf] }
 0x369   :  { %6102 = vmatpush.bf16.msrb.mxu3 %v8800_v11  ;;  %v8020_v7 = vor.u32 %v9829_v2, %v8019_v62  ;;  %v7711_v11 = vld [vmem:[%s15256_s7 + $0xc0] sm:$0xf]  ;;  %v9108_v17 = vor.u32 %v10098_v3, %v9105_v24  ;;  %v10004_v2 = vld [vmem:[%s15256_s7 + $0x8b8] sm:$0xf0]  ;;  %v8993_v3 = vld [vmem:[%s15256_s7 + $0xae4] sm:$0xf0] }
 0x36a   :  { %6089 = vmatpush.bf16.msrb.mxu2 %v8576_v42  ;;  %v8772_v42 = vor.u32 %v10014_v19, %v8769_v5  ;;  %v10091_v19 = vld [vmem:[%s15256_s7 + $0xb74] sm:$0xf]  ;;  %v9077_v5 = vld [vmem:[%s15256_s7 + $0xb8c] sm:$0xf0]  ;;  %v7712_v14 = vor.u32 %v9752_v12, %v7711_v11  ;;  %v8719_v62 = vld [vmem:[%s15256_s7 + $0x8a0] sm:$0xf] }
 0x36b   :  { %v9080_v35 = vor.u32 %v10091_v19, %v9077_v5  ;;  %v8720_v12 = vor.u32 %v10004_v2, %v8719_v62  ;;  %v8965_v41 = vld [vmem:[%s15256_s7 + $0xaac] sm:$0xf0] }
 0x36c   :  { %6064 = vmatpush.bf16.msrb.mxu0 %v8100_v32  ;;  %6025 = vmatpush.bf16.msra.mxu1 %v9216_v40  ;;  %v8405_v32 = vld [vmem:[%s15256_s7 + $0x64c] sm:$0xf0]  ;;  %v9815_v40 = vld [vmem:[%s15256_s7 + $0x2d0] sm:$0xf0]  ;;  %v14807_v63 = vpop.f32.mrf.mxu1  ;;  %v14809_v48 = vpop.f32.mrf.mxu0 }
 0x36d   :  { %6103 = vmatpush.bf16.msrb.mxu3 %v8772_v42  ;;  %v8408_v25 = vor.u32 %v9923_v27, %v8405_v32  ;;  %v9049_v42 = vld [vmem:[%s15256_s7 + $0xb54] sm:$0xf0]  ;;  %v7964_v4 = vor.u32 %v9815_v40, %v7963_v39  ;;  %v8293_v27 = vld [vmem:[%s15256_s7 + $0x56c] sm:$0xf0]  ;;  %v7880_v40 = vor.u32 %v9794_v16, %v7879_v6  ;;  %v10046_v6 = vld [vmem:[%s15256_s7 + $0xa08] sm:$0xf0] }
 0x36e   :  { %6090 = vmatpush.bf16.msrb.mxu2 %v8548_v20  ;;  %v9133_v20 = vld [vmem:[%s15256_s7 + $0xbfc] sm:$0xf0]  ;;  %v7851_v39 = vld [vmem:[%s15256_s7 + $0x1d8] sm:$0xf] }
 0x36f   :  { %v9136_v46 = vor.u32 %v10105_v55, %v9133_v20  ;;  %v7656_v55 = vor.u32 %v9738_v10, %v7655_v1  ;;  %v9990_v1 = vld [vmem:[%s15256_s7 + $0x848] sm:$0xf0]  ;;  %v8943_v10 = vld [vmem:[%s15256_s7 + $0xa60] sm:$0xf] }
 0x370   :  { %6065 = vmatpush.bf16.msrb.mxu0 %v8072_v45  ;;  %6026 = vmatpush.bf16.msra.mxu1 %v9188_v49  ;;  %v7935_v45 = vld [vmem:[%s15256_s7 + $0x280] sm:$0xf]  ;;  %v9052_v49 = vor.u32 %v10084_v37, %v9049_v42  ;;  %v9892_v37 = vld [vmem:[%s15256_s7 + $0x538] sm:$0xf0] }
 0x371   :  { %6104 = vmatpush.bf16.msrb.mxu3 %v8744_v54  ;;  %v10077_v54 = vld [vmem:[%s15256_s7 + $0xb04] sm:$0xf]  ;;  %v7936_v20 = vor.u32 %v9808_v13, %v7935_v45  ;;  %v10060_v45 = vld [vmem:[%s15256_s7 + $0xa78] sm:$0xf0] }
 0x372   :  { %6091 = vmatpush.bf16.msrb.mxu2 %v8520_v60  ;;  %v8433_v60 = vld [vmem:[%s15256_s7 + $0x684] sm:$0xf0] }
 0x373   :  { %6027 = vmatmul.bf16.vlgmr.msra.gmra.mxu1 %v13280_v51  ;;  %6066 = vmatmul.bf16.vlgmr.msrb.gmra.mxu0 %v12671_v50 }
 0x374   :  { %6110 = vmatpush.bf16.msra.mxu0 %v9164_v52  ;;  %6071 = vmatpush.bf16.msrb.mxu1 %v8492_v58  ;;  %v9021_v58 = vld [vmem:[%s15256_s7 + $0xb1c] sm:$0xf0]  ;;  %v5861_v19 = vpop.f32.mrf.mxu0 }
 0x375   :  { %6092 = vmatmul.bf16.vlgmr.msrb.gmra.mxu2 %v12759_v22  ;;  %6149 = vmatpush.bf16.msra.mxu3 %v8048_v47  ;;  %v7627_v47 = vld [vmem:[%s15256_s7 + $0x18] sm:$0xf]  ;;  %v9024_v61 = vor.u32 %v10077_v54, %v9021_v58  ;;  %v14853_v11 = vpop.f32.mrf.mxu3  ;;  %v8243_v58 = vld [vmem:[%s15256_s7 + $0x4e8] sm:$0xf]  ;;  %v9871_v19 = vld [vmem:[%s15256_s7 + $0x490] sm:$0xf0] }
 0x376   :  { %6136 = vmatpush.bf16.msra.mxu2 %v7824_v18  ;;  %6105 = vmatmul.bf16.vlgmr.msrb.gmra.mxu3 %v12955_v33  ;;  %v8436_v18 = vor.u32 %v9930_v8, %v8433_v60  ;;  %v7628_v24 = vor.u32 %v9731_v56, %v7627_v47  ;;  %v8321_v8 = vld [vmem:[%s15256_s7 + $0x5a4] sm:$0xf0]  ;;  %v9357_v47 = vld [vmem:[%s15256_s7 + $0xdbc] sm:$0xf0]  ;;  %v8635_v56 = vld [vmem:[%s15256_s7 + $0x7f8] sm:$0xf] }
 0x378   :  { %6111 = vmatpush.bf16.msra.mxu0 %v9136_v46  ;;  %6072 = vmatpush.bf16.msrb.mxu1 %v8464_v53  ;;  %v14796_v31 = vpop.f32.mrf.mxu2  ;;  %v10070_v53 = vld [vmem:[%s15256_s7 + $0xacc] sm:$0xf] }
 0x379   :  { %6150 = vmatpush.bf16.msra.mxu3 %v8020_v7  ;;  %v9902_v7 = vld [vmem:[%s15256_s7 + $0x58c] sm:$0xf]  ;;  %v8996_v5 = vor.u32 %v10070_v53, %v8993_v3 }
 0x37a   :  { %6137 = vmatpush.bf16.msra.mxu2 %v7796_v38  ;;  %v8377_v38 = vld [vmem:[%s15256_s7 + $0x614] sm:$0xf0]  ;;  %v8324_v32 = vor.u32 %v9902_v7, %v8321_v8  ;;  %v9878_v53 = vld [vmem:[%s15256_s7 + $0x4c8] sm:$0xf0]  ;;  %v9329_v7 = vld [vmem:[%s15256_s7 + $0xd84] sm:$0xf0] }
 0x37b   :  { %v8380_v52 = vor.u32 %v9916_v44, %v8377_v38  ;;  %v8663_v44 = vld [vmem:[%s15256_s7 + $0x830] sm:$0xf]  ;;  %v8968_v38 = vor.u32 %v10063_v34, %v8965_v41  ;;  %v8607_v8 = vld [vmem:[%s15256_s7 + $0x7c0] sm:$0xf]  ;;  %v8859_v34 = vld [vmem:[%s15256_s7 + $0x9b8] sm:$0xf] }
 0x37c   :  { %6112 = vmatpush.bf16.msra.mxu0 %v9108_v17  ;;  %6073 = vmatpush.bf16.msrb.mxu1 %v8436_v18  ;;  %v8691_v17 = vld [vmem:[%s15256_s7 + $0x868] sm:$0xf]  ;;  %v5822_v18 = vpop.f32.mrf.mxu1  ;;  %v10039_v41 = vld [vmem:[%s15256_s7 + $0x9d0] sm:$0xf0] }
 0x37d   :  { %6151 = vmatpush.bf16.msra.mxu3 %v7992_v28  ;;  %v9895_v28 = vld [vmem:[%s15256_s7 + $0x554] sm:$0xf]  ;;  %v8187_v18 = vld [vmem:[%s15256_s7 + $0x478] sm:$0xf] }
 0x37e   :  { %6138 = vmatpush.bf16.msra.mxu2 %v7768_v26  ;;  %v8349_v26 = vld [vmem:[%s15256_s7 + $0x5dc] sm:$0xf0]  ;;  %v8296_v13 = vor.u32 %v9895_v28, %v8293_v27  ;;  %v9301_v28 = vld [vmem:[%s15256_s7 + $0xd4c] sm:$0xf0]  ;;  %v8579_v27 = vld [vmem:[%s15256_s7 + $0x788] sm:$0xf] }
 0x37f   :  { %v8352_v46 = vor.u32 %v9909_v29, %v8349_v26  ;;  %v8664_v29 = vor.u32 %v9990_v1, %v8663_v44  ;;  %v8944_v26 = vor.u32 %v10060_v45, %v8943_v10  ;;  %v8551_v44 = vld [vmem:[%s15256_s7 + $0x750] sm:$0xf]  ;;  %v9962_v1 = vld [vmem:[%s15256_s7 + $0x768] sm:$0xf0]  ;;  %v8831_v10 = vld [vmem:[%s15256_s7 + $0x980] sm:$0xf] }
 0x380   :  { %6113 = vmatpush.bf16.msra.mxu0 %v9080_v35  ;;  %6074 = vmatpush.bf16.msrb.mxu1 %v8408_v25  ;;  %v5887_v60 = vpop.f32.mrf.mxu2  ;;  %v9787_v35 = vld [vmem:[%s15256_s7 + $0x1f0] sm:$0xf0]  ;;  %v8271_v25 = vld [vmem:[%s15256_s7 + $0x520] sm:$0xf]  ;;  %v10032_v45 = vld [vmem:[%s15256_s7 + $0x998] sm:$0xf0] }
 0x381   :  { %6152 = vmatpush.bf16.msra.mxu3 %v7964_v4  ;;  %v9385_v4 = vld [vmem:[%s15256_s7 + $0xdf4] sm:$0xf0]  ;;  %v9976_v60 = vld [vmem:[%s15256_s7 + $0x7d8] sm:$0xf0] }
 0x382   :  { %6139 = vmatpush.bf16.msra.mxu2 %v7740_v0  ;;  %v7908_v0 = vor.u32 %v9801_v23, %v7907_v59  ;;  %v9983_v59 = vld [vmem:[%s15256_s7 + $0x810] sm:$0xf0]  ;;  %v8915_v23 = vld [vmem:[%s15256_s7 + $0xa28] sm:$0xf] }
 0x383   :  { %v8636_v3 = vor.u32 %v9983_v59, %v8635_v56  ;;  %v9245_v56 = vld [vmem:[%s15256_s7 + $0xcdc] sm:$0xf0]  ;;  %v8523_v59 = vld [vmem:[%s15256_s7 + $0x718] sm:$0xf] }
 0x384   :  { %6114 = vmatpush.bf16.msra.mxu0 %v9052_v49  ;;  %6075 = vmatpush.bf16.msrb.mxu1 %v8380_v52  ;;  %v8272_v49 = vor.u32 %v9892_v37, %v8271_v25  ;;  %v7852_v52 = vor.u32 %v9787_v35, %v7851_v39  ;;  %v8188_v39 = vor.u32 %v9871_v19, %v8187_v18  ;;  %v8159_v35 = vld [vmem:[%s15256_s7 + $0x440] sm:$0xf]  ;;  %v9864_v25 = vld [vmem:[%s15256_s7 + $0x458] sm:$0xf0] }
 0x385   :  { %6153 = vmatpush.bf16.msra.mxu3 %v7936_v20  ;;  %v5900_v20 = vpop.f32.mrf.mxu3 }
 0x386   :  { %6140 = vmatpush.bf16.msra.mxu2 %v7712_v14  ;;  %v9997_v14 = vld [vmem:[%s15256_s7 + $0x880] sm:$0xf0]  ;;  %v8131_v20 = vld [vmem:[%s15256_s7 + $0x408] sm:$0xf] }
 0x387   :  { %v8692_v42 = vor.u32 %v9997_v14, %v8691_v17 }
 0x388   :  { %6115 = vmatpush.bf16.msra.mxu0 %v9024_v61  ;;  %6076 = vmatpush.bf16.msrb.mxu1 %v8352_v46  ;;  %v10053_v61 = vld [vmem:[%s15256_s7 + $0xa40] sm:$0xf0]  ;;  %v8215_v46 = vld [vmem:[%s15256_s7 + $0x4b0] sm:$0xf] }
 0x389   :  { %6154 = vmatpush.bf16.msra.mxu3 %v7908_v0  ;;  %v10154_v0 = vld [vmem:[%s15256_s7 + $0xd6c] sm:$0xf]  ;;  %v8216_v16 = vor.u32 %v9878_v53, %v8215_v46  ;;  %v8103_v53 = vld [vmem:[%s15256_s7 + $0x3d0] sm:$0xf] }
 0x38a   :  { %6141 = vmatpush.bf16.msra.mxu2 %v7684_v43  ;;  %v10168_v43 = vld [vmem:[%s15256_s7 + $0xddc] sm:$0xf]  ;;  %v9332_v17 = vor.u32 %v10154_v0, %v9329_v7 }
 0x38b   :  { %v9388_v54 = vor.u32 %v10168_v43, %v9385_v4  ;;  %v10140_v43 = vld [vmem:[%s15256_s7 + $0xcfc] sm:$0xf]  ;;  %v9273_v4 = vld [vmem:[%s15256_s7 + $0xd14] sm:$0xf0] }
 0x38c   :  { %6116 = vmatpush.bf16.msra.mxu0 %v8996_v5  ;;  %6077 = vmatpush.bf16.msrb.mxu1 %v8324_v32  ;;  %v8608_v5 = vor.u32 %v9976_v60, %v8607_v8  ;;  %v9969_v32 = vld [vmem:[%s15256_s7 + $0x7a0] sm:$0xf0]  ;;  %v10126_v8 = vld [vmem:[%s15256_s7 + $0xc8c] sm:$0xf]  ;;  %v9217_v60 = vld [vmem:[%s15256_s7 + $0xca4] sm:$0xf0] }
 0x38d   :  { %6155 = vmatpush.bf16.msra.mxu3 %v7880_v40  ;;  %v8580_v37 = vor.u32 %v9969_v32, %v8579_v27  ;;  %v9189_v27 = vld [vmem:[%s15256_s7 + $0xc6c] sm:$0xf0]  ;;  %v8075_v32 = vld [vmem:[%s15256_s7 + $0x398] sm:$0xf] }
 0x38e   :  { %6142 = vmatpush.bf16.msra.mxu2 %v7656_v55  ;;  %v9885_v55 = vld [vmem:[%s15256_s7 + $0x500] sm:$0xf0] }
 0x38f   :  { %v8244_v62 = vor.u32 %v9885_v55, %v8243_v58  ;;  %v9276_v55 = vor.u32 %v10140_v43, %v9273_v4 }
 0x390   :  { %6117 = vmatpush.bf16.msra.mxu0 %v8968_v38  ;;  %6078 = vmatpush.bf16.msrb.mxu1 %v8296_v13  ;;  %v15009_v13 = vpop.f32.mrf.mxu1 }
 0x391   :  { %6156 = vmatpush.bf16.msra.mxu3 %v7852_v52  ;;  %v8160_v52 = vor.u32 %v9864_v25, %v8159_v35  ;;  %v10116_v35 = vld [vmem:[%s15256_s7 + $0xc38] sm:$0xf0]  ;;  %v10011_v25 = vld [vmem:[%s15256_s7 + $0x8f0] sm:$0xf0] }
 0x392   :  { %6143 = vmatpush.bf16.msra.mxu2 %v7628_v24  ;;  %v8916_v24 = vor.u32 %v10053_v61, %v8915_v23  ;;  %v9955_v23 = vld [vmem:[%s15256_s7 + $0x730] sm:$0xf0]  ;;  %v8803_v61 = vld [vmem:[%s15256_s7 + $0x948] sm:$0xf] }
 0x393   :  { %6079 = vmatmul.bf16.vlgmr.msrb.gmra.mxu1 %v12649_v36  ;;  %6118 = vmatmul.bf16.vlgmr.msra.gmra.mxu0 %v13123_v9  ;;  %v8524_v0 = vor.u32 %v9955_v23, %v8523_v59  ;;  %v10095_v23 = vld [vmem:[%s15256_s7 + $0xb90] sm:$0xf0] }
 0x394   :  { %6162 = vmatpush.bf16.msrb.mxu0 %v8272_v49  ;;  %6123 = vmatpush.bf16.msra.mxu1 %v9388_v54  ;;  %v15011_v49 = vpop.f32.mrf.mxu0  ;;  %v15016_v54 = vld [vmem:[%s15257_s8] sm:$0xff] }
 0x395   :  { %6144 = vmatmul.bf16.vlgmr.msra.gmra.mxu2 %v12569_v57  ;;  %v10161_v57 = vld [vmem:[%s15256_s7 + $0xda4] sm:$0xf]  ;;  %6201 = vmatpush.bf16.msrb.mxu3 %v8944_v26  ;;  %v3198_v58 = vperm.slane %v15016_v54, 4  ;;  %v8552_v26 = vor.u32 %v9962_v1, %v8551_v44 }
 0x396   :  { %6188 = vmatpush.bf16.msrb.mxu2 %v8720_v12  ;;  %v9360_v2 = vor.u32 %v10161_v57, %v9357_v47  ;;  %v8887_v12 = vld [vmem:[%s15256_s7 + $0x9f0] sm:$0xf]  ;;  %6157 = vmatmul.bf16.vlgmr.msra.gmra.mxu3 %v12530_v30  ;;  %v10147_v30 = vld [vmem:[%s15256_s7 + $0xd34] sm:$0xf]  ;;  %v8832_v57 = vor.u32 %v10032_v45, %v8831_v10  ;;  %v10133_v47 = vld [vmem:[%s15256_s7 + $0xcc4] sm:$0xf] }
 0x397   :  { %v8888_v14 = vor.u32 %v10046_v6, %v8887_v12  ;;  %v9304_v40 = vor.u32 %v10147_v30, %v9301_v28  ;;  %v9248_v46 = vor.u32 %v10133_v47, %v9245_v56  ;;  %v5950_v6 = vpop.f32.mrf.mxu3  ;;  %v10119_v30 = vld [vmem:[%s15256_s7 + $0xc54] sm:$0xf]  ;;  %v9220_v28 = vor.u32 %v10126_v8, %v9217_v60  ;;  %v9139_v45 = vld [vmem:[%s15256_s7 + $0xbe8] sm:$0xf] }
 0x398   :  { %6163 = vmatpush.bf16.msrb.mxu0 %v8244_v62  ;;  %6124 = vmatpush.bf16.msra.mxu1 %v9360_v2  ;;  %v5937_v38 = vpop.f32.mrf.mxu2  ;;  %v10025_v62 = vld [vmem:[%s15256_s7 + $0x960] sm:$0xf0]  ;;  %v5874_v19 = vpop.f32.mrf.mxu1  ;;  %v9192_v4 = vor.u32 %v10119_v30, %v9189_v27  ;;  %v10074_v30 = vld [vmem:[%s15256_s7 + $0xae8] sm:$0xf0] }
 0x399   :  { %6202 = vmatpush.bf16.msrb.mxu3 %v8916_v24  ;;  %v5938_v24 = vadd.f32 %v5937_v38, %v3198_v58  ;;  %v8804_v7 = vor.u32 %v10025_v62, %v8803_v61  ;;  %v5860_v38 = vadd.f32 %v14809_v48, %v14658_v21  ;;  %v9941_v21 = vld [vmem:[%s15256_s7 + $0x6c0] sm:$0xf0]  ;;  %v9906_v27 = vld [vmem:[%s15256_s7 + $0x5a8] sm:$0xf0] }
 0x39a   :  { %6189 = vmatpush.bf16.msrb.mxu2 %v8692_v42  ;;  %v8860_v42 = vor.u32 %v10039_v41, %v8859_v34  ;;  %v9843_v34 = vld [vmem:[%s15256_s7 + $0x3b0] sm:$0xf0]  ;;  %v9913_v19 = vld [vmem:[%s15256_s7 + $0x5e0] sm:$0xf0] }
 0x39b   :  { %v15061_v18 = vadd.f32 %v5950_v6, %v5938_v24  ;;  %v8076_v43 = vor.u32 %v9843_v34, %v8075_v32  ;;  %v5873_v48 = vadd.f32 %v15009_v13, %v5860_v38  ;;  %v8439_v13 = vld [vmem:[%s15256_s7 + $0x670] sm:$0xf]  ;;  %v8383_v24 = vld [vmem:[%s15256_s7 + $0x600] sm:$0xf]  ;;  %v9899_v38 = vld [vmem:[%s15256_s7 + $0x570] sm:$0xf0] }
 0x39c   :  { %6164 = vmatpush.bf16.msrb.mxu0 %v8216_v16  ;;  %6125 = vmatpush.bf16.msra.mxu1 %v9332_v17  ;;  %v8775_v16 = vld [vmem:[%s15256_s7 + $0x910] sm:$0xf]  ;;  %v10018_v17 = vld [vmem:[%s15256_s7 + $0x928] sm:$0xf0] }
 0x39d   :  { %6203 = vmatpush.bf16.msrb.mxu3 %v8888_v14  ;;  %v8776_v41 = vor.u32 %v10018_v17, %v8775_v16  ;;  %v5886_v47 = vadd.f32 %v14796_v31, %v5873_v48  ;;  %v8411_v31 = vld [vmem:[%s15256_s7 + $0x638] sm:$0xf]  ;;  %v10081_v17 = vld [vmem:[%s15256_s7 + $0xb20] sm:$0xf0] }
 0x39e   :  { %6190 = vmatpush.bf16.msrb.mxu2 %v8664_v29  ;;  %v9857_v29 = vld [vmem:[%s15256_s7 + $0x420] sm:$0xf0] }
 0x39f   :  { %v8132_v2 = vor.u32 %v9857_v29, %v8131_v20  ;;  %v5952_v58 = vpop.f32.mrf.mxu3  ;;  %v9111_v29 = vld [vmem:[%s15256_s7 + $0xbb0] sm:$0xf]  ;;  %v5899_v61 = vadd.f32 %v14853_v11, %v5886_v47  ;;  %v9920_v11 = vld [vmem:[%s15256_s7 + $0x618] sm:$0xf0]  ;;  %v10165_v48 = vld [vmem:[%s15256_s7 + $0xdc0] sm:$0xf0] }
 0x3a0   :  { %6165 = vmatpush.bf16.msrb.mxu0 %v8188_v39  ;;  %6126 = vmatpush.bf16.msra.mxu1 %v9304_v40  ;;  %v5939_v12 = vpop.f32.mrf.mxu2  ;;  %v8747_v39 = vld [vmem:[%s15256_s7 + $0x8d8] sm:$0xf]  ;;  %v9167_v40 = vld [vmem:[%s15256_s7 + $0xc20] sm:$0xf] }
 0x3a1   :  { %6204 = vmatpush.bf16.msrb.mxu3 %v8860_v42  ;;  %v9948_v42 = vld [vmem:[%s15256_s7 + $0x6f8] sm:$0xf0]  ;;  %v9168_v44 = vor.u32 %v10116_v35, %v9167_v40  ;;  %v8748_v1 = vor.u32 %v10011_v25, %v8747_v39  ;;  %v9279_v47 = vld [vmem:[%s15256_s7 + $0xd00] sm:$0xf] }
 0x3a2   :  { %6191 = vmatpush.bf16.msrb.mxu2 %v8636_v3  ;;  %v9850_v3 = vld [vmem:[%s15256_s7 + $0x3e8] sm:$0xf0] }
 0x3a3   :  { %v8104_v14 = vor.u32 %v9850_v3, %v8103_v53  ;;  %v10088_v53 = vld [vmem:[%s15256_s7 + $0xb58] sm:$0xf0]  ;;  %v5821_v3 = vadd.f32 %v14807_v63, %v14647_v15  ;;  %v8384_v15 = vor.u32 %v9920_v11, %v8383_v24  ;;  %v9027_v63 = vld [vmem:[%s15256_s7 + $0xb08] sm:$0xf]  ;;  %v9223_v24 = vld [vmem:[%s15256_s7 + $0xc90] sm:$0xf] }
 0x3a4   :  { %6166 = vmatpush.bf16.msrb.mxu0 %v8160_v52  ;;  %6127 = vmatpush.bf16.msra.mxu1 %v9276_v55  ;;  %v10109_v52 = vld [vmem:[%s15256_s7 + $0xc00] sm:$0xf0]  ;;  %v10130_v11 = vld [vmem:[%s15256_s7 + $0xca8] sm:$0xf0] }
 0x3a5   :  { %6205 = vmatpush.bf16.msrb.mxu3 %v8832_v57  ;;  %v9140_v55 = vor.u32 %v10109_v52, %v9139_v45  ;;  %v9934_v57 = vld [vmem:[%s15256_s7 + $0x688] sm:$0xf0]  ;;  %10178 = vtanh.f32 %v5821_v3 }
 0x3a6   :  { %6192 = vmatpush.bf16.msrb.mxu2 %v8608_v5  ;;  %v5913_v5 = vpop.f32.mrf.mxu0  ;;  %v8440_v59 = vor.u32 %v9934_v57, %v8439_v13  ;;  %v9307_v13 = vld [vmem:[%s15256_s7 + $0xd38] sm:$0xf] }
 0x3a8   :  { %6167 = vmatpush.bf16.msrb.mxu0 %v8132_v2  ;;  %6128 = vmatpush.bf16.msra.mxu1 %v9248_v46  ;;  %v9055_v46 = vld [vmem:[%s15256_s7 + $0xb40] sm:$0xf] }
 0x3a9   :  { %6206 = vmatpush.bf16.msrb.mxu3 %v8804_v7  ;;  %v9056_v12 = vor.u32 %v10088_v53, %v9055_v46 }
 0x3aa   :  { %6193 = vmatpush.bf16.msrb.mxu2 %v8580_v37  ;;  %v8495_v37 = vld [vmem:[%s15256_s7 + $0x6e0] sm:$0xf] }
 0x3ab   :  { %v8496_v10 = vor.u32 %v9948_v42, %v8495_v37  ;;  %v8971_v42 = vld [vmem:[%s15256_s7 + $0xa98] sm:$0xf] }
 0x3ac   :  { %6168 = vmatpush.bf16.msrb.mxu0 %v8104_v14  ;;  %6129 = vmatpush.bf16.msra.mxu1 %v9220_v28  ;;  %v8999_v14 = vld [vmem:[%s15256_s7 + $0xad0] sm:$0xf] }
 0x3ad   :  { %6207 = vmatpush.bf16.msrb.mxu3 %v8776_v41  ;;  %v8327_v28 = vld [vmem:[%s15256_s7 + $0x590] sm:$0xf]  ;;  %v10179_v41 = vpop.eup %10178  ;;  %v9000_v35 = vor.u32 %v10074_v30, %v8999_v14 }
 0x3ae   :  { %6194 = vmatpush.bf16.msrb.mxu2 %v8552_v26  ;;  %v10102_v26 = vld [vmem:[%s15256_s7 + $0xbc8] sm:$0xf0]  ;;  %v8328_v37 = vor.u32 %v9906_v27, %v8327_v28 }
 0x3af   :  { %v9112_v56 = vor.u32 %v10102_v26, %v9111_v29  ;;  %v10158_v29 = vld [vmem:[%s15256_s7 + $0xd88] sm:$0xf0] }
 0x3b0   :  { %6169 = vmatpush.bf16.msrb.mxu0 %v8076_v43  ;;  %6130 = vmatpush.bf16.msra.mxu1 %v9192_v4  ;;  %v5924_v8 = vpop.f32.mrf.mxu1  ;;  %v5963_v60 = vpop.f32.mrf.mxu0  ;;  %v10067_v43 = vld [vmem:[%s15256_s7 + $0xab0] sm:$0xf0] }
 0x3b1   :  { %6208 = vmatpush.bf16.msrb.mxu3 %v8748_v1  ;;  %v5964_v16 = vadd.f32 %v5963_v60, %v15061_v18  ;;  %v9028_v18 = vor.u32 %v10081_v17, %v9027_v63  ;;  %v9391_v1 = vld [vmem:[%s15256_s7 + $0xde0] sm:$0xf]  ;;  %v8972_v45 = vor.u32 %v10067_v43, %v8971_v42  ;;  %v10123_v63 = vld [vmem:[%s15256_s7 + $0xc70] sm:$0xf0] }
 0x3b2   :  { %6195 = vmatpush.bf16.msrb.mxu2 %v8524_v0  ;;  %v5912_v0 = vadd.f32 %v15011_v49, %v5899_v61  ;;  %v8355_v49 = vld [vmem:[%s15256_s7 + $0x5c8] sm:$0xf] }
 0x3b3   :  { %6170 = vmatmul.bf16.vlgmr.msrb.gmra.mxu0 %v12671_v50  ;;  %6131 = vmatmul.bf16.vlgmr.msra.gmra.mxu1 %v13280_v51  ;;  %v9083_v50 = vld [vmem:[%s15256_s7 + $0xb78] sm:$0xf]  ;;  %v8356_v5 = vor.u32 %v9913_v19, %v8355_v49  ;;  %v9251_v61 = vld [vmem:[%s15256_s7 + $0xcc8] sm:$0xf] }
 0x3b4   :  { %6214 = vmatpush.bf16.msra.mxu0 %v9168_v44  ;;  %6175 = vmatpush.bf16.msrb.mxu1 %v8496_v10  ;;  %v9084_v62 = vor.u32 %v10095_v23, %v9083_v50  ;;  %v5925_v6 = vadd.f32 %v5924_v8, %v5912_v0  ;;  %v8299_v44 = vld [vmem:[%s15256_s7 + $0x558] sm:$0xf]  ;;  %v10172_v10 = vld [vmem:[%s15256_s7 + $0xdf8] sm:$0xf0] }
 0x3b5   :  { %6196 = vmatmul.bf16.vlgmr.msrb.gmra.mxu2 %v12759_v22  ;;  %v8467_v22 = vld [vmem:[%s15256_s7 + $0x6a8] sm:$0xf]  ;;  %6209 = vmatmul.bf16.vlgmr.msrb.gmra.mxu3 %v12955_v33  ;;  %v9927_v33 = vld [vmem:[%s15256_s7 + $0x650] sm:$0xf0]  ;;  %v8300_v52 = vor.u32 %v9899_v38, %v8299_v44  ;;  %v9392_v58 = vor.u32 %v10172_v10, %v9391_v1 }
 0x3b6   :  { %v8468_v20 = vor.u32 %v9941_v21, %v8467_v22  ;;  %v8412_v2 = vor.u32 %v9927_v33, %v8411_v31  ;;  %10180 = vtanh.f32 %v5925_v6  ;;  %v9363_v21 = vld [vmem:[%s15256_s7 + $0xda8] sm:$0xf]  ;;  %v3199_v33 = vperm.slane %v15016_v54, 5 }
 0x3b8   :  { %6215 = vmatpush.bf16.msra.mxu0 %v9140_v55  ;;  %6176 = vmatpush.bf16.msrb.mxu1 %v8468_v20  ;;  %v15153_v7 = vpop.f32.mrf.mxu2  ;;  %v5926_v39 = vpop.f32.mrf.mxu1  ;;  %v9364_v55 = vor.u32 %v10165_v48, %v9363_v21  ;;  %v9335_v20 = vld [vmem:[%s15256_s7 + $0xd70] sm:$0xf] }
 0x3b9   :  { %v6002_v34 = vpop.f32.mrf.mxu3  ;;  %v5965_v40 = vpop.f32.mrf.mxu0  ;;  %v9336_v26 = vor.u32 %v10158_v29, %v9335_v20 }
 0x3ba   :  { %v3200_v40 = vperm.slane %v15016_v54, 6 }
 0x3bc   :  { %6216 = vmatpush.bf16.msra.mxu0 %v9112_v56  ;;  %6177 = vmatpush.bf16.msrb.mxu1 %v8440_v59  ;;  %v10181_v25 = vpop.eup %10180 }
 0x3bd   :  { %v6248_v4 = vpack.c.bf16 %v10181_v25, %v10179_v41 }
 0x3bf   :  { %6252 = vst [vmem:[#allocation2 + $0x8] sm:$0xff] %v6248_v4 }
 0x3c0   :  { %6217 = vmatpush.bf16.msra.mxu0 %v9084_v62  ;;  %6178 = vmatpush.bf16.msrb.mxu1 %v8412_v2  ;;  %v5991_v32 = vpop.f32.mrf.mxu2  ;;  %v10137_v62 = vld [vmem:[%s15256_s7 + $0xce0] sm:$0xf0] }
 0x3c1   :  { %v6004_v22 = vpop.f32.mrf.mxu3  ;;  %v9252_v53 = vor.u32 %v10137_v62, %v9251_v61 }
 0x3c4   :  { %6218 = vmatpush.bf16.msra.mxu0 %v9056_v12  ;;  %6179 = vmatpush.bf16.msrb.mxu1 %v8384_v15  ;;  %v9195_v15 = vld [vmem:[%s15256_s7 + $0xc58] sm:$0xf] }
 0x3c5   :  { %v9196_v17 = vor.u32 %v10123_v63, %v9195_v15 }
 0x3c8   :  { %6219 = vmatpush.bf16.msra.mxu0 %v9028_v18  ;;  %6180 = vmatpush.bf16.msrb.mxu1 %v8356_v5 }
 0x3cc   :  { %6220 = vmatpush.bf16.msra.mxu0 %v9000_v35  ;;  %6181 = vmatpush.bf16.msrb.mxu1 %v8328_v37 }
 0x3d0   :  { %6221 = vmatpush.bf16.msra.mxu0 %v8972_v45  ;;  %6182 = vmatpush.bf16.msrb.mxu1 %v8300_v52  ;;  %v5976_v59 = vpop.f32.mrf.mxu1  ;;  %v6015_v50 = vpop.f32.mrf.mxu0 }
 0x3d1   :  { %v5977_v23 = vadd.f32 %v5976_v59, %v5964_v16 }
 0x3d3   :  { %6222 = vmatmul.bf16.vlgmr.msra.gmra.mxu0 %v13123_v9  ;;  %6183 = vmatmul.bf16.vlgmr.msrb.gmra.mxu1 %v12649_v36  ;;  %v10151_v9 = vld [vmem:[%s15256_s7 + $0xd50] sm:$0xf0]  ;;  %v10144_v36 = vld [vmem:[%s15256_s7 + $0xd18] sm:$0xf0]  ;;  %v5990_v2 = vadd.f32 %v15153_v7, %v5977_v23  ;;  %v9224_v7 = vor.u32 %v10130_v11, %v9223_v24  ;;  %s10217_s7 = smov [#allocation2]  }
 0x3d4   :  { %6227 = vmatpush.bf16.msra.mxu1 %v9392_v58  ;;  %v9308_v57 = vor.u32 %v10151_v9, %v9307_v13  ;;  %v9280_v31 = vor.u32 %v10144_v36, %v9279_v47  ;;  %s6260_s15 = sshll.u32 %s10217_s7, 4  ;;  %s6261_s15 = int_to_ptr.vmem [resolvable:$true] %s6260_s15 }
 0x3d5   :  { %v6003_v46 = vadd.f32 %v6002_v34, %v5990_v2 }
 0x3d7   :  { %v6016_v0 = vadd.f32 %v6015_v50, %v6003_v46 }
 0x3d8   :  { %6228 = vmatpush.bf16.msra.mxu1 %v9364_v55  ;;  %v6041_v56 = vpop.f32.mrf.mxu2  ;;  %v5978_v6 = vpop.f32.mrf.mxu1 }
 0x3d9   :  { %v6042_v3 = vadd.f32 %v6041_v56, %v3199_v33  ;;  %v6054_v60 = vpop.f32.mrf.mxu3  ;;  %v6017_v16 = vpop.f32.mrf.mxu0 }
 0x3db   :  { %v6055_v12 = vadd.f32 %v6054_v60, %v6042_v3 }
 0x3dc   :  { %6229 = vmatpush.bf16.msra.mxu1 %v9336_v26 }
 0x3e0   :  { %6230 = vmatpush.bf16.msra.mxu1 %v9308_v57  ;;  %v6043_v8 = vpop.f32.mrf.mxu2 }
 0x3e1   :  { %v6056_v49 = vpop.f32.mrf.mxu3 }
 0x3e4   :  { %6231 = vmatpush.bf16.msra.mxu1 %v9280_v31 }
 0x3e8   :  { %6232 = vmatpush.bf16.msra.mxu1 %v9252_v53 }
 0x3ec   :  { %6233 = vmatpush.bf16.msra.mxu1 %v9224_v7 }
 0x3f0   :  { %6234 = vmatpush.bf16.msra.mxu1 %v9196_v17  ;;  %v6028_v18 = vpop.f32.mrf.mxu1  ;;  %v6067_v5 = vpop.f32.mrf.mxu0 }
 0x3f1   :  { %v6029_v45 = vadd.f32 %v6028_v18, %v6016_v0 }
 0x3f3   :  { %6235 = vmatmul.bf16.vlgmr.msra.gmra.mxu1 %v13280_v51  ;;  %v6068_v51 = vadd.f32 %v6067_v5, %v6055_v12  ;;  %10182 = vtanh.f32 %v6029_v45 }
 0x3f8   :  { %v6093_v19 = vpop.f32.mrf.mxu2  ;;  %v6030_v28 = vpop.f32.mrf.mxu1 }
 0x3f9   :  { %v6106_v30 = vpop.f32.mrf.mxu3  ;;  %v6069_v27 = vpop.f32.mrf.mxu0 }
 0x3fa   :  { %v10183_v20 = vpop.eup %10182 }
 0x400   :  { %v6095_v14 = vpop.f32.mrf.mxu2 }
 0x401   :  { %v6108_v32 = vpop.f32.mrf.mxu3 }
 0x410   :  { %v6080_v41 = vpop.f32.mrf.mxu1  ;;  %v6119_v39 = vpop.f32.mrf.mxu0 }
 0x411   :  { %v6081_v38 = vadd.f32 %v6080_v41, %v6068_v51 }
 0x413   :  { %v6094_v1 = vadd.f32 %v6093_v19, %v6081_v38 }
 0x415   :  { %v6107_v10 = vadd.f32 %v6106_v30, %v6094_v1 }
 0x417   :  { %v6120_v52 = vadd.f32 %v6119_v39, %v6107_v10 }
 0x418   :  { %v6145_v34 = vpop.f32.mrf.mxu2  ;;  %v6082_v43 = vpop.f32.mrf.mxu1 }
 0x419   :  { %v6146_v35 = vadd.f32 %v6145_v34, %v3200_v40  ;;  %v6158_v37 = vpop.f32.mrf.mxu3  ;;  %v6121_v4 = vpop.f32.mrf.mxu0 }
 0x41b   :  { %v6159_v42 = vadd.f32 %v6158_v37, %v6146_v35 }
 0x420   :  { %v6147_v25 = vpop.f32.mrf.mxu2 }
 0x421   :  { %v6160_v44 = vpop.f32.mrf.mxu3 }
 0x430   :  { %v6171_v22 = vpop.f32.mrf.mxu0  ;;  %v6132_v21 = vpop.f32.mrf.mxu1 }
 0x431   :  { %v6133_v48 = vadd.f32 %v6132_v21, %v6120_v52  ;;  %v6172_v50 = vadd.f32 %v6171_v22, %v6159_v42 }
 0x433   :  { %10184 = vtanh.f32 %v6133_v48 }
 0x438   :  { %v6197_v58 = vpop.f32.mrf.mxu2  ;;  %v6210_v55 = vpop.f32.mrf.mxu3 }
 0x439   :  { %v6134_v29 = vpop.f32.mrf.mxu1  ;;  %v6173_v26 = vpop.f32.mrf.mxu0 }
 0x43a   :  { %v10185_v13 = vpop.eup %10184 }
 0x43b   :  { %v6249_v9 = vpack.c.bf16 %v10185_v13, %v10183_v20 }
 0x43d   :  { %6253 = vst [vmem:[#allocation2 + $0x10] sm:$0xff] %v6249_v9 }
 0x440   :  { %v6199_v54 = vpop.f32.mrf.mxu2  ;;  %v6212_v57 = vpop.f32.mrf.mxu3 }
 0x450   :  { %v6223_v47 = vpop.f32.mrf.mxu0  ;;  %v6184_v36 = vpop.f32.mrf.mxu1 }
 0x451   :  { %v6185_v23 = vadd.f32 %v6184_v36, %v6172_v50 }
 0x453   :  { %v6198_v31 = vadd.f32 %v6197_v58, %v6185_v23 }
 0x455   :  { %v6211_v33 = vadd.f32 %v6210_v55, %v6198_v31 }
 0x457   :  { %v6224_v61 = vadd.f32 %v6223_v47, %v6211_v33 }
 0x458   :  { %v6225_v56 = vpop.f32.mrf.mxu0  ;;  %v6186_v59 = vpop.f32.mrf.mxu1 }
 0x470   :  { %v6236_v62 = vpop.f32.mrf.mxu1 }
 0x471   :  { %v6237_v2 = vadd.f32 %v6236_v62, %v6224_v61 }
 0x473   :  { %10186 = vtanh.f32 %v6237_v2 }
 0x478   :  { %v6238_v46 = vpop.f32.mrf.mxu1 }
 0x479   :  { %v10187_v53 = vpop.eup %10186 }
 0x47a   :  { %v6250_v3 = vpack.c.bf16 %v10187_v53, %v10187_v53 }
 0x47c   :  { %6254 = vst [vmem:[#allocation2 + $0x18] sm:$0xf] %v6250_v3 }
 0x47d   :  { %6265 = dma.vmem_to_hbm [thread:$0]  %s6261_s15, 448, %s6263_s18, [#allocation3]  }
 0x47e   :  { %10215 = dma.done.wait [#allocation3], 448  }
 0x47f   :  { %10216 = vsyncadd [#allocation3], 4294966848 }
 0x480   :  { %6270 = vsyncpa [#allocation3], 1 }

</bundles_post_ra>
